<compile_context>
chip_gen: v7x
topology: tpu7x:2x2x1
jax: 0.10.0
libtpu: 0.0.40
codegen_flags: <defaults>
</compile_context>

<pallas_src>
import math

import jax
import jax.numpy as jnp
from jax import lax
from jax.experimental import pallas as pl
from jax.experimental.pallas import tpu as pltpu

DIM = 32          # transformer dim (divisible by 8 heads)
OUTERDIM = 64     # input feature dim
N_CLASSES = 4
N_HEADS = 8
HEAD_DIM = DIM // N_HEADS
EPS = 1e-5

WCOLS = 3 * DIM   # lane width of the packed parameter slabs (widest tensor = qkv: 96)

# row offsets into the packed bf16 matrix slab (all matrices stored pre-transposed,
# i.e. ready for  x @ W  with x on the left)
MAT_FC1 = 0                         # [OUTERDIM, DIM]
MAT_QKV1 = MAT_FC1 + OUTERDIM       # [DIM, 3*DIM]
MAT_OP1 = MAT_QKV1 + DIM            # [DIM, DIM]
MAT_QKV2 = MAT_OP1 + DIM            # [DIM, 3*DIM]
MAT_OP2 = MAT_QKV2 + DIM            # [DIM, DIM]
MAT_FC2 = MAT_OP2 + DIM             # [DIM, N_CLASSES]
MAT_ROWS = MAT_FC2 + DIM            # 224

# row indices into the packed f32 vector slab
VEC_FC1B, VEC_CLS = 0, 1
VEC_LN1W, VEC_LN1B, VEC_QKV1B, VEC_OP1B = 2, 3, 4, 5
VEC_LN2W, VEC_LN2B, VEC_QKV2B, VEC_OP2B = 6, 7, 8, 9
VEC_LNFW, VEC_LNFB, VEC_FC2B = 10, 11, 12
VEC_ROWS = 13

# dot_general dimension numbers for A @ B^T (contract the last dim of both operands);
# MXU consumes the transposed-rhs contraction natively (same pattern as the flash kernels),
# so no explicit XLU transpose is emitted.
_DOT_TN = (((1,), (1,)), ((), ()))


# ---------------------------------------------------------------------------
# In-kernel helpers (traced inside the Pallas kernel body).
# ---------------------------------------------------------------------------
def _layer_norm(x, w, b):
    # x: [S, E] f32; w/b: [1, E] f32  (nn.LayerNorm, eps=1e-5)
    mu = jnp.mean(x, axis=-1, keepdims=True)
    var = jnp.mean((x - mu) ** 2, axis=-1, keepdims=True)
    return (x - mu) * lax.rsqrt(var + EPS) * w + b


def _mha(x, qkv_wT, qkv_b, op_wT, op_b, s_scr, sm_dtype):
    # nn.MultiheadAttention(dim, 8, batch_first=True), q=k=v=x, inference (dropout off).
    # x: [S, E] f32; qkv_wT: [E, 3E] bf16; op_wT: [E, E] bf16; biases: [1, *] f32.
    S, E = x.shape
    qkv = jnp.dot(x.astype(jnp.bfloat16), qkv_wT,
                  preferred_element_type=jnp.float32) + qkv_b          # [S, 3E] f32
    scale = 1.0 / math.sqrt(HEAD_DIM)
    q = (qkv[:, :E] * scale).astype(jnp.bfloat16)                      # scale hoisted
    k = qkv[:, E:2 * E].astype(jnp.bfloat16)
    v = qkv[:, 2 * E:].astype(jnp.bfloat16)

    acc = None                                                         # fused out-proj accumulator
    for h in range(N_HEADS):                                           # static unroll (8)
        lo, hi = h * HEAD_DIM, (h + 1) * HEAD_DIM
        # Stage the [S,S] score plane through one reused VMEM scratch: the WAR
        # dependency on s_scr bounds live [S,S] temporaries to ~1-2 planes.
        s_scr[...] = lax.dot_general(q[:, lo:hi], k[:, lo:hi], _DOT_TN,
                                     preferred_element_type=sm_dtype)  # [S, S]
        s = s_scr[...]
        m = jnp.max(s, axis=-1, keepdims=True)
        p = jnp.exp(s - m)                                             # UNNORMALISED probs
        l = jnp.sum(p.astype(jnp.float32), axis=-1, keepdims=True)     # row-sum in f32
        pv = jnp.dot(p.astype(jnp.bfloat16), v[:, lo:hi],
                     preferred_element_type=jnp.float32)               # [S, HEAD_DIM]
        # Deferred softmax normalisation: scale the tiny PV result, not the [S,S] plane.
        yh = pv * pl.reciprocal(l, approx=True)
        # Fold the output projection per head (MXU is ~idle at K=4); avoids a
        # concatenated-heads scratch and its masked 4-lane stores.
        contrib = jnp.dot(yh.astype(jnp.bfloat16), op_wT[lo:hi, :],
                          preferred_element_type=jnp.float32)          # [S, E]
        acc = contrib if acc is None else acc + contrib
    return acc + op_b


# ---------------------------------------------------------------------------
# Fused Pallas kernel: fc1 -> pad -> cls -> 2x TransLayer -> LN -> fc2
# ---------------------------------------------------------------------------
def _make_kernel(N, S, add_length, sm_dtype):
    def kernel(data_ref, wmat_ref, vec_ref, out_ref, x_scr, s_scr):
        # data_ref: [1, N, OUTERDIM] bf16 ; wmat_ref: [MAT_ROWS, WCOLS] bf16
        # vec_ref : [VEC_ROWS, WCOLS] f32 ; out_ref : [1, 1, N_CLASSES] f32
        # x_scr: VMEM [S, DIM] f32 ; s_scr: VMEM [S, S] sm_dtype (reused across heads/layers)
        def mat(off, rows, cols):
            return wmat_ref[off:off + rows, 0:cols]        # bf16, already transposed

        def vrow(r, cols):
            return vec_ref[r:r + 1, 0:cols]                # [1, cols] f32

        # ---- _fc1: Linear(OUTERDIM -> DIM) + ReLU (bf16 MXU / f32 acc) ----
        h = jnp.dot(data_ref[0], mat(MAT_FC1, OUTERDIM, DIM),
                    preferred_element_type=jnp.float32) + vrow(VEC_FC1B, DIM)
        h = jnp.maximum(h, 0.0)                                         # [N, DIM]

        # ---- token assembly (attention has no mask / positional info, so ordering
        #      is free): rows [0,N) real tokens (aligned bulk store), [N,S-1) padding,
        #      row S-1 the cls token ----
        x_scr[0:N, :] = h
        if add_length > 0:
            x_scr[N:S - 1, :] = h[:add_length, :]
        x_scr[S - 1:S, :] = vrow(VEC_CLS, DIM)
        x = x_scr[...]                                                  # [S, DIM]

        # ---- layer1 / layer2: x = x + MHA(LN(x)) ----
        x = x + _mha(_layer_norm(x, vrow(VEC_LN1W, DIM), vrow(VEC_LN1B, DIM)),
                     mat(MAT_QKV1, DIM, 3 * DIM), vrow(VEC_QKV1B, 3 * DIM),
                     mat(MAT_OP1, DIM, DIM), vrow(VEC_OP1B, DIM), s_scr, sm_dtype)
        x = x + _mha(_layer_norm(x, vrow(VEC_LN2W, DIM), vrow(VEC_LN2B, DIM)),
                     mat(MAT_QKV2, DIM, 3 * DIM), vrow(VEC_QKV2B, 3 * DIM),
                     mat(MAT_OP2, DIM, DIM), vrow(VEC_OP2B, DIM), s_scr, sm_dtype)

        # ---- final LN on the cls token (last row) + _fc2 ----
        cls = _layer_norm(x[S - 1:S, :], vrow(VEC_LNFW, DIM), vrow(VEC_LNFB, DIM))
        logits = jnp.dot(cls.astype(jnp.bfloat16), mat(MAT_FC2, DIM, N_CLASSES),
                         preferred_element_type=jnp.float32) + vrow(VEC_FC2B, N_CLASSES)
        out_ref[0] = logits                                             # [1, N_CLASSES]

    return kernel


# ---------------------------------------------------------------------------
# Host-side helpers: weight packing, chip-aware knobs
# ---------------------------------------------------------------------------
def pack_params(p):
    def padded(m):
        m = jnp.asarray(m, jnp.float32)
        return jnp.pad(m, ((0, 0), (0, WCOLS - m.shape[1])))

    wmat = jnp.concatenate([
        padded(p["fc1_w"].T),       # [OUTERDIM, DIM]
        padded(p["qkv1_w"].T),      # [DIM, 3*DIM]
        padded(p["op1_w"].T),       # [DIM, DIM]
        padded(p["qkv2_w"].T),
        padded(p["op2_w"].T),
        padded(p["fc2_w"].T),       # [DIM, N_CLASSES]
    ], axis=0).astype(jnp.bfloat16)                      # [MAT_ROWS, WCOLS] bf16

    vec = jnp.concatenate([
        padded(p["fc1_b"]), padded(p["cls"][0]),
        padded(p["ln1_w"]), padded(p["ln1_b"]), padded(p["qkv1_b"]), padded(p["op1_b"]),
        padded(p["ln2_w"]), padded(p["ln2_b"]), padded(p["qkv2_b"]), padded(p["op2_b"]),
        padded(p["lnf_w"]), padded(p["lnf_b"]), padded(p["fc2_b"]),
    ], axis=0)                                           # [VEC_ROWS, WCOLS] f32
    return wmat, vec


def _softmax_dtype():
    # bf16 VALU/EUP only exists on v6e (Trillium) and later; keep the softmax chain
    # in f32 on v2-v5 (and whenever detection fails). Row-sum/reciprocal stay f32 always.
    try:
        kind = jax.devices()[0].device_kind.lower()
    except Exception:
        return jnp.float32
    if any(t in kind for t in ("v2", "v3", "v4", "v5")):
        return jnp.float32
    if any(t in kind for t in ("v6", "v7", "trillium")):
        return jnp.bfloat16
    return jnp.float32


def _vmem_limit_bytes(N, S, sm_bytes):
    # Generation-aware cap: ~75% of physical VMEM (≈96 MiB on v5e/v6e, ≈48 MiB on v7x),
    # leaving headroom for the double-buffered bf16 input block, weight slabs and
    # internal scratch.
    try:
        cap = int(pltpu.get_tpu_info().vmem_capacity_bytes)
    except Exception:
        cap = 64 << 20                       # conservative (v7x-sized) fallback
    cap = max(cap, 64 << 20)
    # ~2 live [S,S] softmax planes + a handful of [S,DIM] f32 activations + input + weights.
    est = (2 * S * S * sm_bytes + 24 * S * DIM * 4 + 4 * N * OUTERDIM * 2
           + (MAT_ROWS * WCOLS * 2 + VEC_ROWS * WCOLS * 4) * 2 + (4 << 20))
    # TODO(synk): if est exceeds the cap (S >~ 1-2k) a flash-style KV-tiled softmax is needed.
    return int(min(max(est, 32 << 20), int(0.75 * cap)))


# ---------------------------------------------------------------------------
# Wrapper
# ---------------------------------------------------------------------------
def transmil_end_forward(data, p):
    # data: [B, N, OUTERDIM]  (== kwargs['data'] in the PyTorch module)
    B, N, F = data.shape
    assert F == OUTERDIM

    _H = int(math.ceil(math.sqrt(N)))
    add_length = _H * _H - N
    S = 1 + _H * _H

    sm_dtype = _softmax_dtype()
    wmat, vec = pack_params(p)
    # bf16 input: it is cast to bf16 for the fc1 MXU matmul anyway; halves the only
    # N-scaled HBM->VMEM DMA and its double-buffered VMEM footprint.
    data_bf16 = data.astype(jnp.bfloat16)

    out = pl.pallas_call(
        _make_kernel(N, S, add_length, sm_dtype),
        out_shape=jax.ShapeDtypeStruct((B, 1, N_CLASSES), jnp.float32),
        grid=(B,),
        in_specs=[
            pl.BlockSpec((1, N, OUTERDIM), lambda i: (i, 0, 0)),
            pl.BlockSpec((MAT_ROWS, WCOLS), lambda i: (0, 0)),
            pl.BlockSpec((VEC_ROWS, WCOLS), lambda i: (0, 0)),
        ],
        out_specs=pl.BlockSpec((1, 1, N_CLASSES), lambda i: (i, 0, 0)),
        scratch_shapes=[
            pltpu.VMEM((S, DIM), jnp.float32),   # residual-stream assembly buffer
            pltpu.VMEM((S, S), sm_dtype),        # single reused softmax score plane
        ],
        compiler_params=pltpu.CompilerParams(
            # bags shard across TensorCores (use B >= 2 per call on v7x megacore)
            dimension_semantics=("parallel",),
            vmem_limit_bytes=_vmem_limit_bytes(N, S, jnp.dtype(sm_dtype).itemsize),
        ),
    )(data_bf16, wmat, vec)
    return out[:, 0, :]                                  # [B, N_CLASSES]


# ---------------------------------------------------------------------------
# Deterministic parameter init (shapes follow TransMIL_End.__init__)
# ---------------------------------------------------------------------------
def init_params(key):
    keys = jax.random.split(key, 16)

    def nrm(k, shape, scale=0.05):
        return (scale * jax.random.normal(k, shape)).astype(jnp.float32)

    p = {
        "fc1_w": nrm(keys[0], (DIM, OUTERDIM)),
        "fc1_b": nrm(keys[1], (1, DIM)),
        "cls":   nrm(keys[2], (1, 1, DIM), scale=1.0),
        "lnf_w": jnp.ones((1, DIM), jnp.float32),
        "lnf_b": jnp.zeros((1, DIM), jnp.float32),
        "fc2_w": nrm(keys[3], (N_CLASSES, DIM)),
        "fc2_b": nrm(keys[4], (1, N_CLASSES)),
    }
    for i, off in ((1, 5), (2, 9)):
        p[f"ln{i}_w"] = jnp.ones((1, DIM), jnp.float32)
        p[f"ln{i}_b"] = jnp.zeros((1, DIM), jnp.float32)
        p[f"qkv{i}_w"] = nrm(keys[off + 0], (3 * DIM, DIM))
        p[f"qkv{i}_b"] = nrm(keys[off + 1], (1, 3 * DIM))
        p[f"op{i}_w"] = nrm(keys[off + 2], (DIM, DIM))
        p[f"op{i}_b"] = nrm(keys[off + 3], (1, DIM))
    return p


# ---------------------------------------------------------------------------
# Pure-JAX reference (mirrors PyTorch semantics).  bf16_matmuls=True mirrors the
# kernel's bf16 MXU operands (f32 accumulation) for a tighter numerical check.
# ---------------------------------------------------------------------------
def reference_forward(data, p, bf16_matmuls=False):
    cast = (lambda a: a.astype(jnp.bfloat16)) if bf16_matmuls else (lambda a: a)

    def mm(a, b):
        return jnp.dot(cast(a), cast(b), preferred_element_type=jnp.float32)

    data = data.astype(jnp.float32)
    B, N, _ = data.shape
    _H = int(math.ceil(math.sqrt(N)))
    add_length = _H * _H - N

    def ln(x, w, b):
        mu = jnp.mean(x, axis=-1, keepdims=True)
        var = jnp.mean((x - mu) ** 2, axis=-1, keepdims=True)
        return (x - mu) * lax.rsqrt(var + EPS) * w[0] + b[0]

    def mha(x, in_w, in_b, out_w, out_b):
        S, E = x.shape
        qkv = mm(x, in_w.T) + in_b[0]
        scale = 1.0 / math.sqrt(HEAD_DIM)
        q = qkv[:, :E] * scale
        k = qkv[:, E:2 * E]
        v = qkv[:, 2 * E:]
        heads = []
        for hh in range(N_HEADS):
            lo, hi = hh * HEAD_DIM, (hh + 1) * HEAD_DIM
            s = mm(q[:, lo:hi], k[:, lo:hi].T)
            a = jax.nn.softmax(s, axis=-1)
            heads.append(mm(a, v[:, lo:hi]))
        y = jnp.concatenate(heads, axis=-1)
        return mm(y, out_w.T) + out_b[0]

    def one(xd):
        h = jnp.maximum(mm(xd, p["fc1_w"].T) + p["fc1_b"][0], 0.0)
        h = jnp.concatenate([h, h[:add_length, :]], axis=0)
        x = jnp.concatenate([p["cls"][0], h], axis=0)
        x = x + mha(ln(x, p["ln1_w"], p["ln1_b"]),
                    p["qkv1_w"], p["qkv1_b"], p["op1_w"], p["op1_b"])
        x = x + mha(ln(x, p["ln2_w"], p["ln2_b"]),
                    p["qkv2_w"], p["qkv2_b"], p["op2_w"], p["op2_b"])
        c = ln(x[0:1], p["lnf_w"], p["lnf_b"])
        return (mm(c, p["fc2_w"].T) + p["fc2_b"][0])[0]

    return jax.vmap(one)(data)


if __name__ == "__main__":
    key = jax.random.PRNGKey(0)
    k_param, k_data = jax.random.split(key)
    params = init_params(k_param)

    # data: [B=2, N=8 tokens, OUTERDIM=64]  ->  padded seq S = 1 + 9 = 10
    data = jax.random.normal(k_data, (2, 8, OUTERDIM), dtype=jnp.float32)

    logits = transmil_end_forward(data, params)
    logits = jax.block_until_ready(logits)
    assert logits.shape == (2, N_CLASSES)

    # tight check vs a reference that mirrors the kernel's bf16 MXU operands
    # (slightly looser when the v6e/v7x bf16 softmax chain is active)
    sm_bf16 = _softmax_dtype() == jnp.bfloat16
    tol = 2.5e-2 if sm_bf16 else 8e-3
    ref_bf16 = reference_forward(data, params, bf16_matmuls=True)
    assert jnp.allclose(logits, ref_bf16, atol=tol, rtol=tol), (logits, ref_bf16)

    # looser check vs pure-f32 PyTorch semantics
    ref_f32 = reference_forward(data, params, bf16_matmuls=False)
    assert jnp.allclose(logits, ref_f32, atol=6e-2, rtol=6e-2), (logits, ref_f32)

    print("KERNEL_OK")
</pallas_src>

<mosaic_0001>
module attributes {stable_mosaic.version = 11 : i64} {
  func.func @kernel(%arg0: i32, %arg1: memref<1x8x64xbf16, #tpu.memory_space<vmem>>, %arg2: memref<224x96xbf16, #tpu.memory_space<vmem>>, %arg3: memref<13x96xf32, #tpu.memory_space<vmem>>, %arg4: memref<1x1x4xf32, #tpu.memory_space<vmem>>, %arg5: memref<10x32xf32, #tpu.memory_space<vmem>>, %arg6: memref<10x10xf32, #tpu.memory_space<vmem>>) attributes {dimension_semantics = [#tpu.dimension_semantics<parallel>], iteration_bounds = array<i64: 2>, scalar_prefetch = 0 : i64, scratch_operands = 2 : i64, tpu.core_type = #tpu.core_type<tc>, window_params = [{transform_indices = @transform_0, window_bounds = array<i64: 1, 8, 64>}, {pipeline_mode = #tpu.pipeline_mode<synchronous>, transform_indices = @transform_1, window_bounds = array<i64: 224, 96>}, {pipeline_mode = #tpu.pipeline_mode<synchronous>, transform_indices = @transform_2, window_bounds = array<i64: 13, 96>}, {transform_indices = @transform_3, window_bounds = array<i64: 1, 1, 4>}]} {
    %c0 = arith.constant 0 : index
    %c0_0 = arith.constant 0 : index
    %c0_1 = arith.constant 0 : index
    %0 = vector.load %arg1[%c0, %c0_0, %c0_1] : memref<1x8x64xbf16, #tpu.memory_space<vmem>>, vector<1x8x64xbf16>
    %1 = vector.shape_cast %0 : vector<1x8x64xbf16> to vector<8x64xbf16>
    %c0_2 = arith.constant 0 : index
    %c0_3 = arith.constant 0 : index
    %2 = vector.load %arg2[%c0_2, %c0_3] : memref<224x96xbf16, #tpu.memory_space<vmem>>, vector<64x32xbf16>
    %cst = arith.constant dense<0.000000e+00> : vector<8x32xf32>
    %3 = tpu.matmul %1, %2, %cst {dimension_numbers = #tpu.dot_dimension_numbers<[1], [0], [0], [1], [0, 0, 1, 1], [], []>} : vector<8x64xbf16>, vector<64x32xbf16>, vector<8x32xf32> -> vector<8x32xf32>
    %c0_4 = arith.constant 0 : index
    %c0_5 = arith.constant 0 : index
    %4 = vector.load %arg3[%c0_4, %c0_5] : memref<13x96xf32, #tpu.memory_space<vmem>>, vector<1x32xf32>
    %5 = vector.broadcast %4 : vector<1x32xf32> to vector<8x32xf32>
    %6 = arith.addf %3, %5 : vector<8x32xf32>
    %cst_6 = arith.constant 0.000000e+00 : f32
    %7 = vector.broadcast %cst_6 : f32 to vector<8x32xf32>
    %8 = arith.maximumf %6, %7 : vector<8x32xf32>
    %c0_7 = arith.constant 0 : index
    %c0_8 = arith.constant 0 : index
    %9 = vector.load %arg5[%c0_7, %c0_8] : memref<10x32xf32, #tpu.memory_space<vmem>>, vector<8x32xf32>
    tpu.vector_store %arg5[%c0_7, %c0_8], %8 {strides = array<i32>} : memref<10x32xf32, #tpu.memory_space<vmem>>, vector<8x32xf32>,
    %10 = vector.extract_strided_slice %8 {offsets = [0, 0], sizes = [1, 32], strides = [1, 1]} : vector<8x32xf32> to vector<1x32xf32>
    %c8 = arith.constant 8 : index
    %c0_9 = arith.constant 0 : index
    %11 = vector.load %arg5[%c8, %c0_9] : memref<10x32xf32, #tpu.memory_space<vmem>>, vector<1x32xf32>
    tpu.vector_store %arg5[%c8, %c0_9], %10 {strides = array<i32>} : memref<10x32xf32, #tpu.memory_space<vmem>>, vector<1x32xf32>,
    %c1 = arith.constant 1 : index
    %c0_10 = arith.constant 0 : index
    %12 = vector.load %arg3[%c1, %c0_10] : memref<13x96xf32, #tpu.memory_space<vmem>>, vector<1x32xf32>
    %c9 = arith.constant 9 : index
    %c0_11 = arith.constant 0 : index
    %13 = vector.load %arg5[%c9, %c0_11] : memref<10x32xf32, #tpu.memory_space<vmem>>, vector<1x32xf32>
    tpu.vector_store %arg5[%c9, %c0_11], %12 {strides = array<i32>} : memref<10x32xf32, #tpu.memory_space<vmem>>, vector<1x32xf32>,
    %c0_12 = arith.constant 0 : index
    %c0_13 = arith.constant 0 : index
    %14 = vector.load %arg5[%c0_12, %c0_13] : memref<10x32xf32, #tpu.memory_space<vmem>>, vector<10x32xf32>
    %c2 = arith.constant 2 : index
    %c0_14 = arith.constant 0 : index
    %15 = vector.load %arg3[%c2, %c0_14] : memref<13x96xf32, #tpu.memory_space<vmem>>, vector<1x32xf32>
    %c3 = arith.constant 3 : index
    %c0_15 = arith.constant 0 : index
    %16 = vector.load %arg3[%c3, %c0_15] : memref<13x96xf32, #tpu.memory_space<vmem>>, vector<1x32xf32>
    %cst_16 = arith.constant dense<0.000000e+00> : vector<10xf32>
    %17 = vector.multi_reduction <add>, %14, %cst_16 [1] : vector<10x32xf32> to vector<10xf32>
    %18 = vector.shape_cast %17 : vector<10xf32> to vector<10x1xf32>
    %cst_17 = arith.constant 3.200000e+01 : f32
    %19 = vector.broadcast %cst_17 : f32 to vector<10x1xf32>
    %20 = arith.divf %18, %19 : vector<10x1xf32>
    %21 = vector.broadcast %20 : vector<10x1xf32> to vector<10x32xf32>
    %22 = arith.subf %14, %21 : vector<10x32xf32>
    %23 = arith.mulf %22, %22 : vector<10x32xf32>
    %cst_18 = arith.constant dense<0.000000e+00> : vector<10xf32>
    %24 = vector.multi_reduction <add>, %23, %cst_18 [1] : vector<10x32xf32> to vector<10xf32>
    %25 = vector.shape_cast %24 : vector<10xf32> to vector<10x1xf32>
    %cst_19 = arith.constant 3.200000e+01 : f32
    %26 = vector.broadcast %cst_19 : f32 to vector<10x1xf32>
    %27 = arith.divf %25, %26 : vector<10x1xf32>
    %28 = vector.broadcast %20 : vector<10x1xf32> to vector<10x32xf32>
    %29 = arith.subf %14, %28 : vector<10x32xf32>
    %cst_20 = arith.constant 9.99999974E-6 : f32
    %30 = vector.broadcast %cst_20 : f32 to vector<10x1xf32>
    %31 = arith.addf %27, %30 : vector<10x1xf32>
    %32 = math.rsqrt %31 : vector<10x1xf32>
    %33 = vector.broadcast %32 : vector<10x1xf32> to vector<10x32xf32>
    %34 = arith.mulf %29, %33 : vector<10x32xf32>
    %35 = vector.broadcast %15 : vector<1x32xf32> to vector<10x32xf32>
    %36 = arith.mulf %34, %35 : vector<10x32xf32>
    %37 = vector.broadcast %16 : vector<1x32xf32> to vector<10x32xf32>
    %38 = arith.addf %36, %37 : vector<10x32xf32>
    %c64 = arith.constant 64 : index
    %c0_21 = arith.constant 0 : index
    %39 = vector.load %arg2[%c64, %c0_21] : memref<224x96xbf16, #tpu.memory_space<vmem>>, vector<32x96xbf16>
    %c4 = arith.constant 4 : index
    %c0_22 = arith.constant 0 : index
    %40 = vector.load %arg3[%c4, %c0_22] : memref<13x96xf32, #tpu.memory_space<vmem>>, vector<1x96xf32>
    %c96 = arith.constant 96 : index
    %c0_23 = arith.constant 0 : index
    %41 = vector.load %arg2[%c96, %c0_23] : memref<224x96xbf16, #tpu.memory_space<vmem>>, vector<32x32xbf16>
    %c5 = arith.constant 5 : index
    %c0_24 = arith.constant 0 : index
    %42 = vector.load %arg3[%c5, %c0_24] : memref<13x96xf32, #tpu.memory_space<vmem>>, vector<1x32xf32>
    %43 = arith.truncf %38 : vector<10x32xf32> to vector<10x32xbf16>
    %cst_25 = arith.constant dense<0.000000e+00> : vector<10x96xf32>
    %44 = tpu.matmul %43, %39, %cst_25 {dimension_numbers = #tpu.dot_dimension_numbers<[1], [0], [0], [1], [0, 0, 1, 1], [], []>} : vector<10x32xbf16>, vector<32x96xbf16>, vector<10x96xf32> -> vector<10x96xf32>
    %45 = vector.broadcast %40 : vector<1x96xf32> to vector<10x96xf32>
    %46 = arith.addf %44, %45 : vector<10x96xf32>
    %47 = vector.extract_strided_slice %46 {offsets = [0, 0], sizes = [10, 32], strides = [1, 1]} : vector<10x96xf32> to vector<10x32xf32>
    %cst_26 = arith.constant 5.000000e-01 : f32
    %48 = vector.broadcast %cst_26 : f32 to vector<10x32xf32>
    %49 = arith.mulf %47, %48 : vector<10x32xf32>
    %50 = arith.truncf %49 : vector<10x32xf32> to vector<10x32xbf16>
    %51 = vector.extract_strided_slice %46 {offsets = [0, 32], sizes = [10, 32], strides = [1, 1]} : vector<10x96xf32> to vector<10x32xf32>
    %52 = arith.truncf %51 : vector<10x32xf32> to vector<10x32xbf16>
    %53 = vector.extract_strided_slice %46 {offsets = [0, 64], sizes = [10, 32], strides = [1, 1]} : vector<10x96xf32> to vector<10x32xf32>
    %54 = arith.truncf %53 : vector<10x32xf32> to vector<10x32xbf16>
    %55 = vector.extract_strided_slice %50 {offsets = [0, 0], sizes = [10, 4], strides = [1, 1]} : vector<10x32xbf16> to vector<10x4xbf16>
    %56 = vector.extract_strided_slice %52 {offsets = [0, 0], sizes = [10, 4], strides = [1, 1]} : vector<10x32xbf16> to vector<10x4xbf16>
    %cst_27 = arith.constant dense<0.000000e+00> : vector<10x10xf32>
    %57 = tpu.matmul %55, %56, %cst_27 {dimension_numbers = #tpu.dot_dimension_numbers<[1], [1], [0], [0], [0, 0, 1, 0], [], []>} : vector<10x4xbf16>, vector<10x4xbf16>, vector<10x10xf32> -> vector<10x10xf32>
    %c0_28 = arith.constant 0 : index
    %c0_29 = arith.constant 0 : index
    %58 = vector.load %arg6[%c0_28, %c0_29] : memref<10x10xf32, #tpu.memory_space<vmem>>, vector<10x10xf32>
    tpu.vector_store %arg6[%c0_28, %c0_29], %57 {strides = array<i32>} : memref<10x10xf32, #tpu.memory_space<vmem>>, vector<10x10xf32>,
    %c0_30 = arith.constant 0 : index
    %c0_31 = arith.constant 0 : index
    %59 = vector.load %arg6[%c0_30, %c0_31] : memref<10x10xf32, #tpu.memory_space<vmem>>, vector<10x10xf32>
    %cst_32 = arith.constant dense<0xFF800000> : vector<10xf32>
    %60 = vector.multi_reduction <maximumf>, %59, %cst_32 [1] : vector<10x10xf32> to vector<10xf32>
    %61 = vector.shape_cast %60 : vector<10xf32> to vector<10x1xf32>
    %62 = vector.broadcast %61 : vector<10x1xf32> to vector<10x10xf32>
    %63 = arith.subf %59, %62 : vector<10x10xf32>
    %64 = math.exp %63 : vector<10x10xf32>
    %cst_33 = arith.constant dense<0.000000e+00> : vector<10xf32>
    %65 = vector.multi_reduction <add>, %64, %cst_33 [1] : vector<10x10xf32> to vector<10xf32>
    %66 = vector.shape_cast %65 : vector<10xf32> to vector<10x1xf32>
    %67 = arith.truncf %64 : vector<10x10xf32> to vector<10x10xbf16>
    %68 = vector.extract_strided_slice %54 {offsets = [0, 0], sizes = [10, 4], strides = [1, 1]} : vector<10x32xbf16> to vector<10x4xbf16>
    %cst_34 = arith.constant dense<0.000000e+00> : vector<10x4xf32>
    %69 = tpu.matmul %67, %68, %cst_34 {dimension_numbers = #tpu.dot_dimension_numbers<[1], [0], [0], [1], [0, 0, 1, 1], [], []>} : vector<10x10xbf16>, vector<10x4xbf16>, vector<10x4xf32> -> vector<10x4xf32>
    %70 = tpu.reciprocal %66 {approx = true} : vector<10x1xf32> -> vector<10x1xf32>
    %71 = vector.broadcast %70 : vector<10x1xf32> to vector<10x4xf32>
    %72 = arith.mulf %69, %71 : vector<10x4xf32>
    %73 = arith.truncf %72 : vector<10x4xf32> to vector<10x4xbf16>
    %74 = vector.extract_strided_slice %41 {offsets = [0, 0], sizes = [4, 32], strides = [1, 1]} : vector<32x32xbf16> to vector<4x32xbf16>
    %cst_35 = arith.constant dense<0.000000e+00> : vector<10x32xf32>
    %75 = tpu.matmul %73, %74, %cst_35 {dimension_numbers = #tpu.dot_dimension_numbers<[1], [0], [0], [1], [0, 0, 1, 1], [], []>} : vector<10x4xbf16>, vector<4x32xbf16>, vector<10x32xf32> -> vector<10x32xf32>
    %76 = vector.extract_strided_slice %50 {offsets = [0, 4], sizes = [10, 4], strides = [1, 1]} : vector<10x32xbf16> to vector<10x4xbf16>
    %77 = vector.extract_strided_slice %52 {offsets = [0, 4], sizes = [10, 4], strides = [1, 1]} : vector<10x32xbf16> to vector<10x4xbf16>
    %cst_36 = arith.constant dense<0.000000e+00> : vector<10x10xf32>
    %78 = tpu.matmul %76, %77, %cst_36 {dimension_numbers = #tpu.dot_dimension_numbers<[1], [1], [0], [0], [0, 0, 1, 0], [], []>} : vector<10x4xbf16>, vector<10x4xbf16>, vector<10x10xf32> -> vector<10x10xf32>
    %c0_37 = arith.constant 0 : index
    %c0_38 = arith.constant 0 : index
    %79 = vector.load %arg6[%c0_37, %c0_38] : memref<10x10xf32, #tpu.memory_space<vmem>>, vector<10x10xf32>
    tpu.vector_store %arg6[%c0_37, %c0_38], %78 {strides = array<i32>} : memref<10x10xf32, #tpu.memory_space<vmem>>, vector<10x10xf32>,
    %c0_39 = arith.constant 0 : index
    %c0_40 = arith.constant 0 : index
    %80 = vector.load %arg6[%c0_39, %c0_40] : memref<10x10xf32, #tpu.memory_space<vmem>>, vector<10x10xf32>
    %cst_41 = arith.constant dense<0xFF800000> : vector<10xf32>
    %81 = vector.multi_reduction <maximumf>, %80, %cst_41 [1] : vector<10x10xf32> to vector<10xf32>
    %82 = vector.shape_cast %81 : vector<10xf32> to vector<10x1xf32>
    %83 = vector.broadcast %82 : vector<10x1xf32> to vector<10x10xf32>
    %84 = arith.subf %80, %83 : vector<10x10xf32>
    %85 = math.exp %84 : vector<10x10xf32>
    %cst_42 = arith.constant dense<0.000000e+00> : vector<10xf32>
    %86 = vector.multi_reduction <add>, %85, %cst_42 [1] : vector<10x10xf32> to vector<10xf32>
    %87 = vector.shape_cast %86 : vector<10xf32> to vector<10x1xf32>
    %88 = arith.truncf %85 : vector<10x10xf32> to vector<10x10xbf16>
    %89 = vector.extract_strided_slice %54 {offsets = [0, 4], sizes = [10, 4], strides = [1, 1]} : vector<10x32xbf16> to vector<10x4xbf16>
    %cst_43 = arith.constant dense<0.000000e+00> : vector<10x4xf32>
    %90 = tpu.matmul %88, %89, %cst_43 {dimension_numbers = #tpu.dot_dimension_numbers<[1], [0], [0], [1], [0, 0, 1, 1], [], []>} : vector<10x10xbf16>, vector<10x4xbf16>, vector<10x4xf32> -> vector<10x4xf32>
    %91 = tpu.reciprocal %87 {approx = true} : vector<10x1xf32> -> vector<10x1xf32>
    %92 = vector.broadcast %91 : vector<10x1xf32> to vector<10x4xf32>
    %93 = arith.mulf %90, %92 : vector<10x4xf32>
    %94 = arith.truncf %93 : vector<10x4xf32> to vector<10x4xbf16>
    %95 = vector.extract_strided_slice %41 {offsets = [4, 0], sizes = [4, 32], strides = [1, 1]} : vector<32x32xbf16> to vector<4x32xbf16>
    %cst_44 = arith.constant dense<0.000000e+00> : vector<10x32xf32>
    %96 = tpu.matmul %94, %95, %cst_44 {dimension_numbers = #tpu.dot_dimension_numbers<[1], [0], [0], [1], [0, 0, 1, 1], [], []>} : vector<10x4xbf16>, vector<4x32xbf16>, vector<10x32xf32> -> vector<10x32xf32>
    %97 = arith.addf %75, %96 : vector<10x32xf32>
    %98 = vector.extract_strided_slice %50 {offsets = [0, 8], sizes = [10, 4], strides = [1, 1]} : vector<10x32xbf16> to vector<10x4xbf16>
    %99 = vector.extract_strided_slice %52 {offsets = [0, 8], sizes = [10, 4], strides = [1, 1]} : vector<10x32xbf16> to vector<10x4xbf16>
    %cst_45 = arith.constant dense<0.000000e+00> : vector<10x10xf32>
    %100 = tpu.matmul %98, %99, %cst_45 {dimension_numbers = #tpu.dot_dimension_numbers<[1], [1], [0], [0], [0, 0, 1, 0], [], []>} : vector<10x4xbf16>, vector<10x4xbf16>, vector<10x10xf32> -> vector<10x10xf32>
    %c0_46 = arith.constant 0 : index
    %c0_47 = arith.constant 0 : index
    %101 = vector.load %arg6[%c0_46, %c0_47] : memref<10x10xf32, #tpu.memory_space<vmem>>, vector<10x10xf32>
    tpu.vector_store %arg6[%c0_46, %c0_47], %100 {strides = array<i32>} : memref<10x10xf32, #tpu.memory_space<vmem>>, vector<10x10xf32>,
    %c0_48 = arith.constant 0 : index
    %c0_49 = arith.constant 0 : index
    %102 = vector.load %arg6[%c0_48, %c0_49] : memref<10x10xf32, #tpu.memory_space<vmem>>, vector<10x10xf32>
    %cst_50 = arith.constant dense<0xFF800000> : vector<10xf32>
    %103 = vector.multi_reduction <maximumf>, %102, %cst_50 [1] : vector<10x10xf32> to vector<10xf32>
    %104 = vector.shape_cast %103 : vector<10xf32> to vector<10x1xf32>
    %105 = vector.broadcast %104 : vector<10x1xf32> to vector<10x10xf32>
    %106 = arith.subf %102, %105 : vector<10x10xf32>
    %107 = math.exp %106 : vector<10x10xf32>
    %cst_51 = arith.constant dense<0.000000e+00> : vector<10xf32>
    %108 = vector.multi_reduction <add>, %107, %cst_51 [1] : vector<10x10xf32> to vector<10xf32>
    %109 = vector.shape_cast %108 : vector<10xf32> to vector<10x1xf32>
    %110 = arith.truncf %107 : vector<10x10xf32> to vector<10x10xbf16>
    %111 = vector.extract_strided_slice %54 {offsets = [0, 8], sizes = [10, 4], strides = [1, 1]} : vector<10x32xbf16> to vector<10x4xbf16>
    %cst_52 = arith.constant dense<0.000000e+00> : vector<10x4xf32>
    %112 = tpu.matmul %110, %111, %cst_52 {dimension_numbers = #tpu.dot_dimension_numbers<[1], [0], [0], [1], [0, 0, 1, 1], [], []>} : vector<10x10xbf16>, vector<10x4xbf16>, vector<10x4xf32> -> vector<10x4xf32>
    %113 = tpu.reciprocal %109 {approx = true} : vector<10x1xf32> -> vector<10x1xf32>
    %114 = vector.broadcast %113 : vector<10x1xf32> to vector<10x4xf32>
    %115 = arith.mulf %112, %114 : vector<10x4xf32>
    %116 = arith.truncf %115 : vector<10x4xf32> to vector<10x4xbf16>
    %117 = vector.extract_strided_slice %41 {offsets = [8, 0], sizes = [4, 32], strides = [1, 1]} : vector<32x32xbf16> to vector<4x32xbf16>
    %cst_53 = arith.constant dense<0.000000e+00> : vector<10x32xf32>
    %118 = tpu.matmul %116, %117, %cst_53 {dimension_numbers = #tpu.dot_dimension_numbers<[1], [0], [0], [1], [0, 0, 1, 1], [], []>} : vector<10x4xbf16>, vector<4x32xbf16>, vector<10x32xf32> -> vector<10x32xf32>
    %119 = arith.addf %97, %118 : vector<10x32xf32>
    %120 = vector.extract_strided_slice %50 {offsets = [0, 12], sizes = [10, 4], strides = [1, 1]} : vector<10x32xbf16> to vector<10x4xbf16>
    %121 = vector.extract_strided_slice %52 {offsets = [0, 12], sizes = [10, 4], strides = [1, 1]} : vector<10x32xbf16> to vector<10x4xbf16>
    %cst_54 = arith.constant dense<0.000000e+00> : vector<10x10xf32>
    %122 = tpu.matmul %120, %121, %cst_54 {dimension_numbers = #tpu.dot_dimension_numbers<[1], [1], [0], [0], [0, 0, 1, 0], [], []>} : vector<10x4xbf16>, vector<10x4xbf16>, vector<10x10xf32> -> vector<10x10xf32>
    %c0_55 = arith.constant 0 : index
    %c0_56 = arith.constant 0 : index
    %123 = vector.load %arg6[%c0_55, %c0_56] : memref<10x10xf32, #tpu.memory_space<vmem>>, vector<10x10xf32>
    tpu.vector_store %arg6[%c0_55, %c0_56], %122 {strides = array<i32>} : memref<10x10xf32, #tpu.memory_space<vmem>>, vector<10x10xf32>,
    %c0_57 = arith.constant 0 : index
    %c0_58 = arith.constant 0 : index
    %124 = vector.load %arg6[%c0_57, %c0_58] : memref<10x10xf32, #tpu.memory_space<vmem>>, vector<10x10xf32>
    %cst_59 = arith.constant dense<0xFF800000> : vector<10xf32>
    %125 = vector.multi_reduction <maximumf>, %124, %cst_59 [1] : vector<10x10xf32> to vector<10xf32>
    %126 = vector.shape_cast %125 : vector<10xf32> to vector<10x1xf32>
    %127 = vector.broadcast %126 : vector<10x1xf32> to vector<10x10xf32>
    %128 = arith.subf %124, %127 : vector<10x10xf32>
    %129 = math.exp %128 : vector<10x10xf32>
    %cst_60 = arith.constant dense<0.000000e+00> : vector<10xf32>
    %130 = vector.multi_reduction <add>, %129, %cst_60 [1] : vector<10x10xf32> to vector<10xf32>
    %131 = vector.shape_cast %130 : vector<10xf32> to vector<10x1xf32>
    %132 = arith.truncf %129 : vector<10x10xf32> to vector<10x10xbf16>
    %133 = vector.extract_strided_slice %54 {offsets = [0, 12], sizes = [10, 4], strides = [1, 1]} : vector<10x32xbf16> to vector<10x4xbf16>
    %cst_61 = arith.constant dense<0.000000e+00> : vector<10x4xf32>
    %134 = tpu.matmul %132, %133, %cst_61 {dimension_numbers = #tpu.dot_dimension_numbers<[1], [0], [0], [1], [0, 0, 1, 1], [], []>} : vector<10x10xbf16>, vector<10x4xbf16>, vector<10x4xf32> -> vector<10x4xf32>
    %135 = tpu.reciprocal %131 {approx = true} : vector<10x1xf32> -> vector<10x1xf32>
    %136 = vector.broadcast %135 : vector<10x1xf32> to vector<10x4xf32>
    %137 = arith.mulf %134, %136 : vector<10x4xf32>
    %138 = arith.truncf %137 : vector<10x4xf32> to vector<10x4xbf16>
    %139 = vector.extract_strided_slice %41 {offsets = [12, 0], sizes = [4, 32], strides = [1, 1]} : vector<32x32xbf16> to vector<4x32xbf16>
    %cst_62 = arith.constant dense<0.000000e+00> : vector<10x32xf32>
    %140 = tpu.matmul %138, %139, %cst_62 {dimension_numbers = #tpu.dot_dimension_numbers<[1], [0], [0], [1], [0, 0, 1, 1], [], []>} : vector<10x4xbf16>, vector<4x32xbf16>, vector<10x32xf32> -> vector<10x32xf32>
    %141 = arith.addf %119, %140 : vector<10x32xf32>
    %142 = vector.extract_strided_slice %50 {offsets = [0, 16], sizes = [10, 4], strides = [1, 1]} : vector<10x32xbf16> to vector<10x4xbf16>
    %143 = vector.extract_strided_slice %52 {offsets = [0, 16], sizes = [10, 4], strides = [1, 1]} : vector<10x32xbf16> to vector<10x4xbf16>
    %cst_63 = arith.constant dense<0.000000e+00> : vector<10x10xf32>
    %144 = tpu.matmul %142, %143, %cst_63 {dimension_numbers = #tpu.dot_dimension_numbers<[1], [1], [0], [0], [0, 0, 1, 0], [], []>} : vector<10x4xbf16>, vector<10x4xbf16>, vector<10x10xf32> -> vector<10x10xf32>
    %c0_64 = arith.constant 0 : index
    %c0_65 = arith.constant 0 : index
    %145 = vector.load %arg6[%c0_64, %c0_65] : memref<10x10xf32, #tpu.memory_space<vmem>>, vector<10x10xf32>
    tpu.vector_store %arg6[%c0_64, %c0_65], %144 {strides = array<i32>} : memref<10x10xf32, #tpu.memory_space<vmem>>, vector<10x10xf32>,
    %c0_66 = arith.constant 0 : index
    %c0_67 = arith.constant 0 : index
    %146 = vector.load %arg6[%c0_66, %c0_67] : memref<10x10xf32, #tpu.memory_space<vmem>>, vector<10x10xf32>
    %cst_68 = arith.constant dense<0xFF800000> : vector<10xf32>
    %147 = vector.multi_reduction <maximumf>, %146, %cst_68 [1] : vector<10x10xf32> to vector<10xf32>
    %148 = vector.shape_cast %147 : vector<10xf32> to vector<10x1xf32>
    %149 = vector.broadcast %148 : vector<10x1xf32> to vector<10x10xf32>
    %150 = arith.subf %146, %149 : vector<10x10xf32>
    %151 = math.exp %150 : vector<10x10xf32>
    %cst_69 = arith.constant dense<0.000000e+00> : vector<10xf32>
    %152 = vector.multi_reduction <add>, %151, %cst_69 [1] : vector<10x10xf32> to vector<10xf32>
    %153 = vector.shape_cast %152 : vector<10xf32> to vector<10x1xf32>
    %154 = arith.truncf %151 : vector<10x10xf32> to vector<10x10xbf16>
    %155 = vector.extract_strided_slice %54 {offsets = [0, 16], sizes = [10, 4], strides = [1, 1]} : vector<10x32xbf16> to vector<10x4xbf16>
    %cst_70 = arith.constant dense<0.000000e+00> : vector<10x4xf32>
    %156 = tpu.matmul %154, %155, %cst_70 {dimension_numbers = #tpu.dot_dimension_numbers<[1], [0], [0], [1], [0, 0, 1, 1], [], []>} : vector<10x10xbf16>, vector<10x4xbf16>, vector<10x4xf32> -> vector<10x4xf32>
    %157 = tpu.reciprocal %153 {approx = true} : vector<10x1xf32> -> vector<10x1xf32>
    %158 = vector.broadcast %157 : vector<10x1xf32> to vector<10x4xf32>
    %159 = arith.mulf %156, %158 : vector<10x4xf32>
    %160 = arith.truncf %159 : vector<10x4xf32> to vector<10x4xbf16>
    %161 = vector.extract_strided_slice %41 {offsets = [16, 0], sizes = [4, 32], strides = [1, 1]} : vector<32x32xbf16> to vector<4x32xbf16>
    %cst_71 = arith.constant dense<0.000000e+00> : vector<10x32xf32>
    %162 = tpu.matmul %160, %161, %cst_71 {dimension_numbers = #tpu.dot_dimension_numbers<[1], [0], [0], [1], [0, 0, 1, 1], [], []>} : vector<10x4xbf16>, vector<4x32xbf16>, vector<10x32xf32> -> vector<10x32xf32>
    %163 = arith.addf %141, %162 : vector<10x32xf32>
    %164 = vector.extract_strided_slice %50 {offsets = [0, 20], sizes = [10, 4], strides = [1, 1]} : vector<10x32xbf16> to vector<10x4xbf16>
    %165 = vector.extract_strided_slice %52 {offsets = [0, 20], sizes = [10, 4], strides = [1, 1]} : vector<10x32xbf16> to vector<10x4xbf16>
    %cst_72 = arith.constant dense<0.000000e+00> : vector<10x10xf32>
    %166 = tpu.matmul %164, %165, %cst_72 {dimension_numbers = #tpu.dot_dimension_numbers<[1], [1], [0], [0], [0, 0, 1, 0], [], []>} : vector<10x4xbf16>, vector<10x4xbf16>, vector<10x10xf32> -> vector<10x10xf32>
    %c0_73 = arith.constant 0 : index
    %c0_74 = arith.constant 0 : index
    %167 = vector.load %arg6[%c0_73, %c0_74] : memref<10x10xf32, #tpu.memory_space<vmem>>, vector<10x10xf32>
    tpu.vector_store %arg6[%c0_73, %c0_74], %166 {strides = array<i32>} : memref<10x10xf32, #tpu.memory_space<vmem>>, vector<10x10xf32>,
    %c0_75 = arith.constant 0 : index
    %c0_76 = arith.constant 0 : index
    %168 = vector.load %arg6[%c0_75, %c0_76] : memref<10x10xf32, #tpu.memory_space<vmem>>, vector<10x10xf32>
    %cst_77 = arith.constant dense<0xFF800000> : vector<10xf32>
    %169 = vector.multi_reduction <maximumf>, %168, %cst_77 [1] : vector<10x10xf32> to vector<10xf32>
    %170 = vector.shape_cast %169 : vector<10xf32> to vector<10x1xf32>
    %171 = vector.broadcast %170 : vector<10x1xf32> to vector<10x10xf32>
    %172 = arith.subf %168, %171 : vector<10x10xf32>
    %173 = math.exp %172 : vector<10x10xf32>
    %cst_78 = arith.constant dense<0.000000e+00> : vector<10xf32>
    %174 = vector.multi_reduction <add>, %173, %cst_78 [1] : vector<10x10xf32> to vector<10xf32>
    %175 = vector.shape_cast %174 : vector<10xf32> to vector<10x1xf32>
    %176 = arith.truncf %173 : vector<10x10xf32> to vector<10x10xbf16>
    %177 = vector.extract_strided_slice %54 {offsets = [0, 20], sizes = [10, 4], strides = [1, 1]} : vector<10x32xbf16> to vector<10x4xbf16>
    %cst_79 = arith.constant dense<0.000000e+00> : vector<10x4xf32>
    %178 = tpu.matmul %176, %177, %cst_79 {dimension_numbers = #tpu.dot_dimension_numbers<[1], [0], [0], [1], [0, 0, 1, 1], [], []>} : vector<10x10xbf16>, vector<10x4xbf16>, vector<10x4xf32> -> vector<10x4xf32>
    %179 = tpu.reciprocal %175 {approx = true} : vector<10x1xf32> -> vector<10x1xf32>
    %180 = vector.broadcast %179 : vector<10x1xf32> to vector<10x4xf32>
    %181 = arith.mulf %178, %180 : vector<10x4xf32>
    %182 = arith.truncf %181 : vector<10x4xf32> to vector<10x4xbf16>
    %183 = vector.extract_strided_slice %41 {offsets = [20, 0], sizes = [4, 32], strides = [1, 1]} : vector<32x32xbf16> to vector<4x32xbf16>
    %cst_80 = arith.constant dense<0.000000e+00> : vector<10x32xf32>
    %184 = tpu.matmul %182, %183, %cst_80 {dimension_numbers = #tpu.dot_dimension_numbers<[1], [0], [0], [1], [0, 0, 1, 1], [], []>} : vector<10x4xbf16>, vector<4x32xbf16>, vector<10x32xf32> -> vector<10x32xf32>
    %185 = arith.addf %163, %184 : vector<10x32xf32>
    %186 = vector.extract_strided_slice %50 {offsets = [0, 24], sizes = [10, 4], strides = [1, 1]} : vector<10x32xbf16> to vector<10x4xbf16>
    %187 = vector.extract_strided_slice %52 {offsets = [0, 24], sizes = [10, 4], strides = [1, 1]} : vector<10x32xbf16> to vector<10x4xbf16>
    %cst_81 = arith.constant dense<0.000000e+00> : vector<10x10xf32>
    %188 = tpu.matmul %186, %187, %cst_81 {dimension_numbers = #tpu.dot_dimension_numbers<[1], [1], [0], [0], [0, 0, 1, 0], [], []>} : vector<10x4xbf16>, vector<10x4xbf16>, vector<10x10xf32> -> vector<10x10xf32>
    %c0_82 = arith.constant 0 : index
    %c0_83 = arith.constant 0 : index
    %189 = vector.load %arg6[%c0_82, %c0_83] : memref<10x10xf32, #tpu.memory_space<vmem>>, vector<10x10xf32>
    tpu.vector_store %arg6[%c0_82, %c0_83], %188 {strides = array<i32>} : memref<10x10xf32, #tpu.memory_space<vmem>>, vector<10x10xf32>,
    %c0_84 = arith.constant 0 : index
    %c0_85 = arith.constant 0 : index
    %190 = vector.load %arg6[%c0_84, %c0_85] : memref<10x10xf32, #tpu.memory_space<vmem>>, vector<10x10xf32>
    %cst_86 = arith.constant dense<0xFF800000> : vector<10xf32>
    %191 = vector.multi_reduction <maximumf>, %190, %cst_86 [1] : vector<10x10xf32> to vector<10xf32>
    %192 = vector.shape_cast %191 : vector<10xf32> to vector<10x1xf32>
    %193 = vector.broadcast %192 : vector<10x1xf32> to vector<10x10xf32>
    %194 = arith.subf %190, %193 : vector<10x10xf32>
    %195 = math.exp %194 : vector<10x10xf32>
    %cst_87 = arith.constant dense<0.000000e+00> : vector<10xf32>
    %196 = vector.multi_reduction <add>, %195, %cst_87 [1] : vector<10x10xf32> to vector<10xf32>
    %197 = vector.shape_cast %196 : vector<10xf32> to vector<10x1xf32>
    %198 = arith.truncf %195 : vector<10x10xf32> to vector<10x10xbf16>
    %199 = vector.extract_strided_slice %54 {offsets = [0, 24], sizes = [10, 4], strides = [1, 1]} : vector<10x32xbf16> to vector<10x4xbf16>
    %cst_88 = arith.constant dense<0.000000e+00> : vector<10x4xf32>
    %200 = tpu.matmul %198, %199, %cst_88 {dimension_numbers = #tpu.dot_dimension_numbers<[1], [0], [0], [1], [0, 0, 1, 1], [], []>} : vector<10x10xbf16>, vector<10x4xbf16>, vector<10x4xf32> -> vector<10x4xf32>
    %201 = tpu.reciprocal %197 {approx = true} : vector<10x1xf32> -> vector<10x1xf32>
    %202 = vector.broadcast %201 : vector<10x1xf32> to vector<10x4xf32>
    %203 = arith.mulf %200, %202 : vector<10x4xf32>
    %204 = arith.truncf %203 : vector<10x4xf32> to vector<10x4xbf16>
    %205 = vector.extract_strided_slice %41 {offsets = [24, 0], sizes = [4, 32], strides = [1, 1]} : vector<32x32xbf16> to vector<4x32xbf16>
    %cst_89 = arith.constant dense<0.000000e+00> : vector<10x32xf32>
    %206 = tpu.matmul %204, %205, %cst_89 {dimension_numbers = #tpu.dot_dimension_numbers<[1], [0], [0], [1], [0, 0, 1, 1], [], []>} : vector<10x4xbf16>, vector<4x32xbf16>, vector<10x32xf32> -> vector<10x32xf32>
    %207 = arith.addf %185, %206 : vector<10x32xf32>
    %208 = vector.extract_strided_slice %50 {offsets = [0, 28], sizes = [10, 4], strides = [1, 1]} : vector<10x32xbf16> to vector<10x4xbf16>
    %209 = vector.extract_strided_slice %52 {offsets = [0, 28], sizes = [10, 4], strides = [1, 1]} : vector<10x32xbf16> to vector<10x4xbf16>
    %cst_90 = arith.constant dense<0.000000e+00> : vector<10x10xf32>
    %210 = tpu.matmul %208, %209, %cst_90 {dimension_numbers = #tpu.dot_dimension_numbers<[1], [1], [0], [0], [0, 0, 1, 0], [], []>} : vector<10x4xbf16>, vector<10x4xbf16>, vector<10x10xf32> -> vector<10x10xf32>
    %c0_91 = arith.constant 0 : index
    %c0_92 = arith.constant 0 : index
    %211 = vector.load %arg6[%c0_91, %c0_92] : memref<10x10xf32, #tpu.memory_space<vmem>>, vector<10x10xf32>
    tpu.vector_store %arg6[%c0_91, %c0_92], %210 {strides = array<i32>} : memref<10x10xf32, #tpu.memory_space<vmem>>, vector<10x10xf32>,
    %c0_93 = arith.constant 0 : index
    %c0_94 = arith.constant 0 : index
    %212 = vector.load %arg6[%c0_93, %c0_94] : memref<10x10xf32, #tpu.memory_space<vmem>>, vector<10x10xf32>
    %cst_95 = arith.constant dense<0xFF800000> : vector<10xf32>
    %213 = vector.multi_reduction <maximumf>, %212, %cst_95 [1] : vector<10x10xf32> to vector<10xf32>
    %214 = vector.shape_cast %213 : vector<10xf32> to vector<10x1xf32>
    %215 = vector.broadcast %214 : vector<10x1xf32> to vector<10x10xf32>
    %216 = arith.subf %212, %215 : vector<10x10xf32>
    %217 = math.exp %216 : vector<10x10xf32>
    %cst_96 = arith.constant dense<0.000000e+00> : vector<10xf32>
    %218 = vector.multi_reduction <add>, %217, %cst_96 [1] : vector<10x10xf32> to vector<10xf32>
    %219 = vector.shape_cast %218 : vector<10xf32> to vector<10x1xf32>
    %220 = arith.truncf %217 : vector<10x10xf32> to vector<10x10xbf16>
    %221 = vector.extract_strided_slice %54 {offsets = [0, 28], sizes = [10, 4], strides = [1, 1]} : vector<10x32xbf16> to vector<10x4xbf16>
    %cst_97 = arith.constant dense<0.000000e+00> : vector<10x4xf32>
    %222 = tpu.matmul %220, %221, %cst_97 {dimension_numbers = #tpu.dot_dimension_numbers<[1], [0], [0], [1], [0, 0, 1, 1], [], []>} : vector<10x10xbf16>, vector<10x4xbf16>, vector<10x4xf32> -> vector<10x4xf32>
    %223 = tpu.reciprocal %219 {approx = true} : vector<10x1xf32> -> vector<10x1xf32>
    %224 = vector.broadcast %223 : vector<10x1xf32> to vector<10x4xf32>
    %225 = arith.mulf %222, %224 : vector<10x4xf32>
    %226 = arith.truncf %225 : vector<10x4xf32> to vector<10x4xbf16>
    %227 = vector.extract_strided_slice %41 {offsets = [28, 0], sizes = [4, 32], strides = [1, 1]} : vector<32x32xbf16> to vector<4x32xbf16>
    %cst_98 = arith.constant dense<0.000000e+00> : vector<10x32xf32>
    %228 = tpu.matmul %226, %227, %cst_98 {dimension_numbers = #tpu.dot_dimension_numbers<[1], [0], [0], [1], [0, 0, 1, 1], [], []>} : vector<10x4xbf16>, vector<4x32xbf16>, vector<10x32xf32> -> vector<10x32xf32>
    %229 = arith.addf %207, %228 : vector<10x32xf32>
    %230 = vector.broadcast %42 : vector<1x32xf32> to vector<10x32xf32>
    %231 = arith.addf %229, %230 : vector<10x32xf32>
    %232 = arith.addf %14, %231 : vector<10x32xf32>
    %c6 = arith.constant 6 : index
    %c0_99 = arith.constant 0 : index
    %233 = vector.load %arg3[%c6, %c0_99] : memref<13x96xf32, #tpu.memory_space<vmem>>, vector<1x32xf32>
    %c7 = arith.constant 7 : index
    %c0_100 = arith.constant 0 : index
    %234 = vector.load %arg3[%c7, %c0_100] : memref<13x96xf32, #tpu.memory_space<vmem>>, vector<1x32xf32>
    %cst_101 = arith.constant dense<0.000000e+00> : vector<10xf32>
    %235 = vector.multi_reduction <add>, %232, %cst_101 [1] : vector<10x32xf32> to vector<10xf32>
    %236 = vector.shape_cast %235 : vector<10xf32> to vector<10x1xf32>
    %cst_102 = arith.constant 3.200000e+01 : f32
    %237 = vector.broadcast %cst_102 : f32 to vector<10x1xf32>
    %238 = arith.divf %236, %237 : vector<10x1xf32>
    %239 = vector.broadcast %238 : vector<10x1xf32> to vector<10x32xf32>
    %240 = arith.subf %232, %239 : vector<10x32xf32>
    %241 = arith.mulf %240, %240 : vector<10x32xf32>
    %cst_103 = arith.constant dense<0.000000e+00> : vector<10xf32>
    %242 = vector.multi_reduction <add>, %241, %cst_103 [1] : vector<10x32xf32> to vector<10xf32>
    %243 = vector.shape_cast %242 : vector<10xf32> to vector<10x1xf32>
    %cst_104 = arith.constant 3.200000e+01 : f32
    %244 = vector.broadcast %cst_104 : f32 to vector<10x1xf32>
    %245 = arith.divf %243, %244 : vector<10x1xf32>
    %246 = vector.broadcast %238 : vector<10x1xf32> to vector<10x32xf32>
    %247 = arith.subf %232, %246 : vector<10x32xf32>
    %cst_105 = arith.constant 9.99999974E-6 : f32
    %248 = vector.broadcast %cst_105 : f32 to vector<10x1xf32>
    %249 = arith.addf %245, %248 : vector<10x1xf32>
    %250 = math.rsqrt %249 : vector<10x1xf32>
    %251 = vector.broadcast %250 : vector<10x1xf32> to vector<10x32xf32>
    %252 = arith.mulf %247, %251 : vector<10x32xf32>
    %253 = vector.broadcast %233 : vector<1x32xf32> to vector<10x32xf32>
    %254 = arith.mulf %252, %253 : vector<10x32xf32>
    %255 = vector.broadcast %234 : vector<1x32xf32> to vector<10x32xf32>
    %256 = arith.addf %254, %255 : vector<10x32xf32>
    %c128 = arith.constant 128 : index
    %c0_106 = arith.constant 0 : index
    %257 = vector.load %arg2[%c128, %c0_106] : memref<224x96xbf16, #tpu.memory_space<vmem>>, vector<32x96xbf16>
    %c8_107 = arith.constant 8 : index
    %c0_108 = arith.constant 0 : index
    %258 = vector.load %arg3[%c8_107, %c0_108] : memref<13x96xf32, #tpu.memory_space<vmem>>, vector<1x96xf32>
    %c160 = arith.constant 160 : index
    %c0_109 = arith.constant 0 : index
    %259 = vector.load %arg2[%c160, %c0_109] : memref<224x96xbf16, #tpu.memory_space<vmem>>, vector<32x32xbf16>
    %c9_110 = arith.constant 9 : index
    %c0_111 = arith.constant 0 : index
    %260 = vector.load %arg3[%c9_110, %c0_111] : memref<13x96xf32, #tpu.memory_space<vmem>>, vector<1x32xf32>
    %261 = arith.truncf %256 : vector<10x32xf32> to vector<10x32xbf16>
    %cst_112 = arith.constant dense<0.000000e+00> : vector<10x96xf32>
    %262 = tpu.matmul %261, %257, %cst_112 {dimension_numbers = #tpu.dot_dimension_numbers<[1], [0], [0], [1], [0, 0, 1, 1], [], []>} : vector<10x32xbf16>, vector<32x96xbf16>, vector<10x96xf32> -> vector<10x96xf32>
    %263 = vector.broadcast %258 : vector<1x96xf32> to vector<10x96xf32>
    %264 = arith.addf %262, %263 : vector<10x96xf32>
    %265 = vector.extract_strided_slice %264 {offsets = [0, 0], sizes = [10, 32], strides = [1, 1]} : vector<10x96xf32> to vector<10x32xf32>
    %cst_113 = arith.constant 5.000000e-01 : f32
    %266 = vector.broadcast %cst_113 : f32 to vector<10x32xf32>
    %267 = arith.mulf %265, %266 : vector<10x32xf32>
    %268 = arith.truncf %267 : vector<10x32xf32> to vector<10x32xbf16>
    %269 = vector.extract_strided_slice %264 {offsets = [0, 32], sizes = [10, 32], strides = [1, 1]} : vector<10x96xf32> to vector<10x32xf32>
    %270 = arith.truncf %269 : vector<10x32xf32> to vector<10x32xbf16>
    %271 = vector.extract_strided_slice %264 {offsets = [0, 64], sizes = [10, 32], strides = [1, 1]} : vector<10x96xf32> to vector<10x32xf32>
    %272 = arith.truncf %271 : vector<10x32xf32> to vector<10x32xbf16>
    %273 = vector.extract_strided_slice %268 {offsets = [0, 0], sizes = [10, 4], strides = [1, 1]} : vector<10x32xbf16> to vector<10x4xbf16>
    %274 = vector.extract_strided_slice %270 {offsets = [0, 0], sizes = [10, 4], strides = [1, 1]} : vector<10x32xbf16> to vector<10x4xbf16>
    %cst_114 = arith.constant dense<0.000000e+00> : vector<10x10xf32>
    %275 = tpu.matmul %273, %274, %cst_114 {dimension_numbers = #tpu.dot_dimension_numbers<[1], [1], [0], [0], [0, 0, 1, 0], [], []>} : vector<10x4xbf16>, vector<10x4xbf16>, vector<10x10xf32> -> vector<10x10xf32>
    %c0_115 = arith.constant 0 : index
    %c0_116 = arith.constant 0 : index
    %276 = vector.load %arg6[%c0_115, %c0_116] : memref<10x10xf32, #tpu.memory_space<vmem>>, vector<10x10xf32>
    tpu.vector_store %arg6[%c0_115, %c0_116], %275 {strides = array<i32>} : memref<10x10xf32, #tpu.memory_space<vmem>>, vector<10x10xf32>,
    %c0_117 = arith.constant 0 : index
    %c0_118 = arith.constant 0 : index
    %277 = vector.load %arg6[%c0_117, %c0_118] : memref<10x10xf32, #tpu.memory_space<vmem>>, vector<10x10xf32>
    %cst_119 = arith.constant dense<0xFF800000> : vector<10xf32>
    %278 = vector.multi_reduction <maximumf>, %277, %cst_119 [1] : vector<10x10xf32> to vector<10xf32>
    %279 = vector.shape_cast %278 : vector<10xf32> to vector<10x1xf32>
    %280 = vector.broadcast %279 : vector<10x1xf32> to vector<10x10xf32>
    %281 = arith.subf %277, %280 : vector<10x10xf32>
    %282 = math.exp %281 : vector<10x10xf32>
    %cst_120 = arith.constant dense<0.000000e+00> : vector<10xf32>
    %283 = vector.multi_reduction <add>, %282, %cst_120 [1] : vector<10x10xf32> to vector<10xf32>
    %284 = vector.shape_cast %283 : vector<10xf32> to vector<10x1xf32>
    %285 = arith.truncf %282 : vector<10x10xf32> to vector<10x10xbf16>
    %286 = vector.extract_strided_slice %272 {offsets = [0, 0], sizes = [10, 4], strides = [1, 1]} : vector<10x32xbf16> to vector<10x4xbf16>
    %cst_121 = arith.constant dense<0.000000e+00> : vector<10x4xf32>
    %287 = tpu.matmul %285, %286, %cst_121 {dimension_numbers = #tpu.dot_dimension_numbers<[1], [0], [0], [1], [0, 0, 1, 1], [], []>} : vector<10x10xbf16>, vector<10x4xbf16>, vector<10x4xf32> -> vector<10x4xf32>
    %288 = tpu.reciprocal %284 {approx = true} : vector<10x1xf32> -> vector<10x1xf32>
    %289 = vector.broadcast %288 : vector<10x1xf32> to vector<10x4xf32>
    %290 = arith.mulf %287, %289 : vector<10x4xf32>
    %291 = arith.truncf %290 : vector<10x4xf32> to vector<10x4xbf16>
    %292 = vector.extract_strided_slice %259 {offsets = [0, 0], sizes = [4, 32], strides = [1, 1]} : vector<32x32xbf16> to vector<4x32xbf16>
    %cst_122 = arith.constant dense<0.000000e+00> : vector<10x32xf32>
    %293 = tpu.matmul %291, %292, %cst_122 {dimension_numbers = #tpu.dot_dimension_numbers<[1], [0], [0], [1], [0, 0, 1, 1], [], []>} : vector<10x4xbf16>, vector<4x32xbf16>, vector<10x32xf32> -> vector<10x32xf32>
    %294 = vector.extract_strided_slice %268 {offsets = [0, 4], sizes = [10, 4], strides = [1, 1]} : vector<10x32xbf16> to vector<10x4xbf16>
    %295 = vector.extract_strided_slice %270 {offsets = [0, 4], sizes = [10, 4], strides = [1, 1]} : vector<10x32xbf16> to vector<10x4xbf16>
    %cst_123 = arith.constant dense<0.000000e+00> : vector<10x10xf32>
    %296 = tpu.matmul %294, %295, %cst_123 {dimension_numbers = #tpu.dot_dimension_numbers<[1], [1], [0], [0], [0, 0, 1, 0], [], []>} : vector<10x4xbf16>, vector<10x4xbf16>, vector<10x10xf32> -> vector<10x10xf32>
    %c0_124 = arith.constant 0 : index
    %c0_125 = arith.constant 0 : index
    %297 = vector.load %arg6[%c0_124, %c0_125] : memref<10x10xf32, #tpu.memory_space<vmem>>, vector<10x10xf32>
    tpu.vector_store %arg6[%c0_124, %c0_125], %296 {strides = array<i32>} : memref<10x10xf32, #tpu.memory_space<vmem>>, vector<10x10xf32>,
    %c0_126 = arith.constant 0 : index
    %c0_127 = arith.constant 0 : index
    %298 = vector.load %arg6[%c0_126, %c0_127] : memref<10x10xf32, #tpu.memory_space<vmem>>, vector<10x10xf32>
    %cst_128 = arith.constant dense<0xFF800000> : vector<10xf32>
    %299 = vector.multi_reduction <maximumf>, %298, %cst_128 [1] : vector<10x10xf32> to vector<10xf32>
    %300 = vector.shape_cast %299 : vector<10xf32> to vector<10x1xf32>
    %301 = vector.broadcast %300 : vector<10x1xf32> to vector<10x10xf32>
    %302 = arith.subf %298, %301 : vector<10x10xf32>
    %303 = math.exp %302 : vector<10x10xf32>
    %cst_129 = arith.constant dense<0.000000e+00> : vector<10xf32>
    %304 = vector.multi_reduction <add>, %303, %cst_129 [1] : vector<10x10xf32> to vector<10xf32>
    %305 = vector.shape_cast %304 : vector<10xf32> to vector<10x1xf32>
    %306 = arith.truncf %303 : vector<10x10xf32> to vector<10x10xbf16>
    %307 = vector.extract_strided_slice %272 {offsets = [0, 4], sizes = [10, 4], strides = [1, 1]} : vector<10x32xbf16> to vector<10x4xbf16>
    %cst_130 = arith.constant dense<0.000000e+00> : vector<10x4xf32>
    %308 = tpu.matmul %306, %307, %cst_130 {dimension_numbers = #tpu.dot_dimension_numbers<[1], [0], [0], [1], [0, 0, 1, 1], [], []>} : vector<10x10xbf16>, vector<10x4xbf16>, vector<10x4xf32> -> vector<10x4xf32>
    %309 = tpu.reciprocal %305 {approx = true} : vector<10x1xf32> -> vector<10x1xf32>
    %310 = vector.broadcast %309 : vector<10x1xf32> to vector<10x4xf32>
    %311 = arith.mulf %308, %310 : vector<10x4xf32>
    %312 = arith.truncf %311 : vector<10x4xf32> to vector<10x4xbf16>
    %313 = vector.extract_strided_slice %259 {offsets = [4, 0], sizes = [4, 32], strides = [1, 1]} : vector<32x32xbf16> to vector<4x32xbf16>
    %cst_131 = arith.constant dense<0.000000e+00> : vector<10x32xf32>
    %314 = tpu.matmul %312, %313, %cst_131 {dimension_numbers = #tpu.dot_dimension_numbers<[1], [0], [0], [1], [0, 0, 1, 1], [], []>} : vector<10x4xbf16>, vector<4x32xbf16>, vector<10x32xf32> -> vector<10x32xf32>
    %315 = arith.addf %293, %314 : vector<10x32xf32>
    %316 = vector.extract_strided_slice %268 {offsets = [0, 8], sizes = [10, 4], strides = [1, 1]} : vector<10x32xbf16> to vector<10x4xbf16>
    %317 = vector.extract_strided_slice %270 {offsets = [0, 8], sizes = [10, 4], strides = [1, 1]} : vector<10x32xbf16> to vector<10x4xbf16>
    %cst_132 = arith.constant dense<0.000000e+00> : vector<10x10xf32>
    %318 = tpu.matmul %316, %317, %cst_132 {dimension_numbers = #tpu.dot_dimension_numbers<[1], [1], [0], [0], [0, 0, 1, 0], [], []>} : vector<10x4xbf16>, vector<10x4xbf16>, vector<10x10xf32> -> vector<10x10xf32>
    %c0_133 = arith.constant 0 : index
    %c0_134 = arith.constant 0 : index
    %319 = vector.load %arg6[%c0_133, %c0_134] : memref<10x10xf32, #tpu.memory_space<vmem>>, vector<10x10xf32>
    tpu.vector_store %arg6[%c0_133, %c0_134], %318 {strides = array<i32>} : memref<10x10xf32, #tpu.memory_space<vmem>>, vector<10x10xf32>,
    %c0_135 = arith.constant 0 : index
    %c0_136 = arith.constant 0 : index
    %320 = vector.load %arg6[%c0_135, %c0_136] : memref<10x10xf32, #tpu.memory_space<vmem>>, vector<10x10xf32>
    %cst_137 = arith.constant dense<0xFF800000> : vector<10xf32>
    %321 = vector.multi_reduction <maximumf>, %320, %cst_137 [1] : vector<10x10xf32> to vector<10xf32>
    %322 = vector.shape_cast %321 : vector<10xf32> to vector<10x1xf32>
    %323 = vector.broadcast %322 : vector<10x1xf32> to vector<10x10xf32>
    %324 = arith.subf %320, %323 : vector<10x10xf32>
    %325 = math.exp %324 : vector<10x10xf32>
    %cst_138 = arith.constant dense<0.000000e+00> : vector<10xf32>
    %326 = vector.multi_reduction <add>, %325, %cst_138 [1] : vector<10x10xf32> to vector<10xf32>
    %327 = vector.shape_cast %326 : vector<10xf32> to vector<10x1xf32>
    %328 = arith.truncf %325 : vector<10x10xf32> to vector<10x10xbf16>
    %329 = vector.extract_strided_slice %272 {offsets = [0, 8], sizes = [10, 4], strides = [1, 1]} : vector<10x32xbf16> to vector<10x4xbf16>
    %cst_139 = arith.constant dense<0.000000e+00> : vector<10x4xf32>
    %330 = tpu.matmul %328, %329, %cst_139 {dimension_numbers = #tpu.dot_dimension_numbers<[1], [0], [0], [1], [0, 0, 1, 1], [], []>} : vector<10x10xbf16>, vector<10x4xbf16>, vector<10x4xf32> -> vector<10x4xf32>
    %331 = tpu.reciprocal %327 {approx = true} : vector<10x1xf32> -> vector<10x1xf32>
    %332 = vector.broadcast %331 : vector<10x1xf32> to vector<10x4xf32>
    %333 = arith.mulf %330, %332 : vector<10x4xf32>
    %334 = arith.truncf %333 : vector<10x4xf32> to vector<10x4xbf16>
    %335 = vector.extract_strided_slice %259 {offsets = [8, 0], sizes = [4, 32], strides = [1, 1]} : vector<32x32xbf16> to vector<4x32xbf16>
    %cst_140 = arith.constant dense<0.000000e+00> : vector<10x32xf32>
    %336 = tpu.matmul %334, %335, %cst_140 {dimension_numbers = #tpu.dot_dimension_numbers<[1], [0], [0], [1], [0, 0, 1, 1], [], []>} : vector<10x4xbf16>, vector<4x32xbf16>, vector<10x32xf32> -> vector<10x32xf32>
    %337 = arith.addf %315, %336 : vector<10x32xf32>
    %338 = vector.extract_strided_slice %268 {offsets = [0, 12], sizes = [10, 4], strides = [1, 1]} : vector<10x32xbf16> to vector<10x4xbf16>
    %339 = vector.extract_strided_slice %270 {offsets = [0, 12], sizes = [10, 4], strides = [1, 1]} : vector<10x32xbf16> to vector<10x4xbf16>
    %cst_141 = arith.constant dense<0.000000e+00> : vector<10x10xf32>
    %340 = tpu.matmul %338, %339, %cst_141 {dimension_numbers = #tpu.dot_dimension_numbers<[1], [1], [0], [0], [0, 0, 1, 0], [], []>} : vector<10x4xbf16>, vector<10x4xbf16>, vector<10x10xf32> -> vector<10x10xf32>
    %c0_142 = arith.constant 0 : index
    %c0_143 = arith.constant 0 : index
    %341 = vector.load %arg6[%c0_142, %c0_143] : memref<10x10xf32, #tpu.memory_space<vmem>>, vector<10x10xf32>
    tpu.vector_store %arg6[%c0_142, %c0_143], %340 {strides = array<i32>} : memref<10x10xf32, #tpu.memory_space<vmem>>, vector<10x10xf32>,
    %c0_144 = arith.constant 0 : index
    %c0_145 = arith.constant 0 : index
    %342 = vector.load %arg6[%c0_144, %c0_145] : memref<10x10xf32, #tpu.memory_space<vmem>>, vector<10x10xf32>
    %cst_146 = arith.constant dense<0xFF800000> : vector<10xf32>
    %343 = vector.multi_reduction <maximumf>, %342, %cst_146 [1] : vector<10x10xf32> to vector<10xf32>
    %344 = vector.shape_cast %343 : vector<10xf32> to vector<10x1xf32>
    %345 = vector.broadcast %344 : vector<10x1xf32> to vector<10x10xf32>
    %346 = arith.subf %342, %345 : vector<10x10xf32>
    %347 = math.exp %346 : vector<10x10xf32>
    %cst_147 = arith.constant dense<0.000000e+00> : vector<10xf32>
    %348 = vector.multi_reduction <add>, %347, %cst_147 [1] : vector<10x10xf32> to vector<10xf32>
    %349 = vector.shape_cast %348 : vector<10xf32> to vector<10x1xf32>
    %350 = arith.truncf %347 : vector<10x10xf32> to vector<10x10xbf16>
    %351 = vector.extract_strided_slice %272 {offsets = [0, 12], sizes = [10, 4], strides = [1, 1]} : vector<10x32xbf16> to vector<10x4xbf16>
    %cst_148 = arith.constant dense<0.000000e+00> : vector<10x4xf32>
    %352 = tpu.matmul %350, %351, %cst_148 {dimension_numbers = #tpu.dot_dimension_numbers<[1], [0], [0], [1], [0, 0, 1, 1], [], []>} : vector<10x10xbf16>, vector<10x4xbf16>, vector<10x4xf32> -> vector<10x4xf32>
    %353 = tpu.reciprocal %349 {approx = true} : vector<10x1xf32> -> vector<10x1xf32>
    %354 = vector.broadcast %353 : vector<10x1xf32> to vector<10x4xf32>
    %355 = arith.mulf %352, %354 : vector<10x4xf32>
    %356 = arith.truncf %355 : vector<10x4xf32> to vector<10x4xbf16>
    %357 = vector.extract_strided_slice %259 {offsets = [12, 0], sizes = [4, 32], strides = [1, 1]} : vector<32x32xbf16> to vector<4x32xbf16>
    %cst_149 = arith.constant dense<0.000000e+00> : vector<10x32xf32>
    %358 = tpu.matmul %356, %357, %cst_149 {dimension_numbers = #tpu.dot_dimension_numbers<[1], [0], [0], [1], [0, 0, 1, 1], [], []>} : vector<10x4xbf16>, vector<4x32xbf16>, vector<10x32xf32> -> vector<10x32xf32>
    %359 = arith.addf %337, %358 : vector<10x32xf32>
    %360 = vector.extract_strided_slice %268 {offsets = [0, 16], sizes = [10, 4], strides = [1, 1]} : vector<10x32xbf16> to vector<10x4xbf16>
    %361 = vector.extract_strided_slice %270 {offsets = [0, 16], sizes = [10, 4], strides = [1, 1]} : vector<10x32xbf16> to vector<10x4xbf16>
    %cst_150 = arith.constant dense<0.000000e+00> : vector<10x10xf32>
    %362 = tpu.matmul %360, %361, %cst_150 {dimension_numbers = #tpu.dot_dimension_numbers<[1], [1], [0], [0], [0, 0, 1, 0], [], []>} : vector<10x4xbf16>, vector<10x4xbf16>, vector<10x10xf32> -> vector<10x10xf32>
    %c0_151 = arith.constant 0 : index
    %c0_152 = arith.constant 0 : index
    %363 = vector.load %arg6[%c0_151, %c0_152] : memref<10x10xf32, #tpu.memory_space<vmem>>, vector<10x10xf32>
    tpu.vector_store %arg6[%c0_151, %c0_152], %362 {strides = array<i32>} : memref<10x10xf32, #tpu.memory_space<vmem>>, vector<10x10xf32>,
    %c0_153 = arith.constant 0 : index
    %c0_154 = arith.constant 0 : index
    %364 = vector.load %arg6[%c0_153, %c0_154] : memref<10x10xf32, #tpu.memory_space<vmem>>, vector<10x10xf32>
    %cst_155 = arith.constant dense<0xFF800000> : vector<10xf32>
    %365 = vector.multi_reduction <maximumf>, %364, %cst_155 [1] : vector<10x10xf32> to vector<10xf32>
    %366 = vector.shape_cast %365 : vector<10xf32> to vector<10x1xf32>
    %367 = vector.broadcast %366 : vector<10x1xf32> to vector<10x10xf32>
    %368 = arith.subf %364, %367 : vector<10x10xf32>
    %369 = math.exp %368 : vector<10x10xf32>
    %cst_156 = arith.constant dense<0.000000e+00> : vector<10xf32>
    %370 = vector.multi_reduction <add>, %369, %cst_156 [1] : vector<10x10xf32> to vector<10xf32>
    %371 = vector.shape_cast %370 : vector<10xf32> to vector<10x1xf32>
    %372 = arith.truncf %369 : vector<10x10xf32> to vector<10x10xbf16>
    %373 = vector.extract_strided_slice %272 {offsets = [0, 16], sizes = [10, 4], strides = [1, 1]} : vector<10x32xbf16> to vector<10x4xbf16>
    %cst_157 = arith.constant dense<0.000000e+00> : vector<10x4xf32>
    %374 = tpu.matmul %372, %373, %cst_157 {dimension_numbers = #tpu.dot_dimension_numbers<[1], [0], [0], [1], [0, 0, 1, 1], [], []>} : vector<10x10xbf16>, vector<10x4xbf16>, vector<10x4xf32> -> vector<10x4xf32>
    %375 = tpu.reciprocal %371 {approx = true} : vector<10x1xf32> -> vector<10x1xf32>
    %376 = vector.broadcast %375 : vector<10x1xf32> to vector<10x4xf32>
    %377 = arith.mulf %374, %376 : vector<10x4xf32>
    %378 = arith.truncf %377 : vector<10x4xf32> to vector<10x4xbf16>
    %379 = vector.extract_strided_slice %259 {offsets = [16, 0], sizes = [4, 32], strides = [1, 1]} : vector<32x32xbf16> to vector<4x32xbf16>
    %cst_158 = arith.constant dense<0.000000e+00> : vector<10x32xf32>
    %380 = tpu.matmul %378, %379, %cst_158 {dimension_numbers = #tpu.dot_dimension_numbers<[1], [0], [0], [1], [0, 0, 1, 1], [], []>} : vector<10x4xbf16>, vector<4x32xbf16>, vector<10x32xf32> -> vector<10x32xf32>
    %381 = arith.addf %359, %380 : vector<10x32xf32>
    %382 = vector.extract_strided_slice %268 {offsets = [0, 20], sizes = [10, 4], strides = [1, 1]} : vector<10x32xbf16> to vector<10x4xbf16>
    %383 = vector.extract_strided_slice %270 {offsets = [0, 20], sizes = [10, 4], strides = [1, 1]} : vector<10x32xbf16> to vector<10x4xbf16>
    %cst_159 = arith.constant dense<0.000000e+00> : vector<10x10xf32>
    %384 = tpu.matmul %382, %383, %cst_159 {dimension_numbers = #tpu.dot_dimension_numbers<[1], [1], [0], [0], [0, 0, 1, 0], [], []>} : vector<10x4xbf16>, vector<10x4xbf16>, vector<10x10xf32> -> vector<10x10xf32>
    %c0_160 = arith.constant 0 : index
    %c0_161 = arith.constant 0 : index
    %385 = vector.load %arg6[%c0_160, %c0_161] : memref<10x10xf32, #tpu.memory_space<vmem>>, vector<10x10xf32>
    tpu.vector_store %arg6[%c0_160, %c0_161], %384 {strides = array<i32>} : memref<10x10xf32, #tpu.memory_space<vmem>>, vector<10x10xf32>,
    %c0_162 = arith.constant 0 : index
    %c0_163 = arith.constant 0 : index
    %386 = vector.load %arg6[%c0_162, %c0_163] : memref<10x10xf32, #tpu.memory_space<vmem>>, vector<10x10xf32>
    %cst_164 = arith.constant dense<0xFF800000> : vector<10xf32>
    %387 = vector.multi_reduction <maximumf>, %386, %cst_164 [1] : vector<10x10xf32> to vector<10xf32>
    %388 = vector.shape_cast %387 : vector<10xf32> to vector<10x1xf32>
    %389 = vector.broadcast %388 : vector<10x1xf32> to vector<10x10xf32>
    %390 = arith.subf %386, %389 : vector<10x10xf32>
    %391 = math.exp %390 : vector<10x10xf32>
    %cst_165 = arith.constant dense<0.000000e+00> : vector<10xf32>
    %392 = vector.multi_reduction <add>, %391, %cst_165 [1] : vector<10x10xf32> to vector<10xf32>
    %393 = vector.shape_cast %392 : vector<10xf32> to vector<10x1xf32>
    %394 = arith.truncf %391 : vector<10x10xf32> to vector<10x10xbf16>
    %395 = vector.extract_strided_slice %272 {offsets = [0, 20], sizes = [10, 4], strides = [1, 1]} : vector<10x32xbf16> to vector<10x4xbf16>
    %cst_166 = arith.constant dense<0.000000e+00> : vector<10x4xf32>
    %396 = tpu.matmul %394, %395, %cst_166 {dimension_numbers = #tpu.dot_dimension_numbers<[1], [0], [0], [1], [0, 0, 1, 1], [], []>} : vector<10x10xbf16>, vector<10x4xbf16>, vector<10x4xf32> -> vector<10x4xf32>
    %397 = tpu.reciprocal %393 {approx = true} : vector<10x1xf32> -> vector<10x1xf32>
    %398 = vector.broadcast %397 : vector<10x1xf32> to vector<10x4xf32>
    %399 = arith.mulf %396, %398 : vector<10x4xf32>
    %400 = arith.truncf %399 : vector<10x4xf32> to vector<10x4xbf16>
    %401 = vector.extract_strided_slice %259 {offsets = [20, 0], sizes = [4, 32], strides = [1, 1]} : vector<32x32xbf16> to vector<4x32xbf16>
    %cst_167 = arith.constant dense<0.000000e+00> : vector<10x32xf32>
    %402 = tpu.matmul %400, %401, %cst_167 {dimension_numbers = #tpu.dot_dimension_numbers<[1], [0], [0], [1], [0, 0, 1, 1], [], []>} : vector<10x4xbf16>, vector<4x32xbf16>, vector<10x32xf32> -> vector<10x32xf32>
    %403 = arith.addf %381, %402 : vector<10x32xf32>
    %404 = vector.extract_strided_slice %268 {offsets = [0, 24], sizes = [10, 4], strides = [1, 1]} : vector<10x32xbf16> to vector<10x4xbf16>
    %405 = vector.extract_strided_slice %270 {offsets = [0, 24], sizes = [10, 4], strides = [1, 1]} : vector<10x32xbf16> to vector<10x4xbf16>
    %cst_168 = arith.constant dense<0.000000e+00> : vector<10x10xf32>
    %406 = tpu.matmul %404, %405, %cst_168 {dimension_numbers = #tpu.dot_dimension_numbers<[1], [1], [0], [0], [0, 0, 1, 0], [], []>} : vector<10x4xbf16>, vector<10x4xbf16>, vector<10x10xf32> -> vector<10x10xf32>
    %c0_169 = arith.constant 0 : index
    %c0_170 = arith.constant 0 : index
    %407 = vector.load %arg6[%c0_169, %c0_170] : memref<10x10xf32, #tpu.memory_space<vmem>>, vector<10x10xf32>
    tpu.vector_store %arg6[%c0_169, %c0_170], %406 {strides = array<i32>} : memref<10x10xf32, #tpu.memory_space<vmem>>, vector<10x10xf32>,
    %c0_171 = arith.constant 0 : index
    %c0_172 = arith.constant 0 : index
    %408 = vector.load %arg6[%c0_171, %c0_172] : memref<10x10xf32, #tpu.memory_space<vmem>>, vector<10x10xf32>
    %cst_173 = arith.constant dense<0xFF800000> : vector<10xf32>
    %409 = vector.multi_reduction <maximumf>, %408, %cst_173 [1] : vector<10x10xf32> to vector<10xf32>
    %410 = vector.shape_cast %409 : vector<10xf32> to vector<10x1xf32>
    %411 = vector.broadcast %410 : vector<10x1xf32> to vector<10x10xf32>
    %412 = arith.subf %408, %411 : vector<10x10xf32>
    %413 = math.exp %412 : vector<10x10xf32>
    %cst_174 = arith.constant dense<0.000000e+00> : vector<10xf32>
    %414 = vector.multi_reduction <add>, %413, %cst_174 [1] : vector<10x10xf32> to vector<10xf32>
    %415 = vector.shape_cast %414 : vector<10xf32> to vector<10x1xf32>
    %416 = arith.truncf %413 : vector<10x10xf32> to vector<10x10xbf16>
    %417 = vector.extract_strided_slice %272 {offsets = [0, 24], sizes = [10, 4], strides = [1, 1]} : vector<10x32xbf16> to vector<10x4xbf16>
    %cst_175 = arith.constant dense<0.000000e+00> : vector<10x4xf32>
    %418 = tpu.matmul %416, %417, %cst_175 {dimension_numbers = #tpu.dot_dimension_numbers<[1], [0], [0], [1], [0, 0, 1, 1], [], []>} : vector<10x10xbf16>, vector<10x4xbf16>, vector<10x4xf32> -> vector<10x4xf32>
    %419 = tpu.reciprocal %415 {approx = true} : vector<10x1xf32> -> vector<10x1xf32>
    %420 = vector.broadcast %419 : vector<10x1xf32> to vector<10x4xf32>
    %421 = arith.mulf %418, %420 : vector<10x4xf32>
    %422 = arith.truncf %421 : vector<10x4xf32> to vector<10x4xbf16>
    %423 = vector.extract_strided_slice %259 {offsets = [24, 0], sizes = [4, 32], strides = [1, 1]} : vector<32x32xbf16> to vector<4x32xbf16>
    %cst_176 = arith.constant dense<0.000000e+00> : vector<10x32xf32>
    %424 = tpu.matmul %422, %423, %cst_176 {dimension_numbers = #tpu.dot_dimension_numbers<[1], [0], [0], [1], [0, 0, 1, 1], [], []>} : vector<10x4xbf16>, vector<4x32xbf16>, vector<10x32xf32> -> vector<10x32xf32>
    %425 = arith.addf %403, %424 : vector<10x32xf32>
    %426 = vector.extract_strided_slice %268 {offsets = [0, 28], sizes = [10, 4], strides = [1, 1]} : vector<10x32xbf16> to vector<10x4xbf16>
    %427 = vector.extract_strided_slice %270 {offsets = [0, 28], sizes = [10, 4], strides = [1, 1]} : vector<10x32xbf16> to vector<10x4xbf16>
    %cst_177 = arith.constant dense<0.000000e+00> : vector<10x10xf32>
    %428 = tpu.matmul %426, %427, %cst_177 {dimension_numbers = #tpu.dot_dimension_numbers<[1], [1], [0], [0], [0, 0, 1, 0], [], []>} : vector<10x4xbf16>, vector<10x4xbf16>, vector<10x10xf32> -> vector<10x10xf32>
    %c0_178 = arith.constant 0 : index
    %c0_179 = arith.constant 0 : index
    %429 = vector.load %arg6[%c0_178, %c0_179] : memref<10x10xf32, #tpu.memory_space<vmem>>, vector<10x10xf32>
    tpu.vector_store %arg6[%c0_178, %c0_179], %428 {strides = array<i32>} : memref<10x10xf32, #tpu.memory_space<vmem>>, vector<10x10xf32>,
    %c0_180 = arith.constant 0 : index
    %c0_181 = arith.constant 0 : index
    %430 = vector.load %arg6[%c0_180, %c0_181] : memref<10x10xf32, #tpu.memory_space<vmem>>, vector<10x10xf32>
    %cst_182 = arith.constant dense<0xFF800000> : vector<10xf32>
    %431 = vector.multi_reduction <maximumf>, %430, %cst_182 [1] : vector<10x10xf32> to vector<10xf32>
    %432 = vector.shape_cast %431 : vector<10xf32> to vector<10x1xf32>
    %433 = vector.broadcast %432 : vector<10x1xf32> to vector<10x10xf32>
    %434 = arith.subf %430, %433 : vector<10x10xf32>
    %435 = math.exp %434 : vector<10x10xf32>
    %cst_183 = arith.constant dense<0.000000e+00> : vector<10xf32>
    %436 = vector.multi_reduction <add>, %435, %cst_183 [1] : vector<10x10xf32> to vector<10xf32>
    %437 = vector.shape_cast %436 : vector<10xf32> to vector<10x1xf32>
    %438 = arith.truncf %435 : vector<10x10xf32> to vector<10x10xbf16>
    %439 = vector.extract_strided_slice %272 {offsets = [0, 28], sizes = [10, 4], strides = [1, 1]} : vector<10x32xbf16> to vector<10x4xbf16>
    %cst_184 = arith.constant dense<0.000000e+00> : vector<10x4xf32>
    %440 = tpu.matmul %438, %439, %cst_184 {dimension_numbers = #tpu.dot_dimension_numbers<[1], [0], [0], [1], [0, 0, 1, 1], [], []>} : vector<10x10xbf16>, vector<10x4xbf16>, vector<10x4xf32> -> vector<10x4xf32>
    %441 = tpu.reciprocal %437 {approx = true} : vector<10x1xf32> -> vector<10x1xf32>
    %442 = vector.broadcast %441 : vector<10x1xf32> to vector<10x4xf32>
    %443 = arith.mulf %440, %442 : vector<10x4xf32>
    %444 = arith.truncf %443 : vector<10x4xf32> to vector<10x4xbf16>
    %445 = vector.extract_strided_slice %259 {offsets = [28, 0], sizes = [4, 32], strides = [1, 1]} : vector<32x32xbf16> to vector<4x32xbf16>
    %cst_185 = arith.constant dense<0.000000e+00> : vector<10x32xf32>
    %446 = tpu.matmul %444, %445, %cst_185 {dimension_numbers = #tpu.dot_dimension_numbers<[1], [0], [0], [1], [0, 0, 1, 1], [], []>} : vector<10x4xbf16>, vector<4x32xbf16>, vector<10x32xf32> -> vector<10x32xf32>
    %447 = arith.addf %425, %446 : vector<10x32xf32>
    %448 = vector.broadcast %260 : vector<1x32xf32> to vector<10x32xf32>
    %449 = arith.addf %447, %448 : vector<10x32xf32>
    %450 = arith.addf %232, %449 : vector<10x32xf32>
    %451 = vector.extract_strided_slice %450 {offsets = [9, 0], sizes = [1, 32], strides = [1, 1]} : vector<10x32xf32> to vector<1x32xf32>
    %c10 = arith.constant 10 : index
    %c0_186 = arith.constant 0 : index
    %452 = vector.load %arg3[%c10, %c0_186] : memref<13x96xf32, #tpu.memory_space<vmem>>, vector<1x32xf32>
    %c11 = arith.constant 11 : index
    %c0_187 = arith.constant 0 : index
    %453 = vector.load %arg3[%c11, %c0_187] : memref<13x96xf32, #tpu.memory_space<vmem>>, vector<1x32xf32>
    %cst_188 = arith.constant dense<0.000000e+00> : vector<1xf32>
    %454 = vector.multi_reduction <add>, %451, %cst_188 [1] : vector<1x32xf32> to vector<1xf32>
    %455 = vector.shape_cast %454 : vector<1xf32> to vector<1x1xf32>
    %cst_189 = arith.constant 3.200000e+01 : f32
    %456 = vector.broadcast %cst_189 : f32 to vector<1x1xf32>
    %457 = arith.divf %455, %456 : vector<1x1xf32>
    %458 = vector.broadcast %457 : vector<1x1xf32> to vector<1x32xf32>
    %459 = arith.subf %451, %458 : vector<1x32xf32>
    %460 = arith.mulf %459, %459 : vector<1x32xf32>
    %cst_190 = arith.constant dense<0.000000e+00> : vector<1xf32>
    %461 = vector.multi_reduction <add>, %460, %cst_190 [1] : vector<1x32xf32> to vector<1xf32>
    %462 = vector.shape_cast %461 : vector<1xf32> to vector<1x1xf32>
    %cst_191 = arith.constant 3.200000e+01 : f32
    %463 = vector.broadcast %cst_191 : f32 to vector<1x1xf32>
    %464 = arith.divf %462, %463 : vector<1x1xf32>
    %465 = vector.broadcast %457 : vector<1x1xf32> to vector<1x32xf32>
    %466 = arith.subf %451, %465 : vector<1x32xf32>
    %cst_192 = arith.constant 9.99999974E-6 : f32
    %467 = vector.broadcast %cst_192 : f32 to vector<1x1xf32>
    %468 = arith.addf %464, %467 : vector<1x1xf32>
    %469 = math.rsqrt %468 : vector<1x1xf32>
    %470 = vector.broadcast %469 : vector<1x1xf32> to vector<1x32xf32>
    %471 = arith.mulf %466, %470 : vector<1x32xf32>
    %472 = arith.mulf %471, %452 : vector<1x32xf32>
    %473 = arith.addf %472, %453 : vector<1x32xf32>
    %474 = arith.truncf %473 : vector<1x32xf32> to vector<1x32xbf16>
    %c192 = arith.constant 192 : index
    %c0_193 = arith.constant 0 : index
    %475 = vector.load %arg2[%c192, %c0_193] : memref<224x96xbf16, #tpu.memory_space<vmem>>, vector<32x4xbf16>
    %cst_194 = arith.constant dense<0.000000e+00> : vector<1x4xf32>
    %476 = tpu.matmul %474, %475, %cst_194 {dimension_numbers = #tpu.dot_dimension_numbers<[1], [0], [0], [1], [0, 0, 1, 1], [], []>} : vector<1x32xbf16>, vector<32x4xbf16>, vector<1x4xf32> -> vector<1x4xf32>
    %c12 = arith.constant 12 : index
    %c0_195 = arith.constant 0 : index
    %477 = vector.load %arg3[%c12, %c0_195] : memref<13x96xf32, #tpu.memory_space<vmem>>, vector<1x4xf32>
    %478 = arith.addf %476, %477 : vector<1x4xf32>
    %c0_196 = arith.constant 0 : index
    %c0_197 = arith.constant 0 : index
    %c0_198 = arith.constant 0 : index
    %479 = vector.load %arg4[%c0_196, %c0_197, %c0_198] : memref<1x1x4xf32, #tpu.memory_space<vmem>>, vector<1x1x4xf32>
    %480 = vector.shape_cast %479 : vector<1x1x4xf32> to vector<1x4xf32>
    %481 = vector.shape_cast %478 : vector<1x4xf32> to vector<1x1x4xf32>
    tpu.vector_store %arg4[%c0_196, %c0_197, %c0_198], %481 {strides = array<i32>} : memref<1x1x4xf32, #tpu.memory_space<vmem>>, vector<1x1x4xf32>,
    return
  }
  func.func @transform_0(%arg0: i32) -> (i32, i32, i32) {
    %c0_i32 = arith.constant 0 : i32
    %c0_i32_0 = arith.constant 0 : i32
    %c0_i32_1 = arith.constant 0 : i32
    return %arg0, %c0_i32, %c0_i32_0 : i32, i32, i32
  }
  func.func @transform_1(%arg0: i32) -> (i32, i32) {
    %c0_i32 = arith.constant 0 : i32
    %c0_i32_0 = arith.constant 0 : i32
    %c0_i32_1 = arith.constant 0 : i32
    return %c0_i32, %c0_i32_0 : i32, i32
  }
  func.func @transform_2(%arg0: i32) -> (i32, i32) {
    %c0_i32 = arith.constant 0 : i32
    %c0_i32_0 = arith.constant 0 : i32
    %c0_i32_1 = arith.constant 0 : i32
    return %c0_i32, %c0_i32_0 : i32, i32
  }
  func.func @transform_3(%arg0: i32) -> (i32, i32, i32) {
    %c0_i32 = arith.constant 0 : i32
    %c0_i32_0 = arith.constant 0 : i32
    %c0_i32_1 = arith.constant 0 : i32
    return %arg0, %c0_i32, %c0_i32_0 : i32, i32, i32
  }
}

</mosaic_0001>

<bundles_post_ra>
// kernel: tpu_custom_call.1
= control target key start
LH: loop header
LB: loop body
LE: loop exit
PB: predicated region body
PF: predicated region fallthrough
CT: control target
= control target key end

     0   :  { %8 = vsyncpa [#allocation5], 0  ;;  %s5083_s0 = inlined_call_operand.vmem [shape: bf16[2,8,64], index: 0, kind: input, shape index: {}]   ;;  %s5084_s1 = inlined_call_operand.vmem [shape: bf16[224,96], index: 1, kind: input, shape index: {}]   ;;  %s5085_s2 = inlined_call_operand.vmem [shape: f32[13,96], index: 2, kind: input, shape index: {}]   ;;  %s5086_s3 = inlined_call_operand.hbm [shape: f32[2,1,4], index: 3, kind: output, shape index: {}]  }
   0x1   :  { %10 = vsyncpa [#allocation5 + $0x1], 0  ;;  %s4361_s12 = smov 0   ;;  %s4363_s13 = smov 0  }
   0x2   :  { %s4365_s14 = smov 0   ;;  %s4367_s15 = smov 0  }
   0x3 LB: > { %s4382_s16 = sadd.s32 4294967295, %s4313_s15   ;;  %s3508_s17 = sadd.s32 4294967294, %s4313_s15   ;;  %s4313_s15 = sphi %s4367_s15, %s5114_s15   ;;  %s4309_s14 = sphi %s4365_s14, %s5113_s14   ;;  %s4305_s13 = sphi %s4363_s13, %s5112_s13   ;;  %s4301_s12 = sphi %s4361_s12, %s5111_s12  }
   0x4   : > { %s4386_s18 = sadd.s32 1, %s4313_s15   ;;  %s91_s19 = sadd.s32 1, %s4309_s14 }
   0x5   : > { %s88_s20 = ssub.s32 %s4313_s15, %s4386_s18  ;;  %p101_p0 = scmp.ne.s32.totalorder %s4309_s14, %s4305_s13 }
   0x6   : > { %p89_p1 = scmp.eq.s32.totalorder %s88_s20, 0  ;;  %p102_p2 = scmp.eq.s32.totalorder %s4382_s16, 1 }
   0x7   : > { %p107_p3 = scmp.ne.s32.totalorder %s4305_s13, %s4301_s12  ;;  %p108_p4 = scmp.eq.s32.totalorder %s3508_s17, 1 }
   0x8   : > { %s4397_s21 = scalar_select %p89_p1, %s4309_s14, %s91_s19  }
   0x9   : > { %p4399_p5 = por %p102_p2, %p101_p0  ;;  %p4403_p6 = por %p108_p4, %p107_p3 }
   0xa   : > { %p3511_p7 = scmp.ge.s32.totalorder %s4313_s15, 1  ;;  %p139_p8 = scmp.lt.s32.totalorder %s4313_s15, 3 }
   0xc   : > { %p140_p9 = pnand %p3511_p7, %p139_p8 }
   0xd   : > { %v4093_v0 = vld [vmem:[%s5084_s1] sm:$0xff] (!%p140_p9)   ;;  %v4315_v1 = vmov (!%p140_p9), 0.0   ;;  %v4094_v2 = vld [vmem:[%s5084_s1 + $0x8] sm:$0xff] (!%p140_p9)   ;;  %vm4316_vm0 = vmmov (!%p140_p9), 0   ;;  %p161_p10 = scmp.lt.s32.totalorder (!%p140_p9), %s4382_s16, 1  ;;  %v4095_v3 = vld [vmem:[%s5084_s1 + $0x10] sm:$0xff] (!%p140_p9)  }
   0xe   : > { %143 = sbr.rel (%p140_p9) target bundleno = 8905 (0x22c9), region = 32  ;;  %3705 = vmatprep.subr.bf16.mxu0 (!%p140_p9), %v4315_v1  ;;  %3717 = vmatprep.subr.bf16.mxu1 (!%p140_p9), %v4315_v1  ;;  %v4096_v4 = vld [vmem:[%s5084_s1 + $0x18] sm:$0xff] (!%p140_p9)   ;;  %vm204_vm1 = vcmask (!%p140_p9), 523264   ;;  %vm251_vm2 = vcmask (!%p140_p9), 253952   ;;  %v253_v6 = vld [vmem:[%s5085_s2 + $0x1] sm:$0x1] (!%p140_p9) }
   0xf   : > { %3706 = vmatpush3.bf16.msra.mxu0 (!%p140_p9), %v4093_v0  ;;  %3713 = vmatprep.mubr.msk.bf16.mxu0 (!%p140_p9), %vm4316_vm0, %v4315_v1  ;;  %254 = vst.msk [vmem:[#allocation2 + $0x9] sm:$0x1] (!%p140_p9), %vm251_vm2, %v253_v6  ;;  %v3513_v7 = vld [vmem:[%s5085_s2] ss:$0 sm:$0xff] (!%p140_p9)  ;;  %vm249_vm3 = vcmask (!%p140_p9), 261120   ;;  %vm262_vm4 = vcmask (!%p140_p9), 254976  }
  0x10   : > { %3707 = vmatprep.subr.bf16.mxu0 (!%p140_p9), %v4315_v1  ;;  %3721 = vmatprep.mubr.msk.bf16.mxu1 (!%p140_p9), %vm4316_vm0, %v4315_v1  ;;  %v4097_v28 = vld [vmem:[%s5084_s1 + $0x20] sm:$0xff] (!%p140_p9)   ;;  %v4098_v29 = vld [vmem:[%s5084_s1 + $0x28] sm:$0xff] (!%p140_p9)   ;;  %s4317_s6 = smov (!%p140_p9), 92   ;;  %s4318_s7 = smov (!%p140_p9), 96   ;;  %vm377_vm5 = vcmask (!%p140_p9), 31744   ;;  %vm425_vm6 = vcmask (!%p140_p9), 80896  }
  0x11   : > { %3718 = vmatpush3.bf16.msra.mxu1 (!%p140_p9), %v4097_v28  ;;  %v3519_v38 = vld [vmem:[%s5085_s2 + $0x2] ss:$0 sm:$0xff] (!%p140_p9)  ;;  %v3520_v42 = vld [vmem:[%s5085_s2 + $0x3] ss:$0 sm:$0xff] (!%p140_p9)  ;;  %v3521_v47 = vld [vmem:[%s5085_s2 + $0x4] ss:$0 sm:$0xff] (!%p140_p9) }
  0x12   : > { %3719 = vmatprep.subr.bf16.mxu1 (!%p140_p9), %v4315_v1  ;;  %s4319_s8 = smov (!%p140_p9), 124   ;;  %vm427_vm7 = vcmask (!%p140_p9), 74752   ;;  %s4321_s10 = smov (!%p140_p9), 60   ;;  %vm455_vm8 = vcmask (!%p140_p9), 1044480   ;;  %vm641_vm9 = vcmask (!%p140_p9), 1041408   ;;  %vm3352_vm10 = vcmask (!%p140_p9), 254977  }
  0x13   : > { %3708 = vmatpush3.bf16.msra.mxu0 (!%p140_p9), %v4094_v2  ;;  %s4322_s11 = smov (!%p140_p9), 88   ;;  %s4323_s17 = smov (!%p140_p9), 120   ;;  %vm3438_vm11 = vcmask (!%p140_p9), 24576  }
  0x14   : > { %3709 = vmatprep.subr.bf16.mxu0 (!%p140_p9), %v4315_v1  ;;  %s4324_s24 = smov (!%p140_p9), 56   ;;  %s4325_s25 = smov (!%p140_p9), 116  }
  0x15   : > { %s162_s28 = scalar_select %p161_p10, %s4382_s16, 1  ;;  %3720 = vmatpush3.bf16.msra.mxu1 %v4098_v29 }
  0x16   : > { %3725 = vmatprep.subr.bf16.mxu1 %v4315_v1  ;;  %s4326_s26 = smov 84   ;;  %s5097_s29 = smov 80  }
  0x17   : > { %s3512_s4 = sshll.u32 %s162_s28, 2  ;;  %3710 = vmatpush3.bf16.msra.mxu0 %v4095_v3  ;;  %s4328_s30 = smov 52  }
  0x18   : > { %3711 = vmatprep.subr.bf16.mxu0 %v4315_v1  ;;  %s164_s9 = scalar_lea.vmem %s5083_s0, %s3512_s4  ;;  %s4329_s4 = smov 112  }
  0x19   : > { %v166_v5 = vld [vmem:[%s164_s9] sm:$0xf]  ;;  %s4320_s9 = smov 64   ;;  %s5095_s5 = smov 48  }
  0x1a   : > { %s5087_s19 = smov 108   ;;  %s5096_s20 = smov 76  }
  0x1b   : > { %3712 = vmatpush3.bf16.msra.mxu0 %v4096_v4  ;;  %s5088_s27 = smov 72   ;;  %s5094_s28 = smov 44  }
  0x1c   : > { %3731 = vmatprep.subr.bf16.mxu0 %v4315_v1 }
  0x1e   : > { %3714 = vmatmul.mubr.msk.bf16.vlgmr.msra.gmra.mrb[0].mxu0 %vm204_vm1, %v166_v5 }
  0x1f   : > { %3733 = vmatprep.mubr.msk.bf16.mxu0 %vm4316_vm0, %v4315_v1 }
  0xf1   : > { %v242_v8 = vpop.f32.mrb[0].mxu0 }
  0xf2   : > { %v243_v9 = vadd.f32 %v3513_v7, %v242_v8  ;;  %v3715_v10 = vpop.f32.mrb[1].mxu0 }
  0xf3   : > { %v245_v11 = vpop.f32.mrb[2].mxu0 }
  0xf4   : > { %v248_v12 = vmax.f32 %v243_v9, 0.0  ;;  %v3716_v13 = vpop.f32.mrb[3].mxu0 }
  0xf6   : > { %250 = vst.msk [vmem:[#allocation2] sm:$0xff] %vm249_vm3, %v248_v12 }
  0xf7   : > { %252 = vst.msk [vmem:[#allocation2 + $0x8] sm:$0x1] %vm251_vm2, %v248_v12 }
  0xfd   : > { %v255_v14 = vld [vmem:[#allocation2] sm:$0xff] }
  0xfe   : > { %v259_v15 = vsel %vm249_vm3, %v255_v14, 0.0  ;;  %v256_v16 = vld [vmem:[#allocation2 + $0x8] sm:$0x3] }
  0xff   : > { %260 = vadd.xlane.f32.xlu0 %v259_v15  ;;  %v263_v17 = vsel %vm262_vm4, %v256_v16, 0.0 }
 0x103   : > { %264 = vadd.xlane.f32.xlu0 %v263_v17 }
 0x18c   : > { %v261_v18 = vpop.xlane.xlu0 %260 }
 0x18d   : > { %v267_v19 = vmul.f32 0.03125, %v261_v18 }
 0x18f   : > { %v269_v20 = vsub.f32 %v255_v14, %v267_v19 }
 0x190   : > { %v265_v21 = vpop.xlane.xlu0 %264 }
 0x191   : > { %v268_v22 = vmul.f32 0.03125, %v265_v21  ;;  %v271_v23 = vmul.f32 %v269_v20, %v269_v20 }
 0x193   : > { %v270_v24 = vsub.f32 %v256_v16, %v268_v22  ;;  %v273_v25 = vsel %vm249_vm3, %v271_v23, 0.0 }
 0x194   : > { %274 = vadd.xlane.f32.xlu1 %v273_v25 }
 0x195   : > { %v272_v26 = vmul.f32 %v270_v24, %v270_v24 }
 0x197   : > { %v276_v27 = vsel %vm262_vm4, %v272_v26, 0.0 }
 0x198   : > { %277 = vadd.xlane.f32.xlu1 %v276_v27 }
 0x221   : > { %v275_v30 = vpop.xlane.xlu1 %274 }
 0x222   : > { %v279_v31 = vmul.f32 0.03125, %v275_v30 }
 0x224   : > { %v281_v32 = vadd.f32 1e-05, %v279_v31 }
 0x225   : > { %v278_v33 = vpop.xlane.xlu1 %277 }
 0x226   : > { %4111 = vrsqrt.f32 %v281_v32  ;;  %v280_v34 = vmul.f32 0.03125, %v278_v33 }
 0x228   : > { %v282_v35 = vadd.f32 1e-05, %v280_v34 }
 0x22a   : > { %4113 = vrsqrt.f32 %v282_v35 }
 0x230   : > { %v4112_v36 = vpop.eup %4111 }
 0x231   : > { %v285_v37 = vmul.f32 %v4112_v36, %v269_v20 }
 0x233   : > { %v291_v41 = vmul.f32 %v3519_v38, %v285_v37 }
 0x234   : > { %v4114_v39 = vpop.eup %4113 }
 0x235   : > { %v286_v40 = vmul.f32 %v4114_v39, %v270_v24  ;;  %v297_v44 = vadd.f32 %v3520_v42, %v291_v41 }
 0x237   : > { %v292_v43 = vmul.f32 %v3519_v38, %v286_v40 }
 0x239   : > { %v298_v45 = vadd.f32 %v3520_v42, %v292_v43  ;;  %v304_v42 = vld [vmem:[%s5084_s1 + $0x30] sm:$0xf] }
 0x23a   : > { %v3529_v43 = vcombine.low %v304_v42, %v304_v42 }
 0x23b   : > { %v309_v46 = vpack.c.bf16 %v298_v45, %v297_v44  ;;  %v690_v44 = vsel %vm641_vm9, %v304_v42, 0 }
 0x23c   : > { %v637_v45 = vrot.slane %v3529_v43, 2 }
 0x23d   : > { %3722 = vmatmul.mubr.msk.bf16.vlgmr.msra.gmra.mrb[0].mxu1 %vm249_vm3, %v309_v46 }
 0x23e   : > { %3727 = vmatprep.mubr.msk.bf16.mxu1 %vm4316_vm0, %v4315_v1  ;;  %v643_v46 = vsel %vm641_vm9, %v637_v45, 0  ;;  %v4567_v45 = vld [vmem:[%s5084_s1 + $0x34] sm:$0xf] }
 0x310   : > { %v363_v48 = vpop.f32.mrb[0].mxu1 }
 0x311   : > { %v364_v49 = vadd.f32 %v3521_v47, %v363_v48  ;;  %v3723_v50 = vpop.f32.mrb[1].mxu1 }
 0x312   : > { %v366_v51 = vpop.f32.mrb[2].mxu1 }
 0x313   : > { %v367_v52 = vadd.f32 %v3521_v47, %v366_v51  ;;  %v3724_v53 = vpop.f32.mrb[3].mxu1  ;;  %v370_v54 = vmul.f32 0.5, %v364_v49 }
 0x315   : > { %v371_v55 = vmul.f32 0.5, %v367_v52  ;;  %v4469_v56 = vpack.c.bf16 %v367_v52, %v364_v49 }
 0x317   : > { %v4471_v57 = vpack.c.bf16 %v371_v55, %v370_v54  ;;  %508 = vrot.lane.b32.xlu1 %v4469_v56, %s4317_s6  ;;  %375 = vrot.lane.b32.xlu0 %v4469_v56, %s4318_s7 }
 0x31b   : > { %506 = vrot.lane.b32.xlu1 %v4471_v57, %s4319_s8 }
 0x389   : > { %v376_v58 = vpop.permute.xlu0 %375  ;;  %v509_v60 = vpop.permute.xlu1 %508 }
 0x38a   : > { %v382_v59 = vsel %vm377_vm5, %v376_v58, 0  ;;  %v514_v61 = vsel %vm377_vm5, %v509_v60, 0 }
 0x38b   : > { %3726 = vmatpush3.bf16.xpose.msra.mxu1 %v382_v59 }
 0x38c   : > { %3737 = vmatprep.subr.bf16.mxu1 %v4315_v1 }
 0x38d   : > { %v507_v62 = vpop.permute.xlu1 %506 }
 0x392   : > { %3728 = vmatmul.mubr.msk.bf16.vlgmr.msra.gmra.mrb[4].mxu1 %vm377_vm5, %v4471_v57 }
 0x393   : > { %3738 = vmatpush3.bf16.xpose.msra.mxu1 %v514_v61  ;;  %3739 = vmatprep.mubr.msk.bf16.mxu1 %vm4316_vm0, %v4315_v1 }
 0x394   : > { %3749 = vmatprep.subr.bf16.mxu1 %v4315_v1 }
 0x39a   : > { %3740 = vmatmul.mubr.msk.bf16.vlgmr.msra.gmra.mrb[8].mxu1 %vm377_vm5, %v507_v62 }
 0x39b   : > { %3751 = vmatprep.mubr.msk.bf16.mxu1 %vm4316_vm0, %v4315_v1  ;;  %3750 = vmatpush3.bf16.msra.mxu1 %v643_v46  ;;  %v865_v46 = vsel %vm641_vm9, %v4567_v45, 0 }
 0x39c   : > { %3761 = vmatprep.subr.bf16.mxu1 %v4315_v1 }
 0x465   : > { %v418_v63 = vpop.f32.mrb[4].mxu1 }
 0x466   : > { %426 = vst.msk [vmem:[#allocation3] sm:$0xff] %vm425_vm6, %v418_v63  ;;  %v3729_v0 = vpop.f32.mrb[5].mxu1 }
 0x467   : > { %v421_v2 = vpop.f32.mrb[6].mxu1 }
 0x468   : > { %428 = vst.msk [vmem:[#allocation3 + $0x8] sm:$0x3] %vm427_vm7, %v421_v2  ;;  %v3730_v3 = vpop.f32.mrb[7].mxu1 }
 0x46d   : > { %v550_v4 = vpop.f32.mrb[8].mxu1  ;;  %v429_v5 = vld [vmem:[#allocation3] sm:$0xff] }
 0x46e   : > { %v3741_v6 = vpop.f32.mrb[9].mxu1  ;;  %v431_v7 = vsel %vm425_vm6, %v429_v5, -inf  ;;  %557 = vst.msk [vmem:[#allocation3] sm:$0xff] %vm425_vm6, %v550_v4 }
 0x46f   : > { %v430_v8 = vld [vmem:[#allocation3 + $0x8] sm:$0x3]  ;;  %432 = vmax.xlane.f32.xlu1 %v431_v7  ;;  %v553_v9 = vpop.f32.mrb[10].mxu1 }
 0x470   : > { %558 = vst.msk [vmem:[#allocation3 + $0x8] sm:$0x3] %vm427_vm7, %v553_v9  ;;  %v3742_v10 = vpop.f32.mrb[11].mxu1  ;;  %v434_v11 = vsel %vm427_vm7, %v430_v8, -inf }
 0x471   : > { %435 = vmax.xlane.f32.xlu0 %v434_v11 }
 0x475   : > { %v559_v12 = vld [vmem:[#allocation3] sm:$0xff] }
 0x476   : > { %v561_v13 = vsel %vm425_vm6, %v559_v12, -inf }
 0x477   : > { %v560_v14 = vld [vmem:[#allocation3 + $0x8] sm:$0x3]  ;;  %562 = vmax.xlane.f32.xlu0 %v561_v13 }
 0x478   : > { %v564_v15 = vsel %vm427_vm7, %v560_v14, -inf }
 0x47b   : > { %565 = vmax.xlane.f32.xlu0 %v564_v15 }
 0x480   : > { %450 = vrot.lane.b32.xlu1 %v4469_v56, %s4320_s9 }
 0x491   : > { %580 = vrot.lane.b32.xlu0 %v4469_v56, %s4321_s10 }
 0x4fc   : > { %v433_v16 = vpop.xlane.xlu1 %432 }
 0x4fd   : > { %v437_v17 = vsub.f32 %v429_v5, %v433_v16 }
 0x4fe   : > { %v436_v18 = vpop.xlane.xlu0 %435 }
 0x4ff   : > { %v439_v19 = vmul.f32 1.442695, %v437_v17  ;;  %v438_v20 = vsub.f32 %v430_v8, %v436_v18 }
 0x500   : > { %v451_v21 = vpop.permute.xlu1 %450 }
 0x501   : > { %v441_v22 = vmul.f32 1.442695, %v438_v20  ;;  %v457_v23 = vsel %vm455_vm8, %v451_v21, 0  ;;  %4115 = vpow2.f32 %v439_v19 }
 0x502   : > { %3732 = vmatpush3.bf16.msra.mxu0 %v457_v23 }
 0x503   : > { %4117 = vpow2.f32 %v441_v22  ;;  %3743 = vmatprep.subr.bf16.mxu0 %v4315_v1 }
 0x504   : > { %v563_v24 = vpop.xlane.xlu0 %562 }
 0x505   : > { %v567_v25 = vsub.f32 %v559_v12, %v563_v24 }
 0x507   : > { %v569_v26 = vmul.f32 1.442695, %v567_v25 }
 0x508   : > { %v566_v27 = vpop.xlane.xlu0 %565 }
 0x509   : > { %4119 = vpow2.f32 %v569_v26  ;;  %v568_v28 = vsub.f32 %v560_v14, %v566_v27 }
 0x50b   : > { %v571_v29 = vmul.f32 1.442695, %v568_v28  ;;  %v4116_v30 = vpop.eup %4115 }
 0x50c   : > { %v581_v32 = vpop.permute.xlu0 %580  ;;  %v443_v40 = vsel %vm425_vm6, %v4116_v30, 0.0 }
 0x50d   : > { %v4118_v31 = vpop.eup %4117  ;;  %4121 = vpow2.f32 %v571_v29  ;;  %v586_v34 = vsel %vm455_vm8, %v581_v32, 0 }
 0x50e   : > { %v449_v33 = vpack.c.bf16 %v4118_v31, %v4116_v30  ;;  %v446_v41 = vsel %vm427_vm7, %v4118_v31, 0.0 }
 0x510   : > { %3734 = vmatmul.mubr.msk.bf16.vlgmr.msra.gmra.mrb[4].mxu0 %vm425_vm6, %v449_v33 }
 0x511   : > { %3744 = vmatpush3.bf16.msra.mxu0 %v586_v34  ;;  %3745 = vmatprep.mubr.msk.bf16.mxu0 %vm4316_vm0, %v4315_v1 }
 0x512   : > { %3755 = vmatprep.subr.bf16.mxu0 %v4315_v1 }
 0x513   : > { %v4120_v35 = vpop.eup %4119 }
 0x514   : > { %v573_v36 = vsel %vm425_vm6, %v4120_v35, 0.0 }
 0x515   : > { %574 = vadd.xlane.f32.xlu1 %v573_v36 }
 0x517   : > { %v4122_v37 = vpop.eup %4121 }
 0x518   : > { %v576_v38 = vsel %vm427_vm7, %v4122_v37, 0.0  ;;  %v579_v39 = vpack.c.bf16 %v4122_v37, %v4120_v35 }
 0x519   : > { %577 = vadd.xlane.f32.xlu0 %v576_v38 }
 0x51a   : > { %3746 = vmatmul.mubr.msk.bf16.vlgmr.msra.gmra.mrb[8].mxu0 %vm425_vm6, %v579_v39 }
 0x51b   : > { %3757 = vmatprep.mubr.msk.bf16.mxu0 %vm4316_vm0, %v4315_v1  ;;  %3756 = vmatpush3.bf16.msra.mxu0 %v690_v44 }
 0x51c   : > { %3767 = vmatprep.subr.bf16.mxu0 %v4315_v1 }
 0x526   : > { %735 = vrot.lane.b32.xlu1 %v4469_v56, %s4322_s11 }
 0x52f   : > { %733 = vrot.lane.b32.xlu0 %v4471_v57, %s4323_s17 }
 0x54a   : > { %444 = vadd.xlane.f32.xlu1 %v443_v40 }
 0x54e   : > { %447 = vadd.xlane.f32.xlu0 %v446_v41 }
 0x5a2   : > { %v575_v47 = vpop.xlane.xlu1 %574 }
 0x5a6   : > { %v578_v48 = vpop.xlane.xlu0 %577  ;;  %v736_v49 = vpop.permute.xlu1 %735 }
 0x5a7   : > { %v741_v10 = vsel %vm377_vm5, %v736_v49, 0 }
 0x5aa   : > { %v734_v50 = vpop.permute.xlu0 %733 }
 0x5d7   : > { %v445_v51 = vpop.xlane.xlu1 %444 }
 0x5d8   : > { %4123 = vrcp.f32 %v445_v51 }
 0x5db   : > { %v448_v52 = vpop.xlane.xlu0 %447 }
 0x5dc   : > { %4125 = vrcp.f32 %v448_v52 }
 0x5dd   : > { %4127 = vrcp.f32 %v575_v47 }
 0x5de   : > { %4129 = vrcp.f32 %v578_v48 }
 0x5e2   : > { %v4124_v54 = vpop.eup %4123 }
 0x5e3   : > { %v493_v53 = vpop.f32.mrb[4].mxu0 }
 0x5e4   : > { %v3735_v55 = vpop.f32.mrb[5].mxu0  ;;  %v502_v61 = vmul.f32 %v4124_v54, %v493_v53 }
 0x5e5   : > { %v496_v58 = vpop.f32.mrb[6].mxu0 }
 0x5e6   : > { %v4126_v59 = vpop.eup %4125  ;;  %v3736_v60 = vpop.f32.mrb[7].mxu0 }
 0x5e7   : > { %v503_v62 = vmul.f32 %v4126_v59, %v496_v58  ;;  %v4128_v2 = vpop.eup %4127 }
 0x5e8   : > { %v4130_v4 = vpop.eup %4129 }
 0x5e9   : > { %v504_v63 = vpack.c.bf16 %v503_v62, %v502_v61 }
 0x5eb   : > { %3758 = vmatmul.mubr.msk.bf16.vlgmr.msra.gmra.mrb[12].mxu0 %vm377_vm5, %v504_v63 }
 0x5ec   : > { %3769 = vmatprep.mubr.msk.bf16.mxu0 %vm4316_vm0, %v4315_v1 }
 0x5ed   : > { %v622_v0 = vpop.f32.mrb[8].mxu0 }
 0x5ee   : > { %v3747_v3 = vpop.f32.mrb[9].mxu0  ;;  %v631_v6 = vmul.f32 %v4128_v2, %v622_v0 }
 0x5ef   : > { %v625_v5 = vpop.f32.mrb[10].mxu0 }
 0x5f0   : > { %v632_v7 = vmul.f32 %v4130_v4, %v625_v5  ;;  %v3748_v8 = vpop.f32.mrb[11].mxu0 }
 0x5f2   : > { %v633_v9 = vpack.c.bf16 %v632_v7, %v631_v6 }
 0x5f4   : > { %3752 = vmatmul.mubr.msk.bf16.vlgmr.msra.gmra.mrb[12].mxu1 %vm377_vm5, %v633_v9 }
 0x5f5   : > { %3762 = vmatpush3.bf16.xpose.msra.mxu1 %v741_v10  ;;  %3763 = vmatprep.mubr.msk.bf16.mxu1 %vm4316_vm0, %v4315_v1 }
 0x5f6   : > { %3773 = vmatprep.subr.bf16.mxu1 %v4315_v1 }
 0x5fc   : > { %3764 = vmatmul.mubr.msk.bf16.vlgmr.msra.gmra.mrb[16].mxu1 %vm377_vm5, %v734_v50 }
 0x5fd   : > { %3775 = vmatprep.mubr.msk.bf16.mxu1 %vm4316_vm0, %v4315_v1  ;;  %3774 = vmatpush3.bf16.msra.mxu1 %v865_v46 }
 0x5fe   : > { %3785 = vmatprep.subr.bf16.mxu1 %v4315_v1 }
 0x6be   : > { %v726_v11 = vpop.f32.mrb[12].mxu0 }
 0x6bf   : > { %v3759_v12 = vpop.f32.mrb[13].mxu0 }
 0x6c0   : > { %v729_v13 = vpop.f32.mrb[14].mxu0 }
 0x6c1   : > { %v3760_v14 = vpop.f32.mrb[15].mxu0 }
 0x6c7   : > { %v679_v15 = vpop.f32.mrb[12].mxu1 }
 0x6c8   : > { %v4538_v16 = vadd.f32 %v726_v11, %v679_v15  ;;  %v3753_v17 = vpop.f32.mrb[13].mxu1 }
 0x6c9   : > { %v682_v18 = vpop.f32.mrb[14].mxu1 }
 0x6ca   : > { %v4540_v19 = vadd.f32 %v729_v13, %v682_v18  ;;  %v3754_v20 = vpop.f32.mrb[15].mxu1 }
 0x6cf   : > { %v777_v21 = vpop.f32.mrb[16].mxu1 }
 0x6d0   : > { %784 = vst.msk [vmem:[#allocation3] sm:$0xff] %vm425_vm6, %v777_v21  ;;  %v3765_v22 = vpop.f32.mrb[17].mxu1 }
 0x6d1   : > { %v780_v23 = vpop.f32.mrb[18].mxu1 }
 0x6d2   : > { %785 = vst.msk [vmem:[#allocation3 + $0x8] sm:$0x3] %vm427_vm7, %v780_v23  ;;  %v3766_v24 = vpop.f32.mrb[19].mxu1 }
 0x6d7   : > { %v786_v25 = vld [vmem:[#allocation3] sm:$0xff] }
 0x6d8   : > { %v788_v26 = vsel %vm425_vm6, %v786_v25, -inf }
 0x6d9   : > { %v787_v27 = vld [vmem:[#allocation3 + $0x8] sm:$0x3]  ;;  %789 = vmax.xlane.f32.xlu1 %v788_v26 }
 0x6da   : > { %v791_v28 = vsel %vm427_vm7, %v787_v27, -inf }
 0x6db   : > { %792 = vmax.xlane.f32.xlu0 %v791_v28 }
 0x6ea   : > { %807 = vrot.lane.b32.xlu1 %v4469_v56, %s4324_s24 }
 0x6ee   : > { %910 = vrot.lane.b32.xlu1 %v4471_v57, %s4325_s25 }
 0x6f1   : > { %912 = vrot.lane.b32.xlu0 %v4469_v56, %s4326_s26 }
 0x766   : > { %v790_v29 = vpop.xlane.xlu1 %789 }
 0x767   : > { %v794_v30 = vsub.f32 %v786_v25, %v790_v29  ;;  %v3537_v29 = vcombine.low %v4567_v45, %v4567_v45 }
 0x768   : > { %v793_v31 = vpop.xlane.xlu0 %792 }
 0x769   : > { %v796_v32 = vmul.f32 1.442695, %v794_v30  ;;  %v795_v33 = vsub.f32 %v787_v27, %v793_v31  ;;  %v1041_v30 = vrot.slane %v3537_v29, 2 }
 0x76a   : > { %v808_v34 = vpop.permute.xlu1 %807 }
 0x76b   : > { %4131 = vpow2.f32 %v796_v32  ;;  %v798_v35 = vmul.f32 1.442695, %v795_v33  ;;  %v813_v36 = vsel %vm455_vm8, %v808_v34, 0  ;;  %v1046_v31 = vsel %vm641_vm9, %v1041_v30, 0 }
 0x76c   : > { %3768 = vmatpush3.bf16.msra.mxu0 %v813_v36  ;;  %v913_v40 = vpop.permute.xlu0 %912 }
 0x76d   : > { %4133 = vpow2.f32 %v798_v35  ;;  %3779 = vmatprep.subr.bf16.mxu0 %v4315_v1  ;;  %v918_v43 = vsel %vm377_vm5, %v913_v40, 0 }
 0x76e   : > { %v911_v44 = vpop.permute.xlu1 %910 }
 0x775   : > { %v4132_v37 = vpop.eup %4131 }
 0x776   : > { %v800_v38 = vsel %vm425_vm6, %v4132_v37, 0.0 }
 0x777   : > { %v4134_v39 = vpop.eup %4133  ;;  %801 = vadd.xlane.f32.xlu1 %v800_v38 }
 0x778   : > { %v803_v41 = vsel %vm427_vm7, %v4134_v39, 0.0  ;;  %v806_v42 = vpack.c.bf16 %v4134_v39, %v4132_v37 }
 0x779   : > { %804 = vadd.xlane.f32.xlu0 %v803_v41 }
 0x77a   : > { %3770 = vmatmul.mubr.msk.bf16.vlgmr.msra.gmra.mrb[16].mxu0 %vm425_vm6, %v806_v42 }
 0x77b   : > { %3780 = vmatpush3.bf16.xpose.msra.mxu0 %v918_v43  ;;  %3781 = vmatprep.mubr.msk.bf16.mxu0 %vm4316_vm0, %v4315_v1 }
 0x77c   : > { %3791 = vmatprep.subr.bf16.mxu0 %v4315_v1 }
 0x782   : > { %3782 = vmatmul.mubr.msk.bf16.vlgmr.msra.gmra.mrb[20].mxu0 %vm377_vm5, %v911_v44 }
 0x783   : > { %3793 = vmatprep.mubr.msk.bf16.mxu0 %vm4316_vm0, %v4315_v1  ;;  %3792 = vmatpush3.bf16.msra.mxu0 %v1046_v31 }
 0x784   : > { %3803 = vmatprep.subr.bf16.mxu0 %v4315_v1 }
 0x804   : > { %v802_v47 = vpop.xlane.xlu1 %801 }
 0x805   : > { %4135 = vrcp.f32 %v802_v47 }
 0x806   : > { %v805_v48 = vpop.xlane.xlu0 %804 }
 0x807   : > { %4137 = vrcp.f32 %v805_v48 }
 0x80f   : > { %v4136_v50 = vpop.eup %4135 }
 0x811   : > { %v4138_v52 = vpop.eup %4137 }
 0x84d   : > { %v849_v49 = vpop.f32.mrb[16].mxu0 }
 0x84e   : > { %v3771_v51 = vpop.f32.mrb[17].mxu0  ;;  %v858_v54 = vmul.f32 %v4136_v50, %v849_v49 }
 0x84f   : > { %v852_v53 = vpop.f32.mrb[18].mxu0 }
 0x850   : > { %v859_v55 = vmul.f32 %v4138_v52, %v852_v53  ;;  %v3772_v58 = vpop.f32.mrb[19].mxu0 }
 0x852   : > { %v860_v59 = vpack.c.bf16 %v859_v55, %v858_v54 }
 0x854   : > { %3776 = vmatmul.mubr.msk.bf16.vlgmr.msra.gmra.mrb[20].mxu1 %vm377_vm5, %v860_v59 }
 0x855   : > { %v954_v60 = vpop.f32.mrb[20].mxu0  ;;  %3787 = vmatprep.mubr.msk.bf16.mxu1 %vm4316_vm0, %v4315_v1 }
 0x856   : > { %961 = vst.msk [vmem:[#allocation3] sm:$0xff] %vm425_vm6, %v954_v60  ;;  %v3783_v61 = vpop.f32.mrb[21].mxu0 }
 0x857   : > { %v957_v62 = vpop.f32.mrb[22].mxu0 }
 0x858   : > { %962 = vst.msk [vmem:[#allocation3 + $0x8] sm:$0x3] %vm427_vm7, %v957_v62  ;;  %v3784_v63 = vpop.f32.mrb[23].mxu0 }
 0x85d   : > { %v963_v0 = vld [vmem:[#allocation3] sm:$0xff] }
 0x85e   : > { %v965_v2 = vsel %vm425_vm6, %v963_v0, -inf }
 0x85f   : > { %v964_v3 = vld [vmem:[#allocation3 + $0x8] sm:$0x3]  ;;  %966 = vmax.xlane.f32.xlu0 %v965_v2 }
 0x860   : > { %v968_v4 = vsel %vm427_vm7, %v964_v3, -inf }
 0x861   : > { %969 = vmax.xlane.f32.xlu1 %v968_v4 }
 0x872   : > { %1093 = vrot.lane.b32.xlu1 %v4469_v56, %s5097_s29 }
 0x875   : > { %984 = vrot.lane.b32.xlu0 %v4469_v56, %s4328_s30 }
 0x876   : > { %1091 = vrot.lane.b32.xlu1 %v4471_v57, %s4329_s4 }
 0x8ec   : > { %v967_v5 = vpop.xlane.xlu0 %966 }
 0x8ed   : > { %v971_v6 = vsub.f32 %v963_v0, %v967_v5 }
 0x8ee   : > { %v970_v7 = vpop.xlane.xlu1 %969 }
 0x8ef   : > { %v973_v8 = vmul.f32 1.442695, %v971_v6  ;;  %v972_v9 = vsub.f32 %v964_v3, %v970_v7 }
 0x8f0   : > { %v985_v10 = vpop.permute.xlu0 %984 }
 0x8f1   : > { %4139 = vpow2.f32 %v973_v8  ;;  %v975_v11 = vmul.f32 1.442695, %v972_v9  ;;  %v990_v12 = vsel %vm455_vm8, %v985_v10, 0  ;;  %v4641_v10 = vld [vmem:[%s5084_s1 + $0x38] sm:$0xf] }
 0x8f2   : > { %3786 = vmatpush3.bf16.msra.mxu1 %v990_v12  ;;  %v1094_v17 = vpop.permute.xlu1 %1093 }
 0x8f3   : > { %4141 = vpow2.f32 %v975_v11  ;;  %3797 = vmatprep.subr.bf16.mxu1 %v4315_v1  ;;  %v1099_v21 = vsel %vm377_vm5, %v1094_v17, 0  ;;  %v1223_v11 = vsel %vm641_vm9, %v4641_v10, 0 }
 0x8f6   : > { %v1092_v22 = vpop.permute.xlu1 %1091 }
 0x8fb   : > { %v4140_v13 = vpop.eup %4139 }
 0x8fc   : > { %v977_v14 = vsel %vm425_vm6, %v4140_v13, 0.0 }
 0x8fd   : > { %v4142_v15 = vpop.eup %4141  ;;  %978 = vadd.xlane.f32.xlu1 %v977_v14 }
 0x8fe   : > { %v980_v18 = vsel %vm427_vm7, %v4142_v15, 0.0  ;;  %v983_v20 = vpack.c.bf16 %v4142_v15, %v4140_v13 }
 0x8ff   : > { %981 = vadd.xlane.f32.xlu0 %v980_v18 }
 0x900   : > { %3788 = vmatmul.mubr.msk.bf16.vlgmr.msra.gmra.mrb[24].mxu1 %vm425_vm6, %v983_v20 }
 0x901   : > { %3798 = vmatpush3.bf16.xpose.msra.mxu1 %v1099_v21  ;;  %3799 = vmatprep.mubr.msk.bf16.mxu1 %vm4316_vm0, %v4315_v1 }
 0x902   : > { %3809 = vmatprep.subr.bf16.mxu1 %v4315_v1 }
 0x908   : > { %3800 = vmatmul.mubr.msk.bf16.vlgmr.msra.gmra.mrb[28].mxu1 %vm377_vm5, %v1092_v22 }
 0x909   : > { %3811 = vmatprep.mubr.msk.bf16.mxu1 %vm4316_vm0, %v4315_v1  ;;  %3810 = vmatpush3.bf16.msra.mxu1 %v1223_v11 }
 0x90a   : > { %3821 = vmatprep.subr.bf16.mxu1 %v4315_v1 }
 0x90e   : > { %1165 = vrot.lane.b32.xlu1 %v4469_v56, %s5095_s5  ;;  %s5110_s5 = smov 36  }
 0x912   : > { %1268 = vrot.lane.b32.xlu1 %v4471_v57, %s5087_s19  ;;  %s5089_s19 = smov 104  }
 0x927   : > { %v901_v23 = vpop.f32.mrb[20].mxu1 }
 0x928   : > { %v4602_v24 = vadd.f32 %v901_v23, %v4538_v16  ;;  %v3777_v25 = vpop.f32.mrb[21].mxu1 }
 0x929   : > { %v904_v26 = vpop.f32.mrb[22].mxu1 }
 0x92a   : > { %v4605_v27 = vadd.f32 %v904_v26, %v4540_v19  ;;  %v3778_v28 = vpop.f32.mrb[23].mxu1 }
 0x98a   : > { %v979_v32 = vpop.xlane.xlu1 %978 }
 0x98b   : > { %4143 = vrcp.f32 %v979_v32 }
 0x98c   : > { %v982_v33 = vpop.xlane.xlu0 %981 }
 0x98d   : > { %4145 = vrcp.f32 %v982_v33 }
 0x98e   : > { %v1166_v40 = vpop.permute.xlu1 %1165 }
 0x98f   : > { %v1171_v42 = vsel %vm455_vm8, %v1166_v40, 0 }
 0x992   : > { %v1269_v3 = vpop.permute.xlu1 %1268 }
 0x995   : > { %v4144_v34 = vpop.eup %4143 }
 0x997   : > { %v4146_v36 = vpop.eup %4145 }
 0x9d3   : > { %v1026_v16 = vpop.f32.mrb[24].mxu1 }
 0x9d4   : > { %v3789_v35 = vpop.f32.mrb[25].mxu1  ;;  %v1035_v37 = vmul.f32 %v4144_v34, %v1026_v16 }
 0x9d5   : > { %v1029_v19 = vpop.f32.mrb[26].mxu1 }
 0x9d6   : > { %v1036_v38 = vmul.f32 %v4146_v36, %v1029_v19  ;;  %v3790_v39 = vpop.f32.mrb[27].mxu1 }
 0x9d8   : > { %v1037_v41 = vpack.c.bf16 %v1036_v38, %v1035_v37 }
 0x9da   : > { %3794 = vmatmul.mubr.msk.bf16.vlgmr.msra.gmra.mrb[24].mxu0 %vm377_vm5, %v1037_v41 }
 0x9db   : > { %3804 = vmatpush3.bf16.msra.mxu0 %v1171_v42  ;;  %v1135_v43 = vpop.f32.mrb[28].mxu1  ;;  %3805 = vmatprep.mubr.msk.bf16.mxu0 %vm4316_vm0, %v4315_v1 }
 0x9dc   : > { %1142 = vst.msk [vmem:[#allocation3] sm:$0xff] %vm425_vm6, %v1135_v43  ;;  %v3801_v44 = vpop.f32.mrb[29].mxu1  ;;  %3815 = vmatprep.subr.bf16.mxu0 %v4315_v1 }
 0x9dd   : > { %v1138_v45 = vpop.f32.mrb[30].mxu1 }
 0x9de   : > { %1143 = vst.msk [vmem:[#allocation3 + $0x8] sm:$0x3] %vm427_vm7, %v1138_v45  ;;  %v3802_v46 = vpop.f32.mrb[31].mxu1 }
 0x9e3   : > { %v1144_v47 = vld [vmem:[#allocation3] sm:$0xff] }
 0x9e4   : > { %v1146_v48 = vsel %vm425_vm6, %v1144_v47, -inf }
 0x9e5   : > { %1147 = vmax.xlane.f32.xlu0 %v1146_v48  ;;  %v1145_v49 = vld [vmem:[#allocation3 + $0x8] sm:$0x3] }
 0x9e6   : > { %v1149_v50 = vsel %vm427_vm7, %v1145_v49, -inf }
 0x9e9   : > { %1150 = vmax.xlane.f32.xlu0 %v1149_v50 }
 0x9ff   : > { %1270 = vrot.lane.b32.xlu0 %v4469_v56, %s5096_s20  ;;  %s5107_s20 = smov 68  }
 0xa72   : > { %v1148_v51 = vpop.xlane.xlu0 %1147 }
 0xa73   : > { %v1152_v52 = vsub.f32 %v1144_v47, %v1148_v51 }
 0xa75   : > { %v1154_v53 = vmul.f32 1.442695, %v1152_v52 }
 0xa76   : > { %v1151_v54 = vpop.xlane.xlu0 %1150 }
 0xa77   : > { %4147 = vpow2.f32 %v1154_v53  ;;  %v1153_v55 = vsub.f32 %v1145_v49, %v1151_v54  ;;  %v3544_v53 = vcombine.low %v4641_v10, %v4641_v10 }
 0xa79   : > { %v1156_v58 = vmul.f32 1.442695, %v1153_v55  ;;  %v1399_v54 = vrot.slane %v3544_v53, 2 }
 0xa7a   : > { %v1271_v62 = vpop.permute.xlu0 %1270 }
 0xa7b   : > { %4149 = vpow2.f32 %v1156_v58  ;;  %v1276_v2 = vsel %vm377_vm5, %v1271_v62, 0  ;;  %v1404_v55 = vsel %vm641_vm9, %v1399_v54, 0 }
 0xa81   : > { %v4148_v59 = vpop.eup %4147 }
 0xa82   : > { %v1158_v60 = vsel %vm425_vm6, %v4148_v59, 0.0 }
 0xa83   : > { %1159 = vadd.xlane.f32.xlu1 %v1158_v60 }
 0xa85   : > { %v4150_v61 = vpop.eup %4149 }
 0xa86   : > { %v1161_v63 = vsel %vm427_vm7, %v4150_v61, 0.0  ;;  %v1164_v0 = vpack.c.bf16 %v4150_v61, %v4148_v59 }
 0xa87   : > { %1162 = vadd.xlane.f32.xlu0 %v1161_v63 }
 0xa88   : > { %3806 = vmatmul.mubr.msk.bf16.vlgmr.msra.gmra.mrb[28].mxu0 %vm425_vm6, %v1164_v0 }
 0xa89   : > { %3816 = vmatpush3.bf16.xpose.msra.mxu0 %v1276_v2  ;;  %3817 = vmatprep.mubr.msk.bf16.mxu0 %vm4316_vm0, %v4315_v1 }
 0xa8a   : > { %3827 = vmatprep.subr.bf16.mxu0 %v4315_v1 }
 0xa90   : > { %3818 = vmatmul.mubr.msk.bf16.vlgmr.msra.gmra.mrb[32].mxu0 %vm377_vm5, %v1269_v3 }
 0xa91   : > { %3829 = vmatprep.mubr.msk.bf16.mxu0 %vm4316_vm0, %v4315_v1  ;;  %3828 = vmatpush3.bf16.msra.mxu0 %v1404_v55 }
 0xa92   : > { %3839 = vmatprep.subr.bf16.mxu0 %v4315_v1 }
 0xaad   : > { %v1082_v4 = vpop.f32.mrb[24].mxu0 }
 0xaae   : > { %v4633_v5 = vadd.f32 %v1082_v4, %v4602_v24  ;;  %v3795_v6 = vpop.f32.mrb[25].mxu0 }
 0xaaf   : > { %v1085_v7 = vpop.f32.mrb[26].mxu0 }
 0xab0   : > { %v4636_v8 = vadd.f32 %v1085_v7, %v4605_v27  ;;  %v3796_v9 = vpop.f32.mrb[27].mxu0 }
 0xb10   : > { %v1160_v12 = vpop.xlane.xlu1 %1159 }
 0xb11   : > { %4151 = vrcp.f32 %v1160_v12 }
 0xb14   : > { %v1163_v13 = vpop.xlane.xlu0 %1162 }
 0xb15   : > { %4153 = vrcp.f32 %v1163_v13 }
 0xb1b   : > { %v4152_v15 = vpop.eup %4151 }
 0xb1f   : > { %v4154_v18 = vpop.eup %4153 }
 0xb5b   : > { %v1207_v14 = vpop.f32.mrb[28].mxu0 }
 0xb5c   : > { %v3807_v17 = vpop.f32.mrb[29].mxu0  ;;  %v1216_v21 = vmul.f32 %v4152_v15, %v1207_v14 }
 0xb5d   : > { %v1210_v20 = vpop.f32.mrb[30].mxu0 }
 0xb5e   : > { %v1217_v22 = vmul.f32 %v4154_v18, %v1210_v20  ;;  %v3808_v23 = vpop.f32.mrb[31].mxu0 }
 0xb60   : > { %v1218_v24 = vpack.c.bf16 %v1217_v22, %v1216_v21 }
 0xb62   : > { %3812 = vmatmul.mubr.msk.bf16.vlgmr.msra.gmra.mrb[32].mxu1 %vm377_vm5, %v1218_v24 }
 0xb63   : > { %v1312_v25 = vpop.f32.mrb[32].mxu0  ;;  %3823 = vmatprep.mubr.msk.bf16.mxu1 %vm4316_vm0, %v4315_v1 }
 0xb64   : > { %1319 = vst.msk [vmem:[#allocation3] sm:$0xff] %vm425_vm6, %v1312_v25  ;;  %v3819_v26 = vpop.f32.mrb[33].mxu0 }
 0xb65   : > { %v1315_v27 = vpop.f32.mrb[34].mxu0 }
 0xb66   : > { %1320 = vst.msk [vmem:[#allocation3 + $0x8] sm:$0x3] %vm427_vm7, %v1315_v27  ;;  %v3820_v28 = vpop.f32.mrb[35].mxu0 }
 0xb6b   : > { %v1321_v29 = vld [vmem:[#allocation3] sm:$0xff] }
 0xb6c   : > { %v1323_v30 = vsel %vm425_vm6, %v1321_v29, -inf }
 0xb6d   : > { %1324 = vmax.xlane.f32.xlu0 %v1323_v30  ;;  %v1322_v31 = vld [vmem:[#allocation3 + $0x8] sm:$0x3] }
 0xb6e   : > { %v1326_v32 = vsel %vm427_vm7, %v1322_v31, -inf }
 0xb6f   : > { %1327 = vmax.xlane.f32.xlu1 %v1326_v32 }
 0xb80   : > { %1451 = vrot.lane.b32.xlu1 %v4469_v56, %s5088_s27  ;;  %s5091_s27 = smov 40  }
 0xb83   : > { %1342 = vrot.lane.b32.xlu0 %v4469_v56, %s5094_s28 }
 0xb84   : > { %1449 = vrot.lane.b32.xlu1 %v4471_v57, %s5089_s19  ;;  %s5090_s19 = smov 100  }
 0xbfa   : > { %v1325_v33 = vpop.xlane.xlu0 %1324 }
 0xbfb   : > { %v1329_v16 = vsub.f32 %v1321_v29, %v1325_v33 }
 0xbfc   : > { %v1328_v34 = vpop.xlane.xlu1 %1327 }
 0xbfd   : > { %v1331_v35 = vmul.f32 1.442695, %v1329_v16  ;;  %v1330_v36 = vsub.f32 %v1322_v31, %v1328_v34 }
 0xbfe   : > { %v1343_v19 = vpop.permute.xlu0 %1342 }
 0xbff   : > { %4155 = vpow2.f32 %v1331_v35  ;;  %v1333_v37 = vmul.f32 1.442695, %v1330_v36  ;;  %v1348_v38 = vsel %vm455_vm8, %v1343_v19, 0  ;;  %v307_v36 = vld [vmem:[%s5084_s1 + $0x3c] sm:$0xf] }
 0xc00   : > { %3822 = vmatpush3.bf16.msra.mxu1 %v1348_v38  ;;  %v1452_v42 = vpop.permute.xlu1 %1451  ;;  %v1581_v19 = vsel %vm641_vm9, %v307_v36, 0 }
 0xc01   : > { %4157 = vpow2.f32 %v1333_v37  ;;  %3833 = vmatprep.subr.bf16.mxu1 %v4315_v1  ;;  %v1457_v45 = vsel %vm377_vm5, %v1452_v42, 0 }
 0xc04   : > { %v1450_v46 = vpop.permute.xlu1 %1449 }
 0xc09   : > { %v4156_v39 = vpop.eup %4155 }
 0xc0a   : > { %v1335_v40 = vsel %vm425_vm6, %v4156_v39, 0.0 }
 0xc0b   : > { %v4158_v41 = vpop.eup %4157  ;;  %1336 = vadd.xlane.f32.xlu1 %v1335_v40 }
 0xc0c   : > { %v1338_v43 = vsel %vm427_vm7, %v4158_v41, 0.0  ;;  %v1341_v44 = vpack.c.bf16 %v4158_v41, %v4156_v39 }
 0xc0d   : > { %1339 = vadd.xlane.f32.xlu0 %v1338_v43 }
 0xc0e   : > { %3824 = vmatmul.mubr.msk.bf16.vlgmr.msra.gmra.mrb[36].mxu1 %vm425_vm6, %v1341_v44 }
 0xc0f   : > { %3834 = vmatpush3.bf16.xpose.msra.mxu1 %v1457_v45  ;;  %3835 = vmatprep.mubr.msk.bf16.mxu1 %vm4316_vm0, %v4315_v1 }
 0xc10   : > { %3845 = vmatprep.subr.bf16.mxu1 %v4315_v1 }
 0xc16   : > { %3836 = vmatmul.mubr.msk.bf16.vlgmr.msra.gmra.mrb[40].mxu1 %vm377_vm5, %v1450_v46 }
 0xc17   : > { %3847 = vmatprep.mubr.msk.bf16.mxu1 %vm4316_vm0, %v4315_v1  ;;  %3846 = vmatpush3.bf16.msra.mxu1 %v1581_v19 }
 0xc18   : > { %3857 = vmatprep.subr.bf16.mxu1 %v4315_v1 }
 0xc1c   : > { %1523 = vrot.lane.b32.xlu1 %v4469_v56, %s5091_s27  ;;  %s5109_s27 = smov 100  }
 0xc20   : > { %1626 = vrot.lane.b32.xlu1 %v4471_v57, %s5090_s19  ;;  %s5092_s19 = smov 68  }
 0xc35   : > { %v1259_v47 = vpop.f32.mrb[32].mxu1 }
 0xc36   : > { %v4676_v48 = vadd.f32 %v1259_v47, %v4633_v5  ;;  %v3813_v49 = vpop.f32.mrb[33].mxu1 }
 0xc37   : > { %v1262_v50 = vpop.f32.mrb[34].mxu1 }
 0xc38   : > { %v4679_v51 = vadd.f32 %v1262_v50, %v4636_v8  ;;  %v3814_v52 = vpop.f32.mrb[35].mxu1 }
 0xc98   : > { %v1337_v57 = vpop.xlane.xlu1 %1336 }
 0xc99   : > { %4159 = vrcp.f32 %v1337_v57 }
 0xc9a   : > { %v1340_v58 = vpop.xlane.xlu0 %1339 }
 0xc9b   : > { %4161 = vrcp.f32 %v1340_v58 }
 0xc9c   : > { %v1524_v4 = vpop.permute.xlu1 %1523 }
 0xc9d   : > { %v1529_v6 = vsel %vm455_vm8, %v1524_v4, 0 }
 0xca0   : > { %v1627_v30 = vpop.permute.xlu1 %1626 }
 0xca3   : > { %v4160_v60 = vpop.eup %4159 }
 0xca5   : > { %v4162_v62 = vpop.eup %4161 }
 0xce1   : > { %v1384_v59 = vpop.f32.mrb[36].mxu1 }
 0xce2   : > { %v3825_v61 = vpop.f32.mrb[37].mxu1  ;;  %v1393_v0 = vmul.f32 %v4160_v60, %v1384_v59 }
 0xce3   : > { %v1387_v63 = vpop.f32.mrb[38].mxu1 }
 0xce4   : > { %v1394_v2 = vmul.f32 %v4162_v62, %v1387_v63  ;;  %v3826_v3 = vpop.f32.mrb[39].mxu1 }
 0xce6   : > { %v1395_v5 = vpack.c.bf16 %v1394_v2, %v1393_v0 }
 0xce8   : > { %3830 = vmatmul.mubr.msk.bf16.vlgmr.msra.gmra.mrb[36].mxu0 %vm377_vm5, %v1395_v5 }
 0xce9   : > { %3840 = vmatpush3.bf16.msra.mxu0 %v1529_v6  ;;  %v1493_v7 = vpop.f32.mrb[40].mxu1  ;;  %3841 = vmatprep.mubr.msk.bf16.mxu0 %vm4316_vm0, %v4315_v1 }
 0xcea   : > { %1500 = vst.msk [vmem:[#allocation3] sm:$0xff] %vm425_vm6, %v1493_v7  ;;  %v3837_v8 = vpop.f32.mrb[41].mxu1  ;;  %3851 = vmatprep.subr.bf16.mxu0 %v4315_v1 }
 0xceb   : > { %v1496_v9 = vpop.f32.mrb[42].mxu1 }
 0xcec   : > { %1501 = vst.msk [vmem:[#allocation3 + $0x8] sm:$0x3] %vm427_vm7, %v1496_v9  ;;  %v3838_v10 = vpop.f32.mrb[43].mxu1 }
 0xcf1   : > { %v1502_v11 = vld [vmem:[#allocation3] sm:$0xff] }
 0xcf2   : > { %v1504_v12 = vsel %vm425_vm6, %v1502_v11, -inf }
 0xcf3   : > { %1505 = vmax.xlane.f32.xlu0 %v1504_v12  ;;  %v1503_v13 = vld [vmem:[#allocation3 + $0x8] sm:$0x3]  ;;  %v3551_v12 = vcombine.low %v307_v36, %v307_v36  ;;  %v4249_v36 = vld [vmem:[#allocation2] sm:$0xff] }
 0xcf4   : > { %v1507_v14 = vsel %vm427_vm7, %v1503_v13, -inf }
 0xcf7   : > { %1508 = vmax.xlane.f32.xlu0 %v1507_v14 }
 0xd0d   : > { %1628 = vrot.lane.b32.xlu0 %v4469_v56, %s5092_s19  ;;  %s5093_s19 = smov 36  }
 0xd80   : > { %v1506_v15 = vpop.xlane.xlu0 %1505 }
 0xd81   : > { %v1510_v17 = vsub.f32 %v1502_v11, %v1506_v15 }
 0xd83   : > { %v1512_v18 = vmul.f32 1.442695, %v1510_v17 }
 0xd84   : > { %v1509_v20 = vpop.xlane.xlu0 %1508 }
 0xd85   : > { %4163 = vpow2.f32 %v1512_v18  ;;  %v1511_v21 = vsub.f32 %v1503_v13, %v1509_v20  ;;  %v1757_v13 = vrot.slane %v3551_v12, 2 }
 0xd87   : > { %v1514_v22 = vmul.f32 1.442695, %v1511_v21  ;;  %v1762_v14 = vsel %vm641_vm9, %v1757_v13, 0 }
 0xd88   : > { %v1629_v26 = vpop.permute.xlu0 %1628 }
 0xd89   : > { %4165 = vpow2.f32 %v1514_v22  ;;  %v1634_v29 = vsel %vm377_vm5, %v1629_v26, 0 }
 0xd8f   : > { %v4164_v23 = vpop.eup %4163 }
 0xd90   : > { %v1516_v24 = vsel %vm425_vm6, %v4164_v23, 0.0 }
 0xd91   : > { %1517 = vadd.xlane.f32.xlu1 %v1516_v24 }
 0xd93   : > { %v4166_v25 = vpop.eup %4165 }
 0xd94   : > { %v1519_v27 = vsel %vm427_vm7, %v4166_v25, 0.0  ;;  %v1522_v28 = vpack.c.bf16 %v4166_v25, %v4164_v23 }
 0xd95   : > { %1520 = vadd.xlane.f32.xlu0 %v1519_v27 }
 0xd96   : > { %3842 = vmatmul.mubr.msk.bf16.vlgmr.msra.gmra.mrb[40].mxu0 %vm425_vm6, %v1522_v28  ;;  %v3553_v28 = vld [vmem:[%s5085_s2 + $0x5] ss:$0 sm:$0xff] }
 0xd97   : > { %3852 = vmatpush3.bf16.xpose.msra.mxu0 %v1634_v29  ;;  %3853 = vmatprep.mubr.msk.bf16.mxu0 %vm4316_vm0, %v4315_v1 }
 0xd98   : > { %3863 = vmatprep.subr.bf16.mxu0 %v4315_v1 }
 0xd9e   : > { %3854 = vmatmul.mubr.msk.bf16.vlgmr.msra.gmra.mrb[44].mxu0 %vm377_vm5, %v1627_v30 }
 0xd9f   : > { %3865 = vmatprep.mubr.msk.bf16.mxu0 %vm4316_vm0, %v4315_v1  ;;  %3864 = vmatpush3.bf16.msra.mxu0 %v1762_v14 }
 0xda0   : > { %3877 = vmatprep.subr.bf16.mxu0 %v4315_v1 }
 0xdbb   : > { %v1440_v31 = vpop.f32.mrb[36].mxu0 }
 0xdbc   : > { %v1447_v32 = vadd.f32 %v1440_v31, %v4676_v48  ;;  %v3831_v33 = vpop.f32.mrb[37].mxu0 }
 0xdbd   : > { %v1443_v16 = vpop.f32.mrb[38].mxu0 }
 0xdbe   : > { %v1448_v34 = vadd.f32 %v1443_v16, %v4679_v51  ;;  %v3832_v35 = vpop.f32.mrb[39].mxu0 }
 0xe1e   : > { %v1518_v37 = vpop.xlane.xlu1 %1517 }
 0xe1f   : > { %4167 = vrcp.f32 %v1518_v37  ;;  %v4250_v37 = vld [vmem:[#allocation2 + $0x8] sm:$0x3] }
 0xe22   : > { %v1521_v38 = vpop.xlane.xlu0 %1520 }
 0xe23   : > { %4169 = vrcp.f32 %v1521_v38 }
 0xe29   : > { %v4168_v40 = vpop.eup %4167 }
 0xe2d   : > { %v4170_v42 = vpop.eup %4169 }
 0xe69   : > { %v1565_v39 = vpop.f32.mrb[40].mxu0 }
 0xe6a   : > { %v3843_v41 = vpop.f32.mrb[41].mxu0  ;;  %v1574_v44 = vmul.f32 %v4168_v40, %v1565_v39 }
 0xe6b   : > { %v1568_v43 = vpop.f32.mrb[42].mxu0 }
 0xe6c   : > { %v1575_v45 = vmul.f32 %v4170_v42, %v1568_v43  ;;  %v3844_v46 = vpop.f32.mrb[43].mxu0 }
 0xe6e   : > { %v1576_v47 = vpack.c.bf16 %v1575_v45, %v1574_v44 }
 0xe70   : > { %3848 = vmatmul.mubr.msk.bf16.vlgmr.msra.gmra.mrb[44].mxu1 %vm377_vm5, %v1576_v47 }
 0xe71   : > { %v1670_v48 = vpop.f32.mrb[44].mxu0  ;;  %3859 = vmatprep.mubr.msk.bf16.mxu1 %vm4316_vm0, %v4315_v1 }
 0xe72   : > { %1677 = vst.msk [vmem:[#allocation3] sm:$0xff] %vm425_vm6, %v1670_v48  ;;  %v3855_v49 = vpop.f32.mrb[45].mxu0 }
 0xe73   : > { %v1673_v50 = vpop.f32.mrb[46].mxu0 }
 0xe74   : > { %1678 = vst.msk [vmem:[#allocation3 + $0x8] sm:$0x3] %vm427_vm7, %v1673_v50  ;;  %v3856_v51 = vpop.f32.mrb[47].mxu0 }
 0xe75   : > { %v4103_v51 = vld [vmem:[%s5084_s1 + $0x40] sm:$0xff]  }
 0xe79   : > { %v1679_v52 = vld [vmem:[#allocation3] sm:$0xff] }
 0xe7a   : > { %v1681_v53 = vsel %vm425_vm6, %v1679_v52, -inf }
 0xe7b   : > { %1682 = vmax.xlane.f32.xlu0 %v1681_v53  ;;  %v1680_v54 = vld [vmem:[#allocation3 + $0x8] sm:$0x3] }
 0xe7c   : > { %v1684_v55 = vsel %vm427_vm7, %v1680_v54, -inf }
 0xe7d   : > { %1685 = vmax.xlane.f32.xlu1 %v1684_v55 }
 0xe91   : > { %1700 = vrot.lane.b32.xlu0 %v4469_v56, %s5093_s19  ;;  %s5108_s19 = smov 40  }
 0xf08   : > { %v1683_v57 = vpop.xlane.xlu0 %1682 }
 0xf09   : > { %v1687_v58 = vsub.f32 %v1679_v52, %v1683_v57  ;;  %v4104_v52 = vld [vmem:[%s5084_s1 + $0x48] sm:$0xff]  }
 0xf0a   : > { %v1686_v59 = vpop.xlane.xlu1 %1685 }
 0xf0b   : > { %v1689_v60 = vmul.f32 1.442695, %v1687_v58  ;;  %v1688_v61 = vsub.f32 %v1680_v54, %v1686_v59 }
 0xf0c   : > { %v1701_v62 = vpop.permute.xlu0 %1700 }
 0xf0d   : > { %4171 = vpow2.f32 %v1689_v60  ;;  %v1691_v63 = vmul.f32 1.442695, %v1688_v61  ;;  %v1706_v0 = vsel %vm455_vm8, %v1701_v62, 0  ;;  %v3554_v62 = vld [vmem:[%s5085_s2 + $0x6] ss:$0 sm:$0xff] }
 0xf0e   : > { %3858 = vmatpush3.bf16.msra.mxu1 %v1706_v0 }
 0xf0f   : > { %4173 = vpow2.f32 %v1691_v63  ;;  %3869 = vmatprep.subr.bf16.mxu1 %v4315_v1 }
 0xf17   : > { %v4172_v2 = vpop.eup %4171 }
 0xf18   : > { %v1693_v3 = vsel %vm425_vm6, %v4172_v2, 0.0 }
 0xf19   : > { %v4174_v4 = vpop.eup %4173  ;;  %1694 = vadd.xlane.f32.xlu1 %v1693_v3  ;;  %v3555_v3 = vld [vmem:[%s5085_s2 + $0x7] ss:$0 sm:$0xff] }
 0xf1a   : > { %v1699_v56 = vpack.c.bf16 %v4174_v4, %v4172_v2  ;;  %v1696_v5 = vsel %vm427_vm7, %v4174_v4, 0.0 }
 0xf1c   : > { %3860 = vmatmul.mubr.msk.bf16.vlgmr.msra.gmra.mrb[48].mxu1 %vm425_vm6, %v1699_v56 }
 0xf1d   : > { %1697 = vadd.xlane.f32.xlu1 %v1696_v5  ;;  %3873 = vmatprep.mubr.msk.bf16.mxu1 %vm4316_vm0, %v4315_v1 }
 0xf1e   : > { %3870 = vmatpush3.bf16.msra.mxu1 %v4103_v51 }
 0xf1f   : > { %3871 = vmatprep.subr.bf16.mxu1 %v4315_v1 }
 0xf22   : > { %3872 = vmatpush3.bf16.msra.mxu1 %v4104_v52 }
 0xf23   : > { %3883 = vmatprep.subr.bf16.mxu1 %v4315_v1 }
 0xf43   : > { %v1617_v6 = vpop.f32.mrb[44].mxu1 }
 0xf44   : > { %v1624_v7 = vadd.f32 %v1617_v6, %v1447_v32  ;;  %v3849_v8 = vpop.f32.mrb[45].mxu1 }
 0xf45   : > { %v1620_v9 = vpop.f32.mrb[46].mxu1 }
 0xf46   : > { %v1625_v10 = vadd.f32 %v1620_v9, %v1448_v34  ;;  %v3850_v11 = vpop.f32.mrb[47].mxu1 }
 0xfa6   : > { %v1695_v15 = vpop.xlane.xlu1 %1694 }
 0xfa7   : > { %4175 = vrcp.f32 %v1695_v15 }
 0xfaa   : > { %v1698_v17 = vpop.xlane.xlu1 %1697 }
 0xfab   : > { %4177 = vrcp.f32 %v1698_v17 }
 0xfb1   : > { %v4176_v20 = vpop.eup %4175 }
 0xfb5   : > { %v4178_v22 = vpop.eup %4177 }
 0xfef   : > { %v1742_v18 = vpop.f32.mrb[48].mxu1 }
 0xff0   : > { %v3861_v21 = vpop.f32.mrb[49].mxu1  ;;  %v1751_v24 = vmul.f32 %v4176_v20, %v1742_v18 }
 0xff1   : > { %v1745_v23 = vpop.f32.mrb[50].mxu1 }
 0xff2   : > { %v1752_v25 = vmul.f32 %v4178_v22, %v1745_v23  ;;  %v3862_v26 = vpop.f32.mrb[51].mxu1 }
 0xff4   : > { %v1753_v27 = vpack.c.bf16 %v1752_v25, %v1751_v24 }
 0xff6   : > { %3866 = vmatmul.mubr.msk.bf16.vlgmr.msra.gmra.mrb[48].mxu0 %vm377_vm5, %v1753_v27 }
 0xff7   : > { %3879 = vmatprep.mubr.msk.bf16.mxu0 %vm4316_vm0, %v4315_v1 }
0x10c9   : > { %v1798_v29 = vpop.f32.mrb[48].mxu0 }
0x10ca   : > { %v1805_v30 = vadd.f32 %v1798_v29, %v1624_v7  ;;  %v3867_v31 = vpop.f32.mrb[49].mxu0  ;;  %v3556_v7 = vld [vmem:[%s5085_s2 + $0x8] ss:$0 sm:$0xff] }
0x10cb   : > { %v1801_v32 = vpop.f32.mrb[50].mxu0 }
0x10cc   : > { %v1811_v33 = vadd.f32 %v3553_v28, %v1805_v30  ;;  %v1806_v16 = vadd.f32 %v1801_v32, %v1625_v10  ;;  %v3868_v34 = vpop.f32.mrb[51].mxu0 }
0x10ce   : > { %v1812_v35 = vadd.f32 %v3553_v28, %v1806_v16  ;;  %v1813_v19 = vadd.f32 %v4249_v36, %v1811_v33 }
0x10d0   : > { %v4737_v38 = vadd.f32 %v4250_v37, %v1812_v35  ;;  %v1817_v39 = vsel %vm249_vm3, %v1813_v19, 0.0 }
0x10d1   : > { %1818 = vadd.xlane.f32.xlu1 %v1817_v39 }
0x10d2   : > { %v1820_v40 = vsel %vm262_vm4, %v4737_v38, 0.0 }
0x10d5   : > { %1821 = vadd.xlane.f32.xlu1 %v1820_v40 }
0x115e   : > { %v1819_v41 = vpop.xlane.xlu1 %1818 }
0x115f   : > { %v1823_v42 = vmul.f32 0.03125, %v1819_v41 }
0x1161   : > { %v1825_v43 = vsub.f32 %v1813_v19, %v1823_v42 }
0x1162   : > { %v1822_v44 = vpop.xlane.xlu1 %1821 }
0x1163   : > { %v1824_v45 = vmul.f32 0.03125, %v1822_v44  ;;  %v1827_v46 = vmul.f32 %v1825_v43, %v1825_v43 }
0x1165   : > { %v1826_v47 = vsub.f32 %v4737_v38, %v1824_v45  ;;  %v1829_v48 = vsel %vm249_vm3, %v1827_v46, 0.0 }
0x1166   : > { %1830 = vadd.xlane.f32.xlu1 %v1829_v48 }
0x1167   : > { %v1828_v49 = vmul.f32 %v1826_v47, %v1826_v47 }
0x1169   : > { %v1832_v50 = vsel %vm262_vm4, %v1828_v49, 0.0 }
0x116a   : > { %1833 = vadd.xlane.f32.xlu1 %v1832_v50 }
0x11f3   : > { %v1831_v53 = vpop.xlane.xlu1 %1830 }
0x11f4   : > { %v1835_v54 = vmul.f32 0.03125, %v1831_v53 }
0x11f6   : > { %v1837_v55 = vadd.f32 1e-05, %v1835_v54 }
0x11f7   : > { %v1834_v57 = vpop.xlane.xlu1 %1833 }
0x11f8   : > { %4179 = vrsqrt.f32 %v1837_v55  ;;  %v1836_v58 = vmul.f32 0.03125, %v1834_v57 }
0x11fa   : > { %v1838_v59 = vadd.f32 1e-05, %v1836_v58 }
0x11fc   : > { %4181 = vrsqrt.f32 %v1838_v59 }
0x1202   : > { %v4180_v60 = vpop.eup %4179 }
0x1203   : > { %v1841_v61 = vmul.f32 %v4180_v60, %v1825_v43 }
0x1205   : > { %v1847_v0 = vmul.f32 %v3554_v62, %v1841_v61 }
0x1206   : > { %v4182_v63 = vpop.eup %4181 }
0x1207   : > { %v1842_v2 = vmul.f32 %v4182_v63, %v1826_v47  ;;  %v1853_v56 = vadd.f32 %v3555_v3, %v1847_v0 }
0x1209   : > { %v1848_v4 = vmul.f32 %v3554_v62, %v1842_v2 }
0x120b   : > { %v1854_v5 = vadd.f32 %v3555_v3, %v1848_v4  ;;  %v1860_v4 = vld [vmem:[%s5084_s1 + $0x50] sm:$0xf] }
0x120d   : > { %v1865_v6 = vpack.c.bf16 %v1854_v5, %v1853_v56  ;;  %v3564_v56 = vcombine.low %v1860_v4, %v1860_v4  ;;  %v2240_v5 = vsel %vm641_vm9, %v1860_v4, 0 }
0x120f   : > { %3874 = vmatmul.mubr.msk.bf16.vlgmr.msra.gmra.mrb[52].mxu1 %vm249_vm3, %v1865_v6  ;;  %v2189_v6 = vrot.slane %v3564_v56, 2 }
0x1210   : > { %3885 = vmatprep.mubr.msk.bf16.mxu1 %vm4316_vm0, %v4315_v1 }
0x12e2   : > { %v1919_v8 = vpop.f32.mrb[52].mxu1 }
0x12e3   : > { %v1920_v9 = vadd.f32 %v3556_v7, %v1919_v8  ;;  %v3875_v10 = vpop.f32.mrb[53].mxu1 }
0x12e4   : > { %v1922_v11 = vpop.f32.mrb[54].mxu1 }
0x12e5   : > { %v1923_v12 = vadd.f32 %v3556_v7, %v1922_v11  ;;  %v3876_v13 = vpop.f32.mrb[55].mxu1  ;;  %v1926_v14 = vmul.f32 0.5, %v1920_v9  ;;  %v2194_v7 = vsel %vm641_vm9, %v2189_v6, 0  ;;  %v4865_v6 = vld [vmem:[%s5084_s1 + $0x54] sm:$0xf] }
0x12e7   : > { %v1927_v15 = vmul.f32 0.5, %v1923_v12  ;;  %v4765_v17 = vpack.c.bf16 %v1923_v12, %v1920_v9 }
0x12e9   : > { %v4767_v18 = vpack.c.bf16 %v1927_v15, %v1926_v14  ;;  %2060 = vrot.lane.b32.xlu1 %v4765_v17, %s4317_s6  ;;  %1931 = vrot.lane.b32.xlu0 %v4765_v17, %s4318_s7 }
0x12ed   : > { %2058 = vrot.lane.b32.xlu0 %v4767_v18, %s4319_s8 }
0x135b   : > { %v1932_v20 = vpop.permute.xlu0 %1931  ;;  %v2061_v22 = vpop.permute.xlu1 %2060 }
0x135c   : > { %v1937_v21 = vsel %vm377_vm5, %v1932_v20, 0  ;;  %v2066_v23 = vsel %vm377_vm5, %v2061_v22, 0 }
0x135d   : > { %3878 = vmatpush3.bf16.xpose.msra.mxu0 %v1937_v21 }
0x135e   : > { %3889 = vmatprep.subr.bf16.mxu0 %v4315_v1 }
0x135f   : > { %v2059_v24 = vpop.permute.xlu0 %2058 }
0x1364   : > { %3880 = vmatmul.mubr.msk.bf16.vlgmr.msra.gmra.mrb[52].mxu0 %vm377_vm5, %v4767_v18 }
0x1365   : > { %3890 = vmatpush3.bf16.xpose.msra.mxu0 %v2066_v23  ;;  %3891 = vmatprep.mubr.msk.bf16.mxu0 %vm4316_vm0, %v4315_v1 }
0x1366   : > { %3901 = vmatprep.subr.bf16.mxu0 %v4315_v1 }
0x136c   : > { %3892 = vmatmul.mubr.msk.bf16.vlgmr.msra.gmra.mrb[56].mxu0 %vm377_vm5, %v2059_v24 }
0x136d   : > { %3903 = vmatprep.mubr.msk.bf16.mxu0 %vm4316_vm0, %v4315_v1  ;;  %3902 = vmatpush3.bf16.msra.mxu0 %v2194_v7  ;;  %v2414_v7 = vsel %vm641_vm9, %v4865_v6, 0 }
0x136e   : > { %3913 = vmatprep.subr.bf16.mxu0 %v4315_v1 }
0x1437   : > { %v1973_v25 = vpop.f32.mrb[52].mxu0 }
0x1438   : > { %1980 = vst.msk [vmem:[#allocation3] sm:$0xff] %vm425_vm6, %v1973_v25  ;;  %v3881_v26 = vpop.f32.mrb[53].mxu0 }
0x1439   : > { %v1976_v27 = vpop.f32.mrb[54].mxu0 }
0x143a   : > { %1981 = vst.msk [vmem:[#allocation3 + $0x8] sm:$0x3] %vm427_vm7, %v1976_v27  ;;  %v3882_v28 = vpop.f32.mrb[55].mxu0 }
0x143f   : > { %v2102_v29 = vpop.f32.mrb[56].mxu0  ;;  %v1982_v30 = vld [vmem:[#allocation3] sm:$0xff] }
0x1440   : > { %v3893_v31 = vpop.f32.mrb[57].mxu0  ;;  %v1984_v32 = vsel %vm425_vm6, %v1982_v30, -inf  ;;  %2109 = vst.msk [vmem:[#allocation3] sm:$0xff] %vm425_vm6, %v2102_v29 }
0x1441   : > { %1985 = vmax.xlane.f32.xlu0 %v1984_v32  ;;  %v2105_v33 = vpop.f32.mrb[58].mxu0  ;;  %v1983_v16 = vld [vmem:[#allocation3 + $0x8] sm:$0x3] }
0x1442   : > { %v3894_v34 = vpop.f32.mrb[59].mxu0  ;;  %v1987_v35 = vsel %vm427_vm7, %v1983_v16, -inf  ;;  %2110 = vst.msk [vmem:[#allocation3 + $0x8] sm:$0x3] %vm427_vm7, %v2105_v33 }
0x1443   : > { %1988 = vmax.xlane.f32.xlu1 %v1987_v35 }
0x1447   : > { %v2111_v36 = vld [vmem:[#allocation3] sm:$0xff] }
0x1448   : > { %v2113_v19 = vsel %vm425_vm6, %v2111_v36, -inf }
0x1449   : > { %2114 = vmax.xlane.f32.xlu0 %v2113_v19  ;;  %v2112_v37 = vld [vmem:[#allocation3 + $0x8] sm:$0x3] }
0x144a   : > { %v2116_v39 = vsel %vm427_vm7, %v2112_v37, -inf }
0x144d   : > { %2117 = vmax.xlane.f32.xlu0 %v2116_v39 }
0x1454   : > { %2132 = vrot.lane.b32.xlu1 %v4765_v17, %s4321_s10  ;;  %s5100_s10 = smov 80  }
0x1463   : > { %2003 = vrot.lane.b32.xlu0 %v4765_v17, %s4320_s9  ;;  %s4340_s9 = smov [#allocation4]  }
0x14ce   : > { %v1986_v40 = vpop.xlane.xlu0 %1985 }
0x14cf   : > { %v1990_v41 = vsub.f32 %v1982_v30, %v1986_v40 }
0x14d0   : > { %v1989_v42 = vpop.xlane.xlu1 %1988 }
0x14d1   : > { %v1992_v43 = vmul.f32 1.442695, %v1990_v41  ;;  %v1991_v44 = vsub.f32 %v1983_v16, %v1989_v42 }
0x14d3   : > { %v1994_v45 = vmul.f32 1.442695, %v1991_v44  ;;  %4183 = vpow2.f32 %v1992_v43 }
0x14d4   : > { %v2133_v57 = vpop.permute.xlu1 %2132 }
0x14d5   : > { %4185 = vpow2.f32 %v1994_v45  ;;  %v2138_v59 = vsel %vm455_vm8, %v2133_v57, 0 }
0x14d6   : > { %v2115_v46 = vpop.xlane.xlu0 %2114 }
0x14d7   : > { %v2119_v47 = vsub.f32 %v2111_v36, %v2115_v46 }
0x14d9   : > { %v2121_v48 = vmul.f32 1.442695, %v2119_v47 }
0x14da   : > { %v2118_v49 = vpop.xlane.xlu0 %2117 }
0x14db   : > { %4187 = vpow2.f32 %v2121_v48  ;;  %v2120_v50 = vsub.f32 %v2112_v37, %v2118_v49 }
0x14dd   : > { %v2123_v51 = vmul.f32 1.442695, %v2120_v50  ;;  %v4184_v52 = vpop.eup %4183 }
0x14de   : > { %v2004_v53 = vpop.permute.xlu0 %2003  ;;  %v1996_v2 = vsel %vm425_vm6, %v4184_v52, 0.0 }
0x14df   : > { %v4186_v54 = vpop.eup %4185  ;;  %4189 = vpow2.f32 %v2123_v51  ;;  %v2009_v55 = vsel %vm455_vm8, %v2004_v53, 0 }
0x14e0   : > { %3884 = vmatpush3.bf16.msra.mxu1 %v2009_v55  ;;  %v2002_v58 = vpack.c.bf16 %v4186_v54, %v4184_v52  ;;  %v1999_v3 = vsel %vm427_vm7, %v4186_v54, 0.0 }
0x14e1   : > { %3895 = vmatprep.subr.bf16.mxu1 %v4315_v1 }
0x14e3   : > { %3886 = vmatmul.mubr.msk.bf16.vlgmr.msra.gmra.mrb[56].mxu1 %vm425_vm6, %v2002_v58 }
0x14e4   : > { %3896 = vmatpush3.bf16.msra.mxu1 %v2138_v59  ;;  %3897 = vmatprep.mubr.msk.bf16.mxu1 %vm4316_vm0, %v4315_v1 }
0x14e5   : > { %v4188_v60 = vpop.eup %4187  ;;  %3907 = vmatprep.subr.bf16.mxu1 %v4315_v1 }
0x14e6   : > { %v2125_v61 = vsel %vm425_vm6, %v4188_v60, 0.0 }
0x14e7   : > { %2126 = vadd.xlane.f32.xlu0 %v2125_v61 }
0x14e9   : > { %v4190_v62 = vpop.eup %4189 }
0x14ea   : > { %v2128_v63 = vsel %vm427_vm7, %v4190_v62, 0.0  ;;  %v2131_v0 = vpack.c.bf16 %v4190_v62, %v4188_v60 }
0x14eb   : > { %2129 = vadd.xlane.f32.xlu1 %v2128_v63 }
0x14ec   : > { %3898 = vmatmul.mubr.msk.bf16.vlgmr.msra.gmra.mrb[60].mxu1 %vm425_vm6, %v2131_v0 }
0x14ed   : > { %3909 = vmatprep.mubr.msk.bf16.mxu1 %vm4316_vm0, %v4315_v1  ;;  %3908 = vmatpush3.bf16.msra.mxu1 %v2240_v5 }
0x14ee   : > { %3919 = vmatprep.subr.bf16.mxu1 %v4315_v1 }
0x14fc   : > { %2282 = vrot.lane.b32.xlu1 %v4767_v18, %s4323_s17  ;;  %s5102_s17 = smov 48  }
0x14fd   : > { %2284 = vrot.lane.b32.xlu0 %v4765_v17, %s4322_s11  ;;  %s5101_s11 = smov 76  }
0x151c   : > { %1997 = vadd.xlane.f32.xlu0 %v1996_v2 }
0x1520   : > { %2000 = vadd.xlane.f32.xlu1 %v1999_v3 }
0x1531   : > { %2459 = vrot.lane.b32.xlu1 %v4765_v17, %s4326_s26  ;;  %s5105_s26 = smov 104  }
0x1535   : > { %2457 = vrot.lane.b32.xlu1 %v4767_v18, %s4325_s25  ;;  %s5104_s25 = smov 44  }
0x1574   : > { %v2127_v8 = vpop.xlane.xlu0 %2126 }
0x1578   : > { %v2130_v9 = vpop.xlane.xlu1 %2129  ;;  %v2285_v10 = vpop.permute.xlu0 %2284 }
0x1579   : > { %v2290_v35 = vsel %vm377_vm5, %v2285_v10, 0 }
0x157c   : > { %v2283_v11 = vpop.permute.xlu1 %2282 }
0x15a9   : > { %v1998_v12 = vpop.xlane.xlu0 %1997 }
0x15aa   : > { %4191 = vrcp.f32 %v1998_v12 }
0x15ad   : > { %v2001_v13 = vpop.xlane.xlu1 %2000 }
0x15ae   : > { %4193 = vrcp.f32 %v2001_v13 }
0x15af   : > { %4195 = vrcp.f32 %v2127_v8 }
0x15b0   : > { %4197 = vrcp.f32 %v2130_v9 }
0x15b1   : > { %v2460_v2 = vpop.permute.xlu1 %2459 }
0x15b2   : > { %v2465_v56 = vsel %vm377_vm5, %v2460_v2, 0 }
0x15b4   : > { %v4192_v15 = vpop.eup %4191 }
0x15b5   : > { %v2458_v5 = vpop.permute.xlu1 %2457 }
0x15b6   : > { %v2045_v14 = vpop.f32.mrb[56].mxu1 }
0x15b7   : > { %v3887_v20 = vpop.f32.mrb[57].mxu1  ;;  %v2054_v23 = vmul.f32 %v4192_v15, %v2045_v14 }
0x15b8   : > { %v4194_v21 = vpop.eup %4193  ;;  %v2048_v22 = vpop.f32.mrb[58].mxu1 }
0x15b9   : > { %v2055_v24 = vmul.f32 %v4194_v21, %v2048_v22  ;;  %v3888_v25 = vpop.f32.mrb[59].mxu1  ;;  %v4196_v28 = vpop.eup %4195 }
0x15ba   : > { %v4198_v30 = vpop.eup %4197 }
0x15bb   : > { %v2056_v26 = vpack.c.bf16 %v2055_v24, %v2054_v23 }
0x15bd   : > { %3910 = vmatmul.mubr.msk.bf16.vlgmr.msra.gmra.mrb[64].mxu1 %vm377_vm5, %v2056_v26 }
0x15be   : > { %3921 = vmatprep.mubr.msk.bf16.mxu1 %vm4316_vm0, %v4315_v1 }
0x15bf   : > { %v2174_v27 = vpop.f32.mrb[60].mxu1 }
0x15c0   : > { %v3899_v29 = vpop.f32.mrb[61].mxu1  ;;  %v2183_v32 = vmul.f32 %v4196_v28, %v2174_v27 }
0x15c1   : > { %v2177_v31 = vpop.f32.mrb[62].mxu1 }
0x15c2   : > { %v2184_v33 = vmul.f32 %v4198_v30, %v2177_v31  ;;  %v3900_v16 = vpop.f32.mrb[63].mxu1 }
0x15c4   : > { %v2185_v34 = vpack.c.bf16 %v2184_v33, %v2183_v32 }
0x15c6   : > { %3904 = vmatmul.mubr.msk.bf16.vlgmr.msra.gmra.mrb[60].mxu0 %vm377_vm5, %v2185_v34 }
0x15c7   : > { %3914 = vmatpush3.bf16.xpose.msra.mxu0 %v2290_v35  ;;  %3915 = vmatprep.mubr.msk.bf16.mxu0 %vm4316_vm0, %v4315_v1 }
0x15c8   : > { %3925 = vmatprep.subr.bf16.mxu0 %v4315_v1 }
0x15ce   : > { %3916 = vmatmul.mubr.msk.bf16.vlgmr.msra.gmra.mrb[64].mxu0 %vm377_vm5, %v2283_v11 }
0x15cf   : > { %3927 = vmatprep.mubr.msk.bf16.mxu0 %vm4316_vm0, %v4315_v1  ;;  %3926 = vmatpush3.bf16.msra.mxu0 %v2414_v7 }
0x15d0   : > { %3937 = vmatprep.subr.bf16.mxu0 %v4315_v1 }
0x1690   : > { %v2276_v36 = vpop.f32.mrb[64].mxu1 }
0x1691   : > { %v3911_v19 = vpop.f32.mrb[65].mxu1 }
0x1692   : > { %v2278_v37 = vpop.f32.mrb[66].mxu1 }
0x1693   : > { %v3912_v39 = vpop.f32.mrb[67].mxu1 }
0x1699   : > { %v2230_v40 = vpop.f32.mrb[60].mxu0 }
0x169a   : > { %v3905_v41 = vpop.f32.mrb[61].mxu0 }
0x169b   : > { %v2232_v42 = vpop.f32.mrb[62].mxu0 }
0x169c   : > { %v4838_v43 = vadd.f32 %v2278_v37, %v2232_v42  ;;  %v3906_v44 = vpop.f32.mrb[63].mxu0 }
0x16a1   : > { %v2326_v45 = vpop.f32.mrb[64].mxu0 }
0x16a2   : > { %2333 = vst.msk [vmem:[#allocation3] sm:$0xff] %vm425_vm6, %v2326_v45  ;;  %v3917_v46 = vpop.f32.mrb[65].mxu0 }
0x16a3   : > { %v2329_v47 = vpop.f32.mrb[66].mxu0 }
0x16a4   : > { %2334 = vst.msk [vmem:[#allocation3 + $0x8] sm:$0x3] %vm427_vm7, %v2329_v47  ;;  %v3918_v48 = vpop.f32.mrb[67].mxu0 }
0x16a9   : > { %v2335_v49 = vld [vmem:[#allocation3] sm:$0xff] }
0x16aa   : > { %v2337_v50 = vsel %vm425_vm6, %v2335_v49, -inf }
0x16ab   : > { %2338 = vmax.xlane.f32.xlu0 %v2337_v50  ;;  %v2336_v51 = vld [vmem:[#allocation3 + $0x8] sm:$0x3] }
0x16ac   : > { %v2340_v52 = vsel %vm427_vm7, %v2336_v51, -inf }
0x16af   : > { %2341 = vmax.xlane.f32.xlu0 %v2340_v52  ;;  %v3572_v52 = vcombine.low %v4865_v6, %v4865_v6 }
0x16c5   : > { %2356 = vrot.lane.b32.xlu0 %v4765_v17, %s4324_s24  ;;  %s5103_s24 = smov 108  }
0x1738   : > { %v2339_v53 = vpop.xlane.xlu0 %2338 }
0x1739   : > { %v2343_v54 = vsub.f32 %v2335_v49, %v2339_v53  ;;  %v2588_v53 = vrot.slane %v3572_v52, 2 }
0x173b   : > { %v2345_v55 = vmul.f32 1.442695, %v2343_v54  ;;  %v2593_v54 = vsel %vm641_vm9, %v2588_v53, 0 }
0x173c   : > { %v2342_v57 = vpop.xlane.xlu0 %2341 }
0x173d   : > { %4199 = vpow2.f32 %v2345_v55  ;;  %v2344_v58 = vsub.f32 %v2336_v51, %v2342_v57 }
0x173f   : > { %v2347_v59 = vmul.f32 1.442695, %v2344_v58 }
0x1740   : > { %v2357_v60 = vpop.permute.xlu0 %2356 }
0x1741   : > { %4201 = vpow2.f32 %v2347_v59  ;;  %v2362_v61 = vsel %vm455_vm8, %v2357_v60, 0 }
0x1742   : > { %3920 = vmatpush3.bf16.msra.mxu1 %v2362_v61 }
0x1743   : > { %3931 = vmatprep.subr.bf16.mxu1 %v4315_v1 }
0x1747   : > { %v4200_v62 = vpop.eup %4199 }
0x1748   : > { %v2349_v63 = vsel %vm425_vm6, %v4200_v62, 0.0 }
0x1749   : > { %2350 = vadd.xlane.f32.xlu1 %v2349_v63 }
0x174b   : > { %v4202_v0 = vpop.eup %4201 }
0x174c   : > { %v2352_v3 = vsel %vm427_vm7, %v4202_v0, 0.0  ;;  %v2355_v4 = vpack.c.bf16 %v4202_v0, %v4200_v62 }
0x174d   : > { %2353 = vadd.xlane.f32.xlu0 %v2352_v3 }
0x174e   : > { %3922 = vmatmul.mubr.msk.bf16.vlgmr.msra.gmra.mrb[68].mxu1 %vm425_vm6, %v2355_v4 }
0x174f   : > { %3932 = vmatpush3.bf16.xpose.msra.mxu1 %v2465_v56  ;;  %3933 = vmatprep.mubr.msk.bf16.mxu1 %vm4316_vm0, %v4315_v1 }
0x1750   : > { %3943 = vmatprep.subr.bf16.mxu1 %v4315_v1 }
0x1756   : > { %3934 = vmatmul.mubr.msk.bf16.vlgmr.msra.gmra.mrb[72].mxu1 %vm377_vm5, %v2458_v5 }
0x1757   : > { %3945 = vmatprep.mubr.msk.bf16.mxu1 %vm4316_vm0, %v4315_v1  ;;  %3944 = vmatpush3.bf16.msra.mxu1 %v2593_v54 }
0x1758   : > { %3955 = vmatprep.subr.bf16.mxu1 %v4315_v1 }
0x175a   : > { %2531 = vrot.lane.b32.xlu1 %v4765_v17, %s4328_s30  ;;  %s159_s30 = sand.u32 1, %s4305_s13  }
0x175e   : > { %2636 = vrot.lane.b32.xlu1 %v4767_v18, %s4329_s4  ;;  %s5106_s4 = smov 72  }
0x17d6   : > { %v2351_v8 = vpop.xlane.xlu1 %2350 }
0x17d7   : > { %4203 = vrcp.f32 %v2351_v8 }
0x17da   : > { %v2354_v9 = vpop.xlane.xlu0 %2353  ;;  %v2532_v22 = vpop.permute.xlu1 %2531 }
0x17db   : > { %4205 = vrcp.f32 %v2354_v9  ;;  %v2537_v24 = vsel %vm455_vm8, %v2532_v22, 0 }
0x17de   : > { %v2637_v46 = vpop.permute.xlu1 %2636 }
0x17e1   : > { %v4204_v11 = vpop.eup %4203 }
0x17e5   : > { %v4206_v13 = vpop.eup %4205 }
0x1821   : > { %v2398_v10 = vpop.f32.mrb[68].mxu1 }
0x1822   : > { %v3923_v12 = vpop.f32.mrb[69].mxu1  ;;  %v2407_v15 = vmul.f32 %v4204_v11, %v2398_v10 }
0x1823   : > { %v2401_v14 = vpop.f32.mrb[70].mxu1 }
0x1824   : > { %v2408_v20 = vmul.f32 %v4206_v13, %v2401_v14  ;;  %v3924_v21 = vpop.f32.mrb[71].mxu1 }
0x1826   : > { %v2409_v23 = vpack.c.bf16 %v2408_v20, %v2407_v15 }
0x1828   : > { %3928 = vmatmul.mubr.msk.bf16.vlgmr.msra.gmra.mrb[68].mxu0 %vm377_vm5, %v2409_v23 }
0x1829   : > { %3938 = vmatpush3.bf16.msra.mxu0 %v2537_v24  ;;  %v2501_v25 = vpop.f32.mrb[72].mxu1  ;;  %3939 = vmatprep.mubr.msk.bf16.mxu0 %vm4316_vm0, %v4315_v1 }
0x182a   : > { %2508 = vst.msk [vmem:[#allocation3] sm:$0xff] %vm425_vm6, %v2501_v25  ;;  %v3935_v26 = vpop.f32.mrb[73].mxu1  ;;  %3949 = vmatprep.subr.bf16.mxu0 %v4315_v1 }
0x182b   : > { %v2504_v27 = vpop.f32.mrb[74].mxu1 }
0x182c   : > { %2509 = vst.msk [vmem:[#allocation3 + $0x8] sm:$0x3] %vm427_vm7, %v2504_v27  ;;  %v3936_v28 = vpop.f32.mrb[75].mxu1 }
0x1831   : > { %v2510_v29 = vld [vmem:[#allocation3] sm:$0xff] }
0x1832   : > { %v2512_v30 = vsel %vm425_vm6, %v2510_v29, -inf }
0x1833   : > { %2513 = vmax.xlane.f32.xlu0 %v2512_v30  ;;  %v2511_v31 = vld [vmem:[#allocation3 + $0x8] sm:$0x3] }
0x1834   : > { %v2515_v32 = vsel %vm427_vm7, %v2511_v31, -inf }
0x1837   : > { %2516 = vmax.xlane.f32.xlu0 %v2515_v32 }
0x184d   : > { %2638 = vrot.lane.b32.xlu0 %v4765_v17, %s5100_s10  ;;  %s4255_s10 = sshll.u32 %s4340_s9, 4  ;;  %s4256_s10 = int_to_ptr.vmem [resolvable:$false] %s4255_s10 }
0x18c0   : > { %v2514_v33 = vpop.xlane.xlu0 %2513 }
0x18c1   : > { %v2518_v16 = vsub.f32 %v2510_v29, %v2514_v33 }
0x18c3   : > { %v2520_v34 = vmul.f32 1.442695, %v2518_v16 }
0x18c4   : > { %v2517_v35 = vpop.xlane.xlu0 %2516 }
0x18c5   : > { %4207 = vpow2.f32 %v2520_v34  ;;  %v2519_v36 = vsub.f32 %v2511_v31, %v2517_v35  ;;  %v4933_v34 = vld [vmem:[%s5084_s1 + $0x58] sm:$0xf] }
0x18c6   : > { %v2768_v35 = vsel %vm641_vm9, %v4933_v34, 0 }
0x18c7   : > { %v2522_v19 = vmul.f32 1.442695, %v2519_v36 }
0x18c8   : > { %v2639_v41 = vpop.permute.xlu0 %2638 }
0x18c9   : > { %4209 = vpow2.f32 %v2522_v19  ;;  %v2644_v45 = vsel %vm377_vm5, %v2639_v41, 0 }
0x18cf   : > { %v4208_v37 = vpop.eup %4207 }
0x18d0   : > { %v2524_v39 = vsel %vm425_vm6, %v4208_v37, 0.0 }
0x18d1   : > { %2525 = vadd.xlane.f32.xlu1 %v2524_v39 }
0x18d3   : > { %v4210_v40 = vpop.eup %4209 }
0x18d4   : > { %v2527_v42 = vsel %vm427_vm7, %v4210_v40, 0.0  ;;  %v2530_v44 = vpack.c.bf16 %v4210_v40, %v4208_v37 }
0x18d5   : > { %2528 = vadd.xlane.f32.xlu0 %v2527_v42 }
0x18d6   : > { %3940 = vmatmul.mubr.msk.bf16.vlgmr.msra.gmra.mrb[72].mxu0 %vm425_vm6, %v2530_v44 }
0x18d7   : > { %3950 = vmatpush3.bf16.xpose.msra.mxu0 %v2644_v45  ;;  %3951 = vmatprep.mubr.msk.bf16.mxu0 %vm4316_vm0, %v4315_v1 }
0x18d8   : > { %3961 = vmatprep.subr.bf16.mxu0 %v4315_v1 }
0x18de   : > { %3952 = vmatmul.mubr.msk.bf16.vlgmr.msra.gmra.mrb[76].mxu0 %vm377_vm5, %v2637_v46 }
0x18df   : > { %3963 = vmatprep.mubr.msk.bf16.mxu0 %vm4316_vm0, %v4315_v1  ;;  %3962 = vmatpush3.bf16.msra.mxu0 %v2768_v35 }
0x18e0   : > { %3973 = vmatprep.subr.bf16.mxu0 %v4315_v1 }
0x18fb   : > { %v2450_v47 = vpop.f32.mrb[68].mxu0 }
0x18fc   : > { %v3929_v48 = vpop.f32.mrb[69].mxu0 }
0x18fd   : > { %v2452_v49 = vpop.f32.mrb[70].mxu0 }
0x18fe   : > { %v4892_v50 = vadd.f32 %v2452_v49, %v4838_v43  ;;  %v3930_v51 = vpop.f32.mrb[71].mxu0 }
0x195e   : > { %v2526_v55 = vpop.xlane.xlu1 %2525 }
0x195f   : > { %4211 = vrcp.f32 %v2526_v55 }
0x1962   : > { %v2529_v57 = vpop.xlane.xlu0 %2528 }
0x1963   : > { %4213 = vrcp.f32 %v2529_v57 }
0x1969   : > { %v4212_v59 = vpop.eup %4211 }
0x196d   : > { %v4214_v61 = vpop.eup %4213 }
0x19a9   : > { %v2573_v58 = vpop.f32.mrb[72].mxu0 }
0x19aa   : > { %v3941_v60 = vpop.f32.mrb[73].mxu0  ;;  %v2582_v62 = vmul.f32 %v4212_v59, %v2573_v58 }
0x19ab   : > { %v2576_v43 = vpop.f32.mrb[74].mxu0 }
0x19ac   : > { %v2583_v63 = vmul.f32 %v4214_v61, %v2576_v43  ;;  %v3942_v0 = vpop.f32.mrb[75].mxu0 }
0x19ae   : > { %v2584_v2 = vpack.c.bf16 %v2583_v63, %v2582_v62 }
0x19b0   : > { %3946 = vmatmul.mubr.msk.bf16.vlgmr.msra.gmra.mrb[76].mxu1 %vm377_vm5, %v2584_v2 }
0x19b1   : > { %v2680_v3 = vpop.f32.mrb[76].mxu0  ;;  %3957 = vmatprep.mubr.msk.bf16.mxu1 %vm4316_vm0, %v4315_v1 }
0x19b2   : > { %2687 = vst.msk [vmem:[#allocation3] sm:$0xff] %vm425_vm6, %v2680_v3  ;;  %v3953_v4 = vpop.f32.mrb[77].mxu0 }
0x19b3   : > { %v2683_v56 = vpop.f32.mrb[78].mxu0 }
0x19b4   : > { %2688 = vst.msk [vmem:[#allocation3 + $0x8] sm:$0x3] %vm427_vm7, %v2683_v56  ;;  %v3954_v5 = vpop.f32.mrb[79].mxu0 }
0x19b9   : > { %v2689_v6 = vld [vmem:[#allocation3] sm:$0xff] }
0x19ba   : > { %v2691_v7 = vsel %vm425_vm6, %v2689_v6, -inf }
0x19bb   : > { %2692 = vmax.xlane.f32.xlu0 %v2691_v7  ;;  %v2690_v8 = vld [vmem:[#allocation3 + $0x8] sm:$0x3] }
0x19bc   : > { %v2694_v9 = vsel %vm427_vm7, %v2690_v8, -inf }
0x19bd   : > { %2695 = vmax.xlane.f32.xlu1 %v2694_v9 }
0x19ce   : > { %2813 = vrot.lane.b32.xlu1 %v4765_v17, %s5101_s11  ;;  %s4257_s11 = scalar_lea.vmem %s4256_s10, 32 }
0x19d1   : > { %2710 = vrot.lane.b32.xlu0 %v4765_v17, %s5102_s17 }
0x19d2   : > { %2811 = vrot.lane.b32.xlu1 %v4767_v18, %s5103_s24 }
0x1a48   : > { %v2693_v10 = vpop.xlane.xlu0 %2692 }
0x1a49   : > { %v2697_v11 = vsub.f32 %v2689_v6, %v2693_v10 }
0x1a4a   : > { %v2696_v12 = vpop.xlane.xlu1 %2695 }
0x1a4b   : > { %v2699_v13 = vmul.f32 1.442695, %v2697_v11  ;;  %v2698_v14 = vsub.f32 %v2690_v8, %v2696_v12 }
0x1a4c   : > { %v2711_v15 = vpop.permute.xlu0 %2710 }
0x1a4d   : > { %4215 = vpow2.f32 %v2699_v13  ;;  %v2701_v20 = vmul.f32 1.442695, %v2698_v14  ;;  %v2716_v21 = vsel %vm455_vm8, %v2711_v15, 0  ;;  %v3579_v13 = vcombine.low %v4933_v34, %v4933_v34 }
0x1a4e   : > { %3956 = vmatpush3.bf16.msra.mxu1 %v2716_v21  ;;  %v2814_v25 = vpop.permute.xlu1 %2813 }
0x1a4f   : > { %4217 = vpow2.f32 %v2701_v20  ;;  %3967 = vmatprep.subr.bf16.mxu1 %v4315_v1  ;;  %v2819_v28 = vsel %vm377_vm5, %v2814_v25, 0  ;;  %v2942_v14 = vrot.slane %v3579_v13, 2 }
0x1a51   : > { %v2947_v15 = vsel %vm641_vm9, %v2942_v14, 0 }
0x1a52   : > { %v2812_v29 = vpop.permute.xlu1 %2811 }
0x1a57   : > { %v4216_v22 = vpop.eup %4215 }
0x1a58   : > { %v2703_v23 = vsel %vm425_vm6, %v4216_v22, 0.0 }
0x1a59   : > { %v4218_v24 = vpop.eup %4217  ;;  %2704 = vadd.xlane.f32.xlu1 %v2703_v23 }
0x1a5a   : > { %v2706_v26 = vsel %vm427_vm7, %v4218_v24, 0.0  ;;  %v2709_v27 = vpack.c.bf16 %v4218_v24, %v4216_v22 }
0x1a5b   : > { %2707 = vadd.xlane.f32.xlu0 %v2706_v26 }
0x1a5c   : > { %3958 = vmatmul.mubr.msk.bf16.vlgmr.msra.gmra.mrb[80].mxu1 %vm425_vm6, %v2709_v27 }
0x1a5d   : > { %3968 = vmatpush3.bf16.xpose.msra.mxu1 %v2819_v28  ;;  %3969 = vmatprep.mubr.msk.bf16.mxu1 %vm4316_vm0, %v4315_v1 }
0x1a5e   : > { %3979 = vmatprep.subr.bf16.mxu1 %v4315_v1 }
0x1a64   : > { %3970 = vmatmul.mubr.msk.bf16.vlgmr.msra.gmra.mrb[84].mxu1 %vm377_vm5, %v2812_v29 }
0x1a65   : > { %3981 = vmatprep.mubr.msk.bf16.mxu1 %vm4316_vm0, %v4315_v1  ;;  %3980 = vmatpush3.bf16.msra.mxu1 %v2947_v15 }
0x1a66   : > { %3991 = vmatprep.subr.bf16.mxu1 %v4315_v1 }
0x1a6a   : > { %2885 = vrot.lane.b32.xlu1 %v4765_v17, %s5104_s25 }
0x1a6e   : > { %2990 = vrot.lane.b32.xlu1 %v4767_v18, %s5105_s26 }
0x1a83   : > { %v2629_v30 = vpop.f32.mrb[76].mxu1 }
0x1a84   : > { %v3947_v31 = vpop.f32.mrb[77].mxu1 }
0x1a85   : > { %v2631_v32 = vpop.f32.mrb[78].mxu1 }
0x1a86   : > { %v4928_v33 = vadd.f32 %v2631_v32, %v4892_v50  ;;  %v3948_v16 = vpop.f32.mrb[79].mxu1 }
0x1ae6   : > { %v2705_v36 = vpop.xlane.xlu1 %2704 }
0x1ae7   : > { %4219 = vrcp.f32 %v2705_v36 }
0x1ae8   : > { %v2708_v19 = vpop.xlane.xlu0 %2707 }
0x1ae9   : > { %4221 = vrcp.f32 %v2708_v19 }
0x1aea   : > { %v2886_v47 = vpop.permute.xlu1 %2885 }
0x1aeb   : > { %v2891_v49 = vsel %vm455_vm8, %v2886_v47, 0 }
0x1aee   : > { %v2991_v7 = vpop.permute.xlu1 %2990 }
0x1af1   : > { %v4220_v39 = vpop.eup %4219 }
0x1af3   : > { %v4222_v41 = vpop.eup %4221 }
0x1b2f   : > { %v2752_v37 = vpop.f32.mrb[80].mxu1 }
0x1b30   : > { %v3959_v40 = vpop.f32.mrb[81].mxu1  ;;  %v2761_v44 = vmul.f32 %v4220_v39, %v2752_v37 }
0x1b31   : > { %v2755_v42 = vpop.f32.mrb[82].mxu1 }
0x1b32   : > { %v2762_v45 = vmul.f32 %v4222_v41, %v2755_v42  ;;  %v3960_v46 = vpop.f32.mrb[83].mxu1 }
0x1b34   : > { %v2763_v48 = vpack.c.bf16 %v2762_v45, %v2761_v44 }
0x1b36   : > { %3964 = vmatmul.mubr.msk.bf16.vlgmr.msra.gmra.mrb[80].mxu0 %vm377_vm5, %v2763_v48 }
0x1b37   : > { %3974 = vmatpush3.bf16.msra.mxu0 %v2891_v49  ;;  %v2855_v50 = vpop.f32.mrb[84].mxu1  ;;  %3975 = vmatprep.mubr.msk.bf16.mxu0 %vm4316_vm0, %v4315_v1 }
0x1b38   : > { %2862 = vst.msk [vmem:[#allocation3] sm:$0xff] %vm425_vm6, %v2855_v50  ;;  %v3971_v51 = vpop.f32.mrb[85].mxu1  ;;  %3985 = vmatprep.subr.bf16.mxu0 %v4315_v1 }
0x1b39   : > { %v2858_v52 = vpop.f32.mrb[86].mxu1 }
0x1b3a   : > { %2863 = vst.msk [vmem:[#allocation3 + $0x8] sm:$0x3] %vm427_vm7, %v2858_v52  ;;  %v3972_v53 = vpop.f32.mrb[87].mxu1 }
0x1b3f   : > { %v2864_v54 = vld [vmem:[#allocation3] sm:$0xff] }
0x1b40   : > { %v2866_v55 = vsel %vm425_vm6, %v2864_v54, -inf }
0x1b41   : > { %2867 = vmax.xlane.f32.xlu0 %v2866_v55  ;;  %v2865_v57 = vld [vmem:[#allocation3 + $0x8] sm:$0x3] }
0x1b42   : > { %v2869_v58 = vsel %vm427_vm7, %v2865_v57, -inf }
0x1b45   : > { %2870 = vmax.xlane.f32.xlu0 %v2869_v58 }
0x1b5b   : > { %2992 = vrot.lane.b32.xlu0 %v4765_v17, %s5106_s4 }
0x1bce   : > { %v2868_v59 = vpop.xlane.xlu0 %2867 }
0x1bcf   : > { %v2872_v60 = vsub.f32 %v2864_v54, %v2868_v59 }
0x1bd1   : > { %v2874_v61 = vmul.f32 1.442695, %v2872_v60  ;;  %v1863_v60 = vld [vmem:[%s5084_s1 + $0x5c] sm:$0xf] }
0x1bd2   : > { %v2871_v43 = vpop.xlane.xlu0 %2870 }
0x1bd3   : > { %4223 = vpow2.f32 %v2874_v61  ;;  %v2873_v62 = vsub.f32 %v2865_v57, %v2871_v43  ;;  %v3122_v61 = vsel %vm641_vm9, %v1863_v60, 0 }
0x1bd5   : > { %v2876_v63 = vmul.f32 1.442695, %v2873_v62 }
0x1bd6   : > { %v2993_v4 = vpop.permute.xlu0 %2992 }
0x1bd7   : > { %4225 = vpow2.f32 %v2876_v63  ;;  %v2998_v6 = vsel %vm377_vm5, %v2993_v4, 0 }
0x1bdd   : > { %v4224_v0 = vpop.eup %4223 }
0x1bde   : > { %v2878_v2 = vsel %vm425_vm6, %v4224_v0, 0.0 }
0x1bdf   : > { %2879 = vadd.xlane.f32.xlu1 %v2878_v2 }
0x1be1   : > { %v4226_v3 = vpop.eup %4225 }
0x1be2   : > { %v2881_v56 = vsel %vm427_vm7, %v4226_v3, 0.0  ;;  %v2884_v5 = vpack.c.bf16 %v4226_v3, %v4224_v0 }
0x1be3   : > { %2882 = vadd.xlane.f32.xlu0 %v2881_v56 }
0x1be4   : > { %3976 = vmatmul.mubr.msk.bf16.vlgmr.msra.gmra.mrb[84].mxu0 %vm425_vm6, %v2884_v5 }
0x1be5   : > { %3986 = vmatpush3.bf16.xpose.msra.mxu0 %v2998_v6  ;;  %3987 = vmatprep.mubr.msk.bf16.mxu0 %vm4316_vm0, %v4315_v1 }
0x1be6   : > { %3997 = vmatprep.subr.bf16.mxu0 %v4315_v1 }
0x1bec   : > { %3988 = vmatmul.mubr.msk.bf16.vlgmr.msra.gmra.mrb[88].mxu0 %vm377_vm5, %v2991_v7 }
0x1bed   : > { %3999 = vmatprep.mubr.msk.bf16.mxu0 %vm4316_vm0, %v4315_v1  ;;  %3998 = vmatpush3.bf16.msra.mxu0 %v3122_v61 }
0x1bee   : > { %4009 = vmatprep.subr.bf16.mxu0 %v4315_v1 }
0x1c09   : > { %v2804_v8 = vpop.f32.mrb[80].mxu0 }
0x1c0a   : > { %v3965_v9 = vpop.f32.mrb[81].mxu0 }
0x1c0b   : > { %v2806_v10 = vpop.f32.mrb[82].mxu0 }
0x1c0c   : > { %v4960_v11 = vadd.f32 %v2806_v10, %v4928_v33  ;;  %v3966_v12 = vpop.f32.mrb[83].mxu0 }
0x1c6c   : > { %v2880_v20 = vpop.xlane.xlu1 %2879 }
0x1c6d   : > { %4227 = vrcp.f32 %v2880_v20 }
0x1c70   : > { %v2883_v21 = vpop.xlane.xlu0 %2882 }
0x1c71   : > { %4229 = vrcp.f32 %v2883_v21 }
0x1c77   : > { %v4228_v23 = vpop.eup %4227 }
0x1c7b   : > { %v4230_v25 = vpop.eup %4229 }
0x1cb7   : > { %v2927_v22 = vpop.f32.mrb[84].mxu0 }
0x1cb8   : > { %v3977_v24 = vpop.f32.mrb[85].mxu0  ;;  %v2936_v27 = vmul.f32 %v4228_v23, %v2927_v22 }
0x1cb9   : > { %v2930_v26 = vpop.f32.mrb[86].mxu0 }
0x1cba   : > { %v2937_v28 = vmul.f32 %v4230_v25, %v2930_v26  ;;  %v3978_v29 = vpop.f32.mrb[87].mxu0 }
0x1cbc   : > { %v2938_v30 = vpack.c.bf16 %v2937_v28, %v2936_v27 }
0x1cbe   : > { %3982 = vmatmul.mubr.msk.bf16.vlgmr.msra.gmra.mrb[88].mxu1 %vm377_vm5, %v2938_v30 }
0x1cbf   : > { %v3034_v31 = vpop.f32.mrb[88].mxu0  ;;  %3993 = vmatprep.mubr.msk.bf16.mxu1 %vm4316_vm0, %v4315_v1 }
0x1cc0   : > { %3041 = vst.msk [vmem:[#allocation3] sm:$0xff] %vm425_vm6, %v3034_v31  ;;  %v3989_v32 = vpop.f32.mrb[89].mxu0 }
0x1cc1   : > { %v3037_v33 = vpop.f32.mrb[90].mxu0 }
0x1cc2   : > { %3042 = vst.msk [vmem:[#allocation3 + $0x8] sm:$0x3] %vm427_vm7, %v3037_v33  ;;  %v3990_v16 = vpop.f32.mrb[91].mxu0 }
0x1cc7   : > { %v3043_v34 = vld [vmem:[#allocation3] sm:$0xff] }
0x1cc8   : > { %v3045_v35 = vsel %vm425_vm6, %v3043_v34, -inf }
0x1cc9   : > { %3046 = vmax.xlane.f32.xlu0 %v3045_v35  ;;  %v3044_v36 = vld [vmem:[#allocation3 + $0x8] sm:$0x3] }
0x1cca   : > { %v3048_v19 = vsel %vm427_vm7, %v3044_v36, -inf }
0x1ccb   : > { %3049 = vmax.xlane.f32.xlu1 %v3048_v19 }
0x1cdc   : > { %3167 = vrot.lane.b32.xlu1 %v4765_v17, %s5107_s20 }
0x1cdf   : > { %3064 = vrot.lane.b32.xlu0 %v4765_v17, %s5108_s19  ;;  %s3592_s19 = sshll.u32 %s4382_s16, 4  ;;  %s3441_s16 = scalar_lea.sflag [#allocation5], %s159_s30 }
0x1ce0   : > { %3165 = vrot.lane.b32.xlu1 %v4767_v18, %s5109_s27  ;;  %s160_s27 = scalar_lea.vmem [#allocation4], %s159_s30  ;;  %s5041_s7 = scalar_lea.hbm %s5086_s3, %s3592_s19 }
0x1d56   : > { %v3047_v37 = vpop.xlane.xlu0 %3046 }
0x1d57   : > { %v3051_v39 = vsub.f32 %v3043_v34, %v3047_v37 }
0x1d58   : > { %v3050_v40 = vpop.xlane.xlu1 %3049 }
0x1d59   : > { %v3053_v41 = vmul.f32 1.442695, %v3051_v39  ;;  %v3052_v42 = vsub.f32 %v3044_v36, %v3050_v40  ;;  %v3586_v36 = vcombine.low %v1863_v60, %v1863_v60 }
0x1d5a   : > { %v3065_v44 = vpop.permute.xlu0 %3064 }
0x1d5b   : > { %4231 = vpow2.f32 %v3053_v41  ;;  %v3055_v45 = vmul.f32 1.442695, %v3052_v42  ;;  %v3070_v46 = vsel %vm455_vm8, %v3065_v44, 0  ;;  %v3296_v19 = vrot.slane %v3586_v36, 2 }
0x1d5c   : > { %3992 = vmatpush3.bf16.msra.mxu1 %v3070_v46  ;;  %v3168_v50 = vpop.permute.xlu1 %3167 }
0x1d5d   : > { %4233 = vpow2.f32 %v3055_v45  ;;  %4003 = vmatprep.subr.bf16.mxu1 %v4315_v1  ;;  %v3173_v52 = vsel %vm377_vm5, %v3168_v50, 0  ;;  %v3301_v37 = vsel %vm641_vm9, %v3296_v19, 0 }
0x1d60   : > { %v3166_v53 = vpop.permute.xlu1 %3165 }
0x1d65   : > { %v4232_v47 = vpop.eup %4231 }
0x1d66   : > { %v3057_v48 = vsel %vm425_vm6, %v4232_v47, 0.0 }
0x1d67   : > { %v4234_v49 = vpop.eup %4233  ;;  %3058 = vadd.xlane.f32.xlu1 %v3057_v48 }
0x1d68   : > { %v3060_v18 = vsel %vm427_vm7, %v4234_v49, 0.0  ;;  %v3063_v51 = vpack.c.bf16 %v4234_v49, %v4232_v47 }
0x1d69   : > { %3061 = vadd.xlane.f32.xlu0 %v3060_v18 }
0x1d6a   : > { %3994 = vmatmul.mubr.msk.bf16.vlgmr.msra.gmra.mrb[92].mxu1 %vm425_vm6, %v3063_v51 }
0x1d6b   : > { %4004 = vmatpush3.bf16.xpose.msra.mxu1 %v3173_v52  ;;  %4005 = vmatprep.mubr.msk.bf16.mxu1 %vm4316_vm0, %v4315_v1  ;;  %v3588_v52 = vld [vmem:[%s5085_s2 + $0x9] ss:$0 sm:$0xff] }
0x1d6c   : > { %4015 = vmatprep.subr.bf16.mxu1 %v4315_v1 }
0x1d72   : > { %4006 = vmatmul.mubr.msk.bf16.vlgmr.msra.gmra.mrb[96].mxu1 %vm377_vm5, %v3166_v53 }
0x1d73   : > { %4017 = vmatprep.mubr.msk.bf16.mxu1 %vm4316_vm0, %v4315_v1  ;;  %4016 = vmatpush3.bf16.msra.mxu1 %v3301_v37 }
0x1d78   : > { %3239 = vrot.lane.b32.xlu1 %v4765_v17, %s5110_s5  ;;  %s3453_s5 = sshll.u32 %s160_s27, 4  ;;  %s5043_s5 = int_to_ptr.vmem [resolvable:$true] %s3453_s5 }
0x1d79   : > { %s4251_s8 = scalar_lea.vmem %s5043_s5, 16  ;;  %p4258_p0 = scmp.lt.s32.totalorder %s5043_s5, %s4256_s10 }
0x1d7a   : > { %p4252_p11 = scmp.ne.s32.totalorder %s5043_s5, %s4251_s8  ;;  %p4259_p1 = scmp.lt.s32.totalorder %s4257_s11, %s4251_s8 }
0x1d7c   : > { %p4253_p12 = pnand %p4252_p11, %p4399_p5  ;;  %p4260_p2 = por %p4259_p1, %p4258_p0 }
0x1d7e   : > { %p4254_p13 = pneg %p4253_p12 }
0x1d80   : > { %p4261_p3 = pnand %p4260_p2, %p4254_p13 }
0x1d91   : > { %v2983_v54 = vpop.f32.mrb[88].mxu1 }
0x1d92   : > { %v3983_v55 = vpop.f32.mrb[89].mxu1 }
0x1d93   : > { %v2985_v57 = vpop.f32.mrb[90].mxu1 }
0x1d94   : > { %v2989_v58 = vadd.f32 %v2985_v57, %v4960_v11  ;;  %v3984_v59 = vpop.f32.mrb[91].mxu1 }
0x1df4   : > { %v3059_v43 = vpop.xlane.xlu1 %3058 }
0x1df5   : > { %4235 = vrcp.f32 %v3059_v43 }
0x1df6   : > { %v3062_v62 = vpop.xlane.xlu0 %3061 }
0x1df7   : > { %4237 = vrcp.f32 %v3062_v62 }
0x1df8   : > { %v3240_v6 = vpop.permute.xlu1 %3239 }
0x1df9   : > { %v3245_v8 = vsel %vm455_vm8, %v3240_v6, 0 }
0x1dff   : > { %v4236_v63 = vpop.eup %4235 }
0x1e01   : > { %v4238_v2 = vpop.eup %4237 }
0x1e3d   : > { %v3106_v17 = vpop.f32.mrb[92].mxu1 }
0x1e3e   : > { %v3995_v0 = vpop.f32.mrb[93].mxu1  ;;  %v3115_v4 = vmul.f32 %v4236_v63, %v3106_v17  ;;  %v4109_v63 = vld [vmem:[%s5084_s1 + $0x60] sm:$0xff]  }
0x1e3f   : > { %v3109_v3 = vpop.f32.mrb[94].mxu1  ;;  %v4110_v0 = vld [vmem:[%s5084_s1 + $0x68] sm:$0xff]  }
0x1e40   : > { %v3116_v56 = vmul.f32 %v4238_v2, %v3109_v3  ;;  %v3996_v5 = vpop.f32.mrb[95].mxu1 }
0x1e42   : > { %v3117_v7 = vpack.c.bf16 %v3116_v56, %v3115_v4  ;;  %v3350_v4 = vld [vmem:[%s5085_s2 + $0xa] sm:$0x1]  ;;  %v3351_v56 = vld [vmem:[%s5085_s2 + $0xb] sm:$0x1] }
0x1e43   : > { %v3367_v5 = vrot.slane %v3350_v4, 7 }
0x1e44   : > { %4000 = vmatmul.mubr.msk.bf16.vlgmr.msra.gmra.mrb[92].mxu0 %vm377_vm5, %v3117_v7 }
0x1e45   : > { %4010 = vmatpush3.bf16.msra.mxu0 %v3245_v8  ;;  %v3209_v9 = vpop.f32.mrb[96].mxu1  ;;  %4011 = vmatprep.mubr.msk.bf16.mxu0 %vm4316_vm0, %v4315_v1  ;;  %v3371_v8 = vrot.slane %v3351_v56, 7 }
0x1e46   : > { %3216 = vst.msk [vmem:[#allocation3] sm:$0xff] %vm425_vm6, %v3209_v9  ;;  %v4007_v10 = vpop.f32.mrb[97].mxu1  ;;  %4021 = vmatprep.subr.bf16.mxu0 %v4315_v1 }
0x1e47   : > { %v3212_v11 = vpop.f32.mrb[98].mxu1 }
0x1e48   : > { %3217 = vst.msk [vmem:[#allocation3 + $0x8] sm:$0x3] %vm427_vm7, %v3212_v11  ;;  %v4008_v12 = vpop.f32.mrb[99].mxu1 }
0x1e49   : > { %v3379_v12 = vld [vmem:[%s5085_s2 + $0xc] sm:$0x1] }
0x1e4d   : > { %v3218_v13 = vld [vmem:[#allocation3] sm:$0xff] }
0x1e4e   : > { %v3220_v14 = vsel %vm425_vm6, %v3218_v13, -inf }
0x1e4f   : > { %3221 = vmax.xlane.f32.xlu0 %v3220_v14  ;;  %v3219_v15 = vld [vmem:[#allocation3 + $0x8] sm:$0x3] }
0x1e50   : > { %v3223_v20 = vsel %vm427_vm7, %v3219_v15, -inf }
0x1e53   : > { %3224 = vmax.xlane.f32.xlu0 %v3223_v20 }
0x1edc   : > { %v3222_v21 = vpop.xlane.xlu0 %3221 }
0x1edd   : > { %v3226_v22 = vsub.f32 %v3218_v13, %v3222_v21 }
0x1edf   : > { %v3228_v23 = vmul.f32 1.442695, %v3226_v22 }
0x1ee0   : > { %v3225_v24 = vpop.xlane.xlu0 %3224 }
0x1ee1   : > { %4239 = vpow2.f32 %v3228_v23  ;;  %v3227_v25 = vsub.f32 %v3219_v15, %v3225_v24 }
0x1ee3   : > { %v3230_v26 = vmul.f32 1.442695, %v3227_v25 }
0x1ee5   : > { %4241 = vpow2.f32 %v3230_v26 }
0x1eeb   : > { %v4240_v27 = vpop.eup %4239 }
0x1eec   : > { %v3232_v28 = vsel %vm425_vm6, %v4240_v27, 0.0 }
0x1eed   : > { %3233 = vadd.xlane.f32.xlu0 %v3232_v28 }
0x1eef   : > { %v4242_v29 = vpop.eup %4241 }
0x1ef0   : > { %v3235_v30 = vsel %vm427_vm7, %v4242_v29, 0.0  ;;  %v3238_v31 = vpack.c.bf16 %v4242_v29, %v4240_v27 }
0x1ef1   : > { %3236 = vadd.xlane.f32.xlu0 %v3235_v30 }
0x1ef2   : > { %4012 = vmatmul.mubr.msk.bf16.vlgmr.msra.gmra.mrb[96].mxu0 %vm425_vm6, %v3238_v31 }
0x1ef3   : > { %4025 = vmatprep.mubr.msk.bf16.mxu0 %vm4316_vm0, %v4315_v1  ;;  %4022 = vmatpush3.bf16.msra.mxu0 %v4109_v63 }
0x1ef4   : > { %4023 = vmatprep.subr.bf16.mxu0 %v4315_v1 }
0x1ef7   : > { %4024 = vmatpush3.bf16.msra.mxu0 %v4110_v0 }
0x1f17   : > { %v3158_v32 = vpop.f32.mrb[92].mxu0 }
0x1f18   : > { %v4001_v33 = vpop.f32.mrb[93].mxu0 }
0x1f19   : > { %v3160_v16 = vpop.f32.mrb[94].mxu0 }
0x1f1a   : > { %v3164_v34 = vadd.f32 %v3160_v16, %v2989_v58  ;;  %v4002_v35 = vpop.f32.mrb[95].mxu0 }
0x1f7a   : > { %v3234_v39 = vpop.xlane.xlu0 %3233 }
0x1f7b   : > { %4243 = vrcp.f32 %v3234_v39 }
0x1f7e   : > { %v3237_v40 = vpop.xlane.xlu0 %3236 }
0x1f7f   : > { %4245 = vrcp.f32 %v3237_v40 }
0x1f85   : > { %v4244_v42 = vpop.eup %4243 }
0x1f89   : > { %v4246_v45 = vpop.eup %4245 }
0x1fc5   : > { %v3281_v41 = vpop.f32.mrb[96].mxu0 }
0x1fc6   : > { %v4013_v44 = vpop.f32.mrb[97].mxu0  ;;  %v3290_v47 = vmul.f32 %v4244_v42, %v3281_v41 }
0x1fc7   : > { %v3284_v46 = vpop.f32.mrb[98].mxu0 }
0x1fc8   : > { %v3291_v48 = vmul.f32 %v4246_v45, %v3284_v46  ;;  %v4014_v49 = vpop.f32.mrb[99].mxu0 }
0x1fca   : > { %v3292_v50 = vpack.c.bf16 %v3291_v48, %v3290_v47 }
0x1fcc   : > { %4018 = vmatmul.mubr.msk.bf16.vlgmr.msra.gmra.mrb[100].mxu1 %vm377_vm5, %v3292_v50 }
0x209f   : > { %v3337_v18 = vpop.f32.mrb[100].mxu1 }
0x20a0   : > { %v4019_v51 = vpop.f32.mrb[101].mxu1 }
0x20a1   : > { %v3339_v53 = vpop.f32.mrb[102].mxu1 }
0x20a2   : > { %v3343_v54 = vadd.f32 %v3339_v53, %v3164_v34  ;;  %v4020_v55 = vpop.f32.mrb[103].mxu1 }
0x20a4   : > { %v3348_v57 = vadd.f32 %v3588_v52, %v3343_v54 }
0x20a6   : > { %v3349_v58 = vadd.f32 %v3348_v57, %v4737_v38 }
0x20a8   : > { %v3353_v59 = vsel %vm3352_vm10, %v3349_v58, 0.0 }
0x20a9   : > { %3354 = vadd.xlane.f32.xlu0 %v3353_v59 }
0x2136   : > { %v3355_v60 = vpop.xlane.xlu0 %3354 }
0x2137   : > { %v3356_v61 = vmul.f32 0.03125, %v3355_v60 }
0x2139   : > { %v3357_v43 = vsub.f32 %v3349_v58, %v3356_v61 }
0x213b   : > { %v3358_v62 = vmul.f32 %v3357_v43, %v3357_v43 }
0x213d   : > { %v3359_v17 = vsel %vm3352_vm10, %v3358_v62, 0.0 }
0x213e   : > { %3360 = vadd.xlane.f32.xlu0 %v3359_v17 }
0x21cb   : > { %v3361_v38 = vpop.xlane.xlu0 %3360 }
0x21cc   : > { %v3362_v2 = vmul.f32 0.03125, %v3361_v38 }
0x21ce   : > { %v3363_v3 = vadd.f32 1e-05, %v3362_v2 }
0x21d0   : > { %4247 = vrsqrt.f32 %v3363_v3 }
0x21da   : > { %v4248_v6 = vpop.eup %4247 }
0x21db   : > { %v3365_v7 = vmul.f32 %v4248_v6, %v3357_v43 }
0x21dd   : > { %v3369_v1 = vmul.f32 %v3367_v5, %v3365_v7 }
0x21df   : > { %v3373_v9 = vadd.f32 %v3371_v8, %v3369_v1 }
0x21e1   : > { %v3374_v10 = vpack.c.bf16 %v3373_v9, %v3373_v9 }
0x21e3   : > { %v3381_v11 = vshrl.u32 %v3374_v10, 16 }
0x21e5   : > { %4026 = vmatmul.mubr.msk.bf16.vlgmr.msra.gmra.mrb[100].mxu0 %vm249_vm3, %v3381_v11 }
0x22b8   : > { %v3432_v13 = vpop.f32.mrb[100].mxu0 }
0x22b9   : > { %v3433_v14 = vadd.f32 %v3432_v13, %v3379_v12  ;;  %v4027_v15 = vpop.f32.mrb[101].mxu0 }
0x22ba   : > { %v3435_v20 = vpop.f32.mrb[102].mxu0 }
0x22bb   : > { %v4028_v21 = vpop.f32.mrb[103].mxu0  ;;  %3439 = vst.msk [vmem:[%s160_s27] sm:$0x1] %vm3438_vm11, %v3433_v14 }
0x22bc   : > { %4264 = shalt.err (!%p4261_p3)
}
0x22bd   : > { %s4265_s17 = scalar_lea.hbm %s5041_s7, 16  ;;  %s4269_s26 = scalar_lea.hbm %s5086_s3, 32 }
0x22be   : > { %p4266_p4 = scmp.ne.s32.totalorder %s5041_s7, %s4265_s17  ;;  %p4270_p9 = scmp.lt.u32.totalorder %s5041_s7, %s5086_s3 }
0x22bf   : > { %p4271_p10 = scmp.lt.u32.totalorder %s4269_s26, %s4265_s17  ;;  %p4273_p12 = scmp.lt.u32.totalorder %s4265_s17, %s5041_s7 }
0x22c0   : > { %p4267_p7 = pnand %p4266_p4, %p4399_p5 }
0x22c1   : > { %p4272_p11 = por %p4271_p10, %p4270_p9 }
0x22c2   : > { %p4268_p8 = pneg %p4267_p7 }
0x22c3   : > { %p4274_p13 = por %p4273_p12, %p4272_p11 }
0x22c5   : > { %p4275_p0 = pnand %p4274_p13, %p4268_p8 }
0x22c7   : > { %4278 = shalt.err (!%p4275_p0)
}
0x22c8   : > { %4029 = dma.vmem_to_hbm [thread:$0]  (%p4399_p5), %s5043_s5, 16, %s5041_s7, %s3441_s16  }
0x22c9 PF: > { %p4035_p1 = scmp.ge.s32.totalorder %s4313_s15, 2  ;;  %s3465_s4 = sand.u32 1, %s4301_s12  }
0x22ca   : > { %s3466_s20 = scalar_lea.sflag [#allocation5], %s3465_s4 }
0x22cb   : > { %p4032_p2 = pnand %p4035_p1, %p4403_p6 }
0x22cd   : > { %4296 = dma.done.wait (!%p4032_p2), %s3466_s20, 16  }
0x22ce   : > { %4298 = vsyncadd (!%p4032_p2), %s3466_s20, 4294967280  ;;  %p13_p3 = scmp.ge.s32.totalorder %s4386_s18, 4   ;;  %s5111_s12 = smov %s4305_s13 }
0x22cf   : > { %s5112_s13 = smov %s4309_s14  ;;  %s5113_s14 = smov %s4397_s21 }
0x22d0   : > { %s5114_s15 = smov %s4386_s18  ;;  %15 = sbr.rel (!%p13_p3) target bundleno = 3 (0x3), region = 67 }
0x22d7   :  { %3470 = vsyncpa [#allocation5], 1 }
0x22d8   :  { %3472 = vsyncpa [#allocation5 + $0x1], 1 }

</bundles_post_ra>
